<compile_context>
chip_gen: v6e
topology: v6e:2x2x1
jax: 0.10.0
libtpu: 0.0.40
codegen_flags: <defaults>
</compile_context>

<pallas_src>
import functools

import jax
import jax.numpy as jnp
from jax import lax
from jax.experimental import pallas as pl
from jax.experimental.pallas import tpu as pltpu


# ----------------------------------------------------------------------------
# BlockSpec helper: one grid step, whole-array blocks (everything is small and
# VMEM-resident; block_shape == full array dims satisfies the (8,128) rule).
# ----------------------------------------------------------------------------
def _full_spec(shape):
    nd = len(shape)
    return pl.BlockSpec(shape, lambda i, _nd=nd: (0,) * _nd)


_ARB = pltpu.CompilerParams(dimension_semantics=("arbitrary",))


# ============================================================================
# The single fused kernel
# ============================================================================
def _nlgnn2_kernel(a_ref, x_ref, *refs, n_layers, K, N):
    it = iter(refs)
    gcn = [(next(it), next(it)) for _ in range(n_layers)]       # (W, b) per GCN layer
    proj_w_ref = next(it)      # [1, C]
    proj_b_ref = next(it)      # [1, 1]
    c1w_ref = next(it)         # [K*C, C]  (im2col-packed conv1 weight)
    c1b_ref = next(it)         # [1, C]
    c2w_ref = next(it)         # [K*C, C]
    c2b_ref = next(it)         # [1, C]
    lw1_ref = next(it)         # [C, C]   (lin weight, h1 half)
    lw2_ref = next(it)         # [C, C]   (lin weight, h2 half)
    lb_ref = next(it)          # [1, C]
    out_ref = next(it)         # [N, C]   output
    xcat_ref = next(it)        # [N, K*C] VMEM scratch for im2col

    # ---------------- GCN stack: adjacency loaded once, h stays in VMEM -------------
    a = a_ref[...]
    h = x_ref[...]
    for i in range(n_layers):
        w = gcn[i][0][...]
        b = gcn[i][1][...]
        d_in, d_out = w.shape
        if d_in <= d_out:
            # (A @ h) @ W  — the N^2 term contracts over the smaller dim
            h = jnp.dot(jnp.dot(a, h, preferred_element_type=jnp.float32), w,
                        preferred_element_type=jnp.float32) + b
        else:
            h = jnp.dot(a, jnp.dot(h, w, preferred_element_type=jnp.float32),
                        preferred_element_type=jnp.float32) + b
        if i < n_layers - 1:
            h = jnp.maximum(h, 0.0)          # ReLU on all but the last GCN layer
        # dropout1 is identity in eval mode
    h1 = h                                    # [N, C]
    C = h1.shape[1]

    # ---------------- projection score, both orientations from ONE MXU pass ---------
    # g_lanes[i, j] = sum_c pw[c] * h1[j, c]  (same value in every row i)
    pw_b = jnp.broadcast_to(proj_w_ref[...], (N, C))
    g_lanes = lax.dot_general(pw_b, h1, (((1,), (1,)), ((), ())),
                              preferred_element_type=jnp.float32)           # [N, N]
    iota_r = lax.broadcasted_iota(jnp.int32, (N, N), 0)
    iota_c = lax.broadcasted_iota(jnp.int32, (N, N), 1)
    # diagonal -> same per-node values in sublane orientation (bit-identical to g_lanes)
    g_col = jnp.sum(jnp.where(iota_r == iota_c, g_lanes, 0.0),
                    axis=-1, keepdims=True)                                 # [N, 1]

    # ---------------- rank permutation in-kernel (replaces jnp.argsort) -------------
    # key(i) < key(j)  <=>  g[i] < g[j]  or (g[i] == g[j] and i < j)   (stable ascending)
    # TODO(synk): jnp.argsort/torch.sort — torch.sort is not guaranteed stable; tied
    #             scores may order differently than PyTorch (only matters with exact ties).
    eq = g_col == g_lanes
    cmp = jnp.logical_or(g_col < g_lanes, jnp.logical_and(eq, iota_r < iota_c))
    cmpT = jnp.logical_or(g_lanes < g_col, jnp.logical_and(eq, iota_c < iota_r))
    rank_row = jnp.sum(cmp.astype(jnp.float32), axis=0, keepdims=True)      # [1, N]
    rank_col = jnp.sum(cmpT.astype(jnp.float32), axis=-1, keepdims=True)    # [N, 1]
    # perm[r, j]  = 1 iff rank[j] == r  (sort gather);  permT = its transpose, built
    # directly from rank_col -> no materialized NxN transpose on the critical path.
    perm = (iota_r == rank_row.astype(jnp.int32)).astype(jnp.float32)
    permT = (iota_c == rank_col.astype(jnp.int32)).astype(jnp.float32)

    # sorted_x = g_score_sorted * h1[sorted_idx]  ==  perm @ (g_score * h1)
    g_score = g_col + proj_b_ref[...]
    xs = jnp.dot(perm, g_score * h1, preferred_element_type=jnp.float32)    # [N, C]

    # ---------------- im2col 'same' Conv1d: one depth-K*C matmul per conv ------------
    pad = (K - 1) // 2
    row_ids = lax.broadcasted_iota(jnp.int32, (N, 1), 0)
    taps = []                         # hoisted (shift, mask) pairs, shared by both convs
    for k in range(K):
        d = k - pad
        if d == 0:
            taps.append((0, None))
        else:
            valid = jnp.logical_and(row_ids + d >= 0, row_ids + d < N)
            taps.append((d, valid))

    def im2col(v):
        # pack K shifted/masked copies along lanes into the [N, K*C] scratch
        for k, (d, valid) in enumerate(taps):
            if d == 0:
                xcat_ref[:, k * C:(k + 1) * C] = v
            else:
                rolled = pltpu.roll(v, shift=(-d) % N, axis=0)   # XLU sublane rotate
                xcat_ref[:, k * C:(k + 1) * C] = jnp.where(valid, rolled, 0.0)
        return xcat_ref[...]

    c1 = jnp.maximum(jnp.dot(im2col(xs), c1w_ref[...],
                             preferred_element_type=jnp.float32) + c1b_ref[...], 0.0)
    # dropout2 is identity in eval mode
    c2 = jnp.dot(im2col(c1), c2w_ref[...],
                 preferred_element_type=jnp.float32) + c2b_ref[...]

    # h2 = c2[inverse_idx]  ==  permT @ c2   (plain NN matmul, no transpose)
    # TODO(synk): the reference indexes with inverse_idx of shape [N,1] which would break
    #             torch.cat; the intended squeezed gather is used here.
    h2 = jnp.dot(permT, c2, preferred_element_type=jnp.float32)

    # lin(concat([h1, h2], dim=1))  ==  h1 @ W1 + h2 @ W2 + b
    out_ref[...] = (jnp.dot(h1, lw1_ref[...], preferred_element_type=jnp.float32)
                    + jnp.dot(h2, lw2_ref[...], preferred_element_type=jnp.float32)
                    + lb_ref[...])


# ----------------------------------------------------------------------------
# Wrapper: ONE pallas_call for the whole forward
# ----------------------------------------------------------------------------
def nlgnn2_forward(x, a_norm, params, kernel_size):
    n = x.shape[0]
    c_out = params["gcn_w"][-1].shape[1]
    n_layers = len(params["gcn_w"])

    ins = [a_norm, x]
    for w, b in zip(params["gcn_w"], params["gcn_b"]):
        ins += [w, b]
    ins += [params["proj_w"], params["proj_b"],
            params["conv1_w"], params["conv1_b"],
            params["conv2_w"], params["conv2_b"],
            params["lin_w1"], params["lin_w2"], params["lin_b"]]

    flops = 0
    for w in params["gcn_w"]:
        d_in, d_out = w.shape
        flops += 2 * n * n * min(d_in, d_out) + 2 * n * d_in * d_out
    flops += 2 * n * n * c_out                       # score matmul
    flops += 2 * (2 * n * n * c_out)                 # perm gather / scatter matmuls
    flops += 2 * (2 * n * (kernel_size * c_out) * c_out)   # two im2col convs
    flops += 2 * (2 * n * c_out * c_out)             # fused concat-Linear
    bytes_accessed = sum(int(v.size) * v.dtype.itemsize for v in ins) + 4 * n * c_out

    return pl.pallas_call(
        functools.partial(_nlgnn2_kernel, n_layers=n_layers, K=kernel_size, N=n),
        grid=(1,),
        out_shape=jax.ShapeDtypeStruct((n, c_out), jnp.float32),
        in_specs=[_full_spec(v.shape) for v in ins],
        out_specs=_full_spec((n, c_out)),
        scratch_shapes=[pltpu.VMEM((n, kernel_size * c_out), jnp.float32)],
        compiler_params=_ARB,
        cost_estimate=pl.CostEstimate(flops=int(flops), transcendentals=0,
                                      bytes_accessed=int(bytes_accessed)),
    )(*ins)


# ----------------------------------------------------------------------------
# JAX glue: GCN normalized adjacency (A + I with symmetric deg^-1/2 scaling)
# ----------------------------------------------------------------------------
def build_gcn_adj(edge_index, n):
    src, dst = edge_index[0], edge_index[1]
    loops = jnp.arange(n, dtype=src.dtype)
    src = jnp.concatenate([src, loops])
    dst = jnp.concatenate([dst, loops])
    a = jnp.zeros((n, n), jnp.float32).at[dst, src].add(1.0)
    deg = a.sum(axis=1)
    dinv = jnp.where(deg > 0, 1.0 / jnp.sqrt(deg), 0.0)
    return a * dinv[:, None] * dinv[None, :]


# ----------------------------------------------------------------------------
# Deterministic parameter construction
# ----------------------------------------------------------------------------
def make_params(key, n_gnn_layers, in_dim, hid_dim, out_dim, kernel_size):
    keys = jax.random.split(key, 4 * n_gnn_layers + 10)
    ki = iter(range(len(keys)))

    gcn_w, gcn_b = [], []
    d_in = in_dim
    d_hid = hid_dim
    for i in range(n_gnn_layers):
        if i == n_gnn_layers - 1:
            d_hid = out_dim
        gcn_w.append(0.2 * jax.random.normal(keys[next(ki)], (d_in, d_hid), jnp.float32))
        gcn_b.append(0.05 * jax.random.normal(keys[next(ki)], (1, d_hid), jnp.float32))
        d_in = d_hid

    # proj: Linear(out_dim, 1) stored as a [1, out_dim] row
    proj_w = 0.2 * jax.random.normal(keys[next(ki)], (1, out_dim), jnp.float32)
    proj_b = 0.05 * jax.random.normal(keys[next(ki)], (1, 1), jnp.float32)

    # conv1d weights: PyTorch [C_out, C_in, K] -> im2col-packed [K*C_in, C_out]
    def conv_w(k):
        w = 0.2 * jax.random.normal(k, (out_dim, out_dim, kernel_size), jnp.float32)
        w = jnp.transpose(w, (2, 1, 0))                 # [K, C_in, C_out]
        return w.reshape(kernel_size * out_dim, out_dim)

    conv1_w = conv_w(keys[next(ki)])
    conv1_b = 0.05 * jax.random.normal(keys[next(ki)], (1, out_dim), jnp.float32)
    conv2_w = conv_w(keys[next(ki)])
    conv2_b = 0.05 * jax.random.normal(keys[next(ki)], (1, out_dim), jnp.float32)

    # lin: Linear(2*out_dim, out_dim), weight [out_dim, 2*out_dim] split into two halves
    lin_w = 0.2 * jax.random.normal(keys[next(ki)], (out_dim, 2 * out_dim), jnp.float32)
    lin_b = 0.05 * jax.random.normal(keys[next(ki)], (1, out_dim), jnp.float32)
    lin_w1 = jnp.transpose(lin_w[:, :out_dim])          # [out_dim, out_dim]
    lin_w2 = jnp.transpose(lin_w[:, out_dim:])          # [out_dim, out_dim]

    return dict(gcn_w=gcn_w, gcn_b=gcn_b, proj_w=proj_w, proj_b=proj_b,
                conv1_w=conv1_w, conv1_b=conv1_b, conv2_w=conv2_w, conv2_b=conv2_b,
                lin_w1=lin_w1, lin_w2=lin_w2, lin_b=lin_b)


# ----------------------------------------------------------------------------
# Pure-JAX reference (mirrors the kernel's contraction order so the check can be tight)
# ----------------------------------------------------------------------------
def _ref_forward(x, a_norm, params, kernel_size):
    h = x
    n_layers = len(params["gcn_w"])
    for i in range(n_layers):
        w = params["gcn_w"][i]
        b = params["gcn_b"][i]
        if w.shape[0] <= w.shape[1]:
            h = (a_norm @ h) @ w + b
        else:
            h = a_norm @ (h @ w) + b
        if i < n_layers - 1:
            h = jnp.maximum(h, 0.0)
    h1 = h
    g = jnp.sum(h1 * params["proj_w"], axis=-1, keepdims=True) + params["proj_b"]
    order = jnp.argsort(g[:, 0])
    inverse = jnp.argsort(order)
    xs = (g * h1)[order]

    n, c = h1.shape
    K = kernel_size
    pad = (K - 1) // 2
    w1 = params["conv1_w"].reshape(K, c, c)
    w2 = params["conv2_w"].reshape(K, c, c)

    def conv(v, w, b):
        vp = jnp.pad(v, ((pad, pad), (0, 0)))
        acc = b
        for k in range(K):
            acc = acc + vp[k:k + n] @ w[k]
        return acc

    c1 = jnp.maximum(conv(xs, w1, params["conv1_b"]), 0.0)
    c2 = conv(c1, w2, params["conv2_b"])
    h2 = c2[inverse]
    return h1 @ params["lin_w1"] + h2 @ params["lin_w2"] + params["lin_b"]


# ----------------------------------------------------------------------------
if __name__ == "__main__":
    N = 128            # nodes
    IN_DIM = 16
    HID_DIM = 32
    OUT_DIM = 32
    N_GNN_LAYERS = 3
    KERNEL = 3         # odd -> 'same' padding, matches int((kernel-1)/2)

    key = jax.random.PRNGKey(0)
    k_x, k_p = jax.random.split(key)

    # Deterministic node features and a simple symmetric ring graph.
    x = jax.random.normal(k_x, (N, IN_DIM), jnp.float32)
    src = jnp.arange(N, dtype=jnp.int32)
    dst = (src + 1) % N
    edge_index = jnp.stack([jnp.concatenate([src, dst]),
                            jnp.concatenate([dst, src])], axis=0)  # [2, 2N]

    a_norm = build_gcn_adj(edge_index, N)
    params = make_params(k_p, N_GNN_LAYERS, IN_DIM, HID_DIM, OUT_DIM, KERNEL)

    # --- single fused forward ---
    fwd = jax.jit(functools.partial(nlgnn2_forward, kernel_size=KERNEL))
    out = fwd(x, a_norm, params)
    jax.block_until_ready(out)
    assert out.shape == (N, OUT_DIM), out.shape
    assert bool(jnp.all(jnp.isfinite(out)))

    # --- correctness check vs pure-JAX reference (tightened tolerance: catches
    #     permutation/layout bugs, allows f32 MXU multi-pass rounding differences) ---
    out_ref = _ref_forward(x, a_norm, params, KERNEL)
    err = float(jnp.max(jnp.abs(out - out_ref)))
    scale = float(jnp.max(jnp.abs(out_ref))) + 1e-6
    assert err <= 3e-4 * scale + 1e-5, (err, scale)

    print("KERNEL_OK")
</pallas_src>

<mosaic_0001>
module attributes {stable_mosaic.version = 11 : i64} {
  func.func @_nlgnn2_kernel(%arg0: i32, %arg1: memref<128x128xf32, #tpu.memory_space<vmem>>, %arg2: memref<128x16xf32, #tpu.memory_space<vmem>>, %arg3: memref<16x32xf32, #tpu.memory_space<vmem>>, %arg4: memref<1x32xf32, #tpu.memory_space<vmem>>, %arg5: memref<32x32xf32, #tpu.memory_space<vmem>>, %arg6: memref<1x32xf32, #tpu.memory_space<vmem>>, %arg7: memref<32x32xf32, #tpu.memory_space<vmem>>, %arg8: memref<1x32xf32, #tpu.memory_space<vmem>>, %arg9: memref<1x32xf32, #tpu.memory_space<vmem>>, %arg10: memref<1x1xf32, #tpu.memory_space<vmem>>, %arg11: memref<96x32xf32, #tpu.memory_space<vmem>>, %arg12: memref<1x32xf32, #tpu.memory_space<vmem>>, %arg13: memref<96x32xf32, #tpu.memory_space<vmem>>, %arg14: memref<1x32xf32, #tpu.memory_space<vmem>>, %arg15: memref<32x32xf32, #tpu.memory_space<vmem>>, %arg16: memref<32x32xf32, #tpu.memory_space<vmem>>, %arg17: memref<1x32xf32, #tpu.memory_space<vmem>>, %arg18: memref<128x32xf32, #tpu.memory_space<vmem>>, %arg19: memref<128x96xf32, #tpu.memory_space<vmem>>) attributes {dimension_semantics = [#tpu.dimension_semantics<arbitrary>], iteration_bounds = array<i64: 1>, scalar_prefetch = 0 : i64, scratch_operands = 1 : i64, tpu.core_type = #tpu.core_type<tc>, window_params = [{pipeline_mode = #tpu.pipeline_mode<synchronous>, transform_indices = @transform_0, window_bounds = array<i64: 128, 128>}, {pipeline_mode = #tpu.pipeline_mode<synchronous>, transform_indices = @transform_1, window_bounds = array<i64: 128, 16>}, {pipeline_mode = #tpu.pipeline_mode<synchronous>, transform_indices = @transform_2, window_bounds = array<i64: 16, 32>}, {pipeline_mode = #tpu.pipeline_mode<synchronous>, transform_indices = @transform_3, window_bounds = array<i64: 1, 32>}, {pipeline_mode = #tpu.pipeline_mode<synchronous>, transform_indices = @transform_4, window_bounds = array<i64: 32, 32>}, {pipeline_mode = #tpu.pipeline_mode<synchronous>, transform_indices = @transform_5, window_bounds = array<i64: 1, 32>}, {pipeline_mode = #tpu.pipeline_mode<synchronous>, transform_indices = @transform_6, window_bounds = array<i64: 32, 32>}, {pipeline_mode = #tpu.pipeline_mode<synchronous>, transform_indices = @transform_7, window_bounds = array<i64: 1, 32>}, {pipeline_mode = #tpu.pipeline_mode<synchronous>, transform_indices = @transform_8, window_bounds = array<i64: 1, 32>}, {pipeline_mode = #tpu.pipeline_mode<synchronous>, transform_indices = @transform_9, window_bounds = array<i64: 1, 1>}, {pipeline_mode = #tpu.pipeline_mode<synchronous>, transform_indices = @transform_10, window_bounds = array<i64: 96, 32>}, {pipeline_mode = #tpu.pipeline_mode<synchronous>, transform_indices = @transform_11, window_bounds = array<i64: 1, 32>}, {pipeline_mode = #tpu.pipeline_mode<synchronous>, transform_indices = @transform_12, window_bounds = array<i64: 96, 32>}, {pipeline_mode = #tpu.pipeline_mode<synchronous>, transform_indices = @transform_13, window_bounds = array<i64: 1, 32>}, {pipeline_mode = #tpu.pipeline_mode<synchronous>, transform_indices = @transform_14, window_bounds = array<i64: 32, 32>}, {pipeline_mode = #tpu.pipeline_mode<synchronous>, transform_indices = @transform_15, window_bounds = array<i64: 32, 32>}, {pipeline_mode = #tpu.pipeline_mode<synchronous>, transform_indices = @transform_16, window_bounds = array<i64: 1, 32>}, {pipeline_mode = #tpu.pipeline_mode<synchronous>, transform_indices = @transform_17, window_bounds = array<i64: 128, 32>}]} {
    %c0 = arith.constant 0 : index
    %c0_0 = arith.constant 0 : index
    %0 = vector.load %arg1[%c0, %c0_0] : memref<128x128xf32, #tpu.memory_space<vmem>>, vector<128x128xf32>
    %c0_1 = arith.constant 0 : index
    %c0_2 = arith.constant 0 : index
    %1 = vector.load %arg2[%c0_1, %c0_2] : memref<128x16xf32, #tpu.memory_space<vmem>>, vector<128x16xf32>
    %c0_3 = arith.constant 0 : index
    %c0_4 = arith.constant 0 : index
    %2 = vector.load %arg3[%c0_3, %c0_4] : memref<16x32xf32, #tpu.memory_space<vmem>>, vector<16x32xf32>
    %c0_5 = arith.constant 0 : index
    %c0_6 = arith.constant 0 : index
    %3 = vector.load %arg4[%c0_5, %c0_6] : memref<1x32xf32, #tpu.memory_space<vmem>>, vector<1x32xf32>
    %cst = arith.constant dense<0.000000e+00> : vector<128x16xf32>
    %4 = tpu.matmul %0, %1, %cst {dimension_numbers = #tpu.dot_dimension_numbers<[1], [0], [0], [1], [0, 0, 1, 1], [], []>} : vector<128x128xf32>, vector<128x16xf32>, vector<128x16xf32> -> vector<128x16xf32>
    %cst_7 = arith.constant dense<0.000000e+00> : vector<128x32xf32>
    %5 = tpu.matmul %4, %2, %cst_7 {dimension_numbers = #tpu.dot_dimension_numbers<[1], [0], [0], [1], [0, 0, 1, 1], [], []>} : vector<128x16xf32>, vector<16x32xf32>, vector<128x32xf32> -> vector<128x32xf32>
    %6 = vector.broadcast %3 : vector<1x32xf32> to vector<128x32xf32>
    %7 = arith.addf %5, %6 : vector<128x32xf32>
    %cst_8 = arith.constant 0.000000e+00 : f32
    %8 = vector.broadcast %cst_8 : f32 to vector<128x32xf32>
    %9 = arith.maximumf %7, %8 : vector<128x32xf32>
    %c0_9 = arith.constant 0 : index
    %c0_10 = arith.constant 0 : index
    %10 = vector.load %arg5[%c0_9, %c0_10] : memref<32x32xf32, #tpu.memory_space<vmem>>, vector<32x32xf32>
    %c0_11 = arith.constant 0 : index
    %c0_12 = arith.constant 0 : index
    %11 = vector.load %arg6[%c0_11, %c0_12] : memref<1x32xf32, #tpu.memory_space<vmem>>, vector<1x32xf32>
    %cst_13 = arith.constant dense<0.000000e+00> : vector<128x32xf32>
    %12 = tpu.matmul %0, %9, %cst_13 {dimension_numbers = #tpu.dot_dimension_numbers<[1], [0], [0], [1], [0, 0, 1, 1], [], []>} : vector<128x128xf32>, vector<128x32xf32>, vector<128x32xf32> -> vector<128x32xf32>
    %cst_14 = arith.constant dense<0.000000e+00> : vector<128x32xf32>
    %13 = tpu.matmul %12, %10, %cst_14 {dimension_numbers = #tpu.dot_dimension_numbers<[1], [0], [0], [1], [0, 0, 1, 1], [], []>} : vector<128x32xf32>, vector<32x32xf32>, vector<128x32xf32> -> vector<128x32xf32>
    %14 = vector.broadcast %11 : vector<1x32xf32> to vector<128x32xf32>
    %15 = arith.addf %13, %14 : vector<128x32xf32>
    %cst_15 = arith.constant 0.000000e+00 : f32
    %16 = vector.broadcast %cst_15 : f32 to vector<128x32xf32>
    %17 = arith.maximumf %15, %16 : vector<128x32xf32>
    %c0_16 = arith.constant 0 : index
    %c0_17 = arith.constant 0 : index
    %18 = vector.load %arg7[%c0_16, %c0_17] : memref<32x32xf32, #tpu.memory_space<vmem>>, vector<32x32xf32>
    %c0_18 = arith.constant 0 : index
    %c0_19 = arith.constant 0 : index
    %19 = vector.load %arg8[%c0_18, %c0_19] : memref<1x32xf32, #tpu.memory_space<vmem>>, vector<1x32xf32>
    %cst_20 = arith.constant dense<0.000000e+00> : vector<128x32xf32>
    %20 = tpu.matmul %0, %17, %cst_20 {dimension_numbers = #tpu.dot_dimension_numbers<[1], [0], [0], [1], [0, 0, 1, 1], [], []>} : vector<128x128xf32>, vector<128x32xf32>, vector<128x32xf32> -> vector<128x32xf32>
    %cst_21 = arith.constant dense<0.000000e+00> : vector<128x32xf32>
    %21 = tpu.matmul %20, %18, %cst_21 {dimension_numbers = #tpu.dot_dimension_numbers<[1], [0], [0], [1], [0, 0, 1, 1], [], []>} : vector<128x32xf32>, vector<32x32xf32>, vector<128x32xf32> -> vector<128x32xf32>
    %22 = vector.broadcast %19 : vector<1x32xf32> to vector<128x32xf32>
    %23 = arith.addf %21, %22 : vector<128x32xf32>
    %c0_22 = arith.constant 0 : index
    %c0_23 = arith.constant 0 : index
    %24 = vector.load %arg9[%c0_22, %c0_23] : memref<1x32xf32, #tpu.memory_space<vmem>>, vector<1x32xf32>
    %25 = vector.shape_cast %24 : vector<1x32xf32> to vector<1x32xf32>
    %26 = vector.broadcast %25 : vector<1x32xf32> to vector<128x32xf32>
    %cst_24 = arith.constant dense<0.000000e+00> : vector<128x128xf32>
    %27 = tpu.matmul %26, %23, %cst_24 {dimension_numbers = #tpu.dot_dimension_numbers<[1], [1], [0], [0], [0, 0, 1, 0], [], []>} : vector<128x32xf32>, vector<128x32xf32>, vector<128x128xf32> -> vector<128x128xf32>
    %28 = tpu.iota {dimensions = array<i32: 0>} : vector<128x128xi32>
    %29 = tpu.iota {dimensions = array<i32: 1>} : vector<128x128xi32>
    %30 = arith.cmpi eq, %28, %29 : vector<128x128xi32>
    %cst_25 = arith.constant 0.000000e+00 : f32
    %31 = vector.broadcast %cst_25 : f32 to vector<128x128xf32>
    %32 = arith.select %30, %27, %31 : vector<128x128xi1>, vector<128x128xf32>
    %cst_26 = arith.constant dense<0.000000e+00> : vector<128xf32>
    %33 = vector.multi_reduction <add>, %32, %cst_26 [1] : vector<128x128xf32> to vector<128xf32>
    %34 = vector.shape_cast %33 : vector<128xf32> to vector<128x1xf32>
    %35 = vector.broadcast %34 : vector<128x1xf32> to vector<128x128xf32>
    %36 = arith.cmpf oeq, %35, %27 : vector<128x128xf32>
    %37 = vector.broadcast %34 : vector<128x1xf32> to vector<128x128xf32>
    %38 = arith.cmpf olt, %37, %27 : vector<128x128xf32>
    %39 = arith.cmpi slt, %28, %29 : vector<128x128xi32>
    %40 = arith.andi %36, %39 : vector<128x128xi1>
    %41 = arith.ori %38, %40 : vector<128x128xi1>
    %42 = vector.broadcast %34 : vector<128x1xf32> to vector<128x128xf32>
    %43 = arith.cmpf olt, %27, %42 : vector<128x128xf32>
    %44 = arith.cmpi slt, %29, %28 : vector<128x128xi32>
    %45 = arith.andi %36, %44 : vector<128x128xi1>
    %46 = arith.ori %43, %45 : vector<128x128xi1>
    %47 = arith.extui %41 : vector<128x128xi1> to vector<128x128xi32>
    %48 = arith.sitofp %47 : vector<128x128xi32> to vector<128x128xf32>
    %cst_27 = arith.constant dense<0.000000e+00> : vector<128xf32>
    %49 = vector.multi_reduction <add>, %48, %cst_27 [0] : vector<128x128xf32> to vector<128xf32>
    %50 = vector.shape_cast %49 : vector<128xf32> to vector<1x128xf32>
    %51 = arith.extui %46 : vector<128x128xi1> to vector<128x128xi32>
    %52 = arith.sitofp %51 : vector<128x128xi32> to vector<128x128xf32>
    %cst_28 = arith.constant dense<0.000000e+00> : vector<128xf32>
    %53 = vector.multi_reduction <add>, %52, %cst_28 [1] : vector<128x128xf32> to vector<128xf32>
    %54 = vector.shape_cast %53 : vector<128xf32> to vector<128x1xf32>
    %55 = arith.fptosi %50 : vector<1x128xf32> to vector<1x128xi32>
    %56 = vector.broadcast %55 : vector<1x128xi32> to vector<128x128xi32>
    %57 = arith.cmpi eq, %28, %56 : vector<128x128xi32>
    %58 = arith.extui %57 : vector<128x128xi1> to vector<128x128xi32>
    %59 = arith.sitofp %58 : vector<128x128xi32> to vector<128x128xf32>
    %60 = arith.fptosi %54 : vector<128x1xf32> to vector<128x1xi32>
    %61 = vector.broadcast %60 : vector<128x1xi32> to vector<128x128xi32>
    %62 = arith.cmpi eq, %29, %61 : vector<128x128xi32>
    %63 = arith.extui %62 : vector<128x128xi1> to vector<128x128xi32>
    %64 = arith.sitofp %63 : vector<128x128xi32> to vector<128x128xf32>
    %c0_29 = arith.constant 0 : index
    %c0_30 = arith.constant 0 : index
    %65 = vector.load %arg10[%c0_29, %c0_30] : memref<1x1xf32, #tpu.memory_space<vmem>>, vector<1x1xf32>
    %66 = vector.broadcast %65 : vector<1x1xf32> to vector<128x1xf32>
    %67 = arith.addf %34, %66 : vector<128x1xf32>
    %68 = vector.broadcast %67 : vector<128x1xf32> to vector<128x32xf32>
    %69 = arith.mulf %68, %23 : vector<128x32xf32>
    %cst_31 = arith.constant dense<0.000000e+00> : vector<128x32xf32>
    %70 = tpu.matmul %59, %69, %cst_31 {dimension_numbers = #tpu.dot_dimension_numbers<[1], [0], [0], [1], [0, 0, 1, 1], [], []>} : vector<128x128xf32>, vector<128x32xf32>, vector<128x32xf32> -> vector<128x32xf32>
    %71 = tpu.iota {dimensions = array<i32: 0>} : vector<128x1xi32>
    %c-1_i32 = arith.constant -1 : i32
    %72 = vector.broadcast %c-1_i32 : i32 to vector<128x1xi32>
    %73 = arith.addi %71, %72 : vector<128x1xi32>
    %c0_i32 = arith.constant 0 : i32
    %74 = vector.broadcast %c0_i32 : i32 to vector<128x1xi32>
    %75 = arith.cmpi sge, %73, %74 : vector<128x1xi32>
    %c-1_i32_32 = arith.constant -1 : i32
    %76 = vector.broadcast %c-1_i32_32 : i32 to vector<128x1xi32>
    %77 = arith.addi %71, %76 : vector<128x1xi32>
    %c128_i32 = arith.constant 128 : i32
    %78 = vector.broadcast %c128_i32 : i32 to vector<128x1xi32>
    %79 = arith.cmpi slt, %77, %78 : vector<128x1xi32>
    %80 = arith.andi %75, %79 : vector<128x1xi1>
    %c1_i32 = arith.constant 1 : i32
    %81 = vector.broadcast %c1_i32 : i32 to vector<128x1xi32>
    %82 = arith.addi %71, %81 : vector<128x1xi32>
    %c0_i32_33 = arith.constant 0 : i32
    %83 = vector.broadcast %c0_i32_33 : i32 to vector<128x1xi32>
    %84 = arith.cmpi sge, %82, %83 : vector<128x1xi32>
    %c1_i32_34 = arith.constant 1 : i32
    %85 = vector.broadcast %c1_i32_34 : i32 to vector<128x1xi32>
    %86 = arith.addi %71, %85 : vector<128x1xi32>
    %c128_i32_35 = arith.constant 128 : i32
    %87 = vector.broadcast %c128_i32_35 : i32 to vector<128x1xi32>
    %88 = arith.cmpi slt, %86, %87 : vector<128x1xi32>
    %89 = arith.andi %84, %88 : vector<128x1xi1>
    %c1_i32_36 = arith.constant 1 : i32
    %90 = tpu.dynamic_rotate %70 by %c1_i32_36 dim 0 : vector<128x32xf32>, i32 -> vector<128x32xf32>
    %cst_37 = arith.constant 0.000000e+00 : f32
    %91 = vector.shape_cast %80 : vector<128x1xi1> to vector<128x1xi1>
    %92 = vector.broadcast %91 : vector<128x1xi1> to vector<128x32xi1>
    %93 = vector.broadcast %cst_37 : f32 to vector<128x32xf32>
    %94 = arith.select %92, %90, %93 : vector<128x32xi1>, vector<128x32xf32>
    %c0_38 = arith.constant 0 : index
    %c0_39 = arith.constant 0 : index
    %95 = vector.load %arg19[%c0_38, %c0_39] : memref<128x96xf32, #tpu.memory_space<vmem>>, vector<128x32xf32>
    tpu.vector_store %arg19[%c0_38, %c0_39], %94 {strides = array<i32>} : memref<128x96xf32, #tpu.memory_space<vmem>>, vector<128x32xf32>,
    %c0_40 = arith.constant 0 : index
    %c32 = arith.constant 32 : index
    %96 = vector.load %arg19[%c0_40, %c32] : memref<128x96xf32, #tpu.memory_space<vmem>>, vector<128x32xf32>
    tpu.vector_store %arg19[%c0_40, %c32], %70 {strides = array<i32>} : memref<128x96xf32, #tpu.memory_space<vmem>>, vector<128x32xf32>,
    %c127_i32 = arith.constant 127 : i32
    %97 = tpu.dynamic_rotate %70 by %c127_i32 dim 0 : vector<128x32xf32>, i32 -> vector<128x32xf32>
    %cst_41 = arith.constant 0.000000e+00 : f32
    %98 = vector.shape_cast %89 : vector<128x1xi1> to vector<128x1xi1>
    %99 = vector.broadcast %98 : vector<128x1xi1> to vector<128x32xi1>
    %100 = vector.broadcast %cst_41 : f32 to vector<128x32xf32>
    %101 = arith.select %99, %97, %100 : vector<128x32xi1>, vector<128x32xf32>
    %c0_42 = arith.constant 0 : index
    %c64 = arith.constant 64 : index
    %102 = vector.load %arg19[%c0_42, %c64] : memref<128x96xf32, #tpu.memory_space<vmem>>, vector<128x32xf32>
    tpu.vector_store %arg19[%c0_42, %c64], %101 {strides = array<i32>} : memref<128x96xf32, #tpu.memory_space<vmem>>, vector<128x32xf32>,
    %c0_43 = arith.constant 0 : index
    %c0_44 = arith.constant 0 : index
    %103 = vector.load %arg19[%c0_43, %c0_44] : memref<128x96xf32, #tpu.memory_space<vmem>>, vector<128x96xf32>
    %c0_45 = arith.constant 0 : index
    %c0_46 = arith.constant 0 : index
    %104 = vector.load %arg11[%c0_45, %c0_46] : memref<96x32xf32, #tpu.memory_space<vmem>>, vector<96x32xf32>
    %cst_47 = arith.constant dense<0.000000e+00> : vector<128x32xf32>
    %105 = tpu.matmul %103, %104, %cst_47 {dimension_numbers = #tpu.dot_dimension_numbers<[1], [0], [0], [1], [0, 0, 1, 1], [], []>} : vector<128x96xf32>, vector<96x32xf32>, vector<128x32xf32> -> vector<128x32xf32>
    %c0_48 = arith.constant 0 : index
    %c0_49 = arith.constant 0 : index
    %106 = vector.load %arg12[%c0_48, %c0_49] : memref<1x32xf32, #tpu.memory_space<vmem>>, vector<1x32xf32>
    %107 = vector.broadcast %106 : vector<1x32xf32> to vector<128x32xf32>
    %108 = arith.addf %105, %107 : vector<128x32xf32>
    %cst_50 = arith.constant 0.000000e+00 : f32
    %109 = vector.broadcast %cst_50 : f32 to vector<128x32xf32>
    %110 = arith.maximumf %108, %109 : vector<128x32xf32>
    %c1_i32_51 = arith.constant 1 : i32
    %111 = tpu.dynamic_rotate %110 by %c1_i32_51 dim 0 : vector<128x32xf32>, i32 -> vector<128x32xf32>
    %cst_52 = arith.constant 0.000000e+00 : f32
    %112 = vector.shape_cast %80 : vector<128x1xi1> to vector<128x1xi1>
    %113 = vector.broadcast %112 : vector<128x1xi1> to vector<128x32xi1>
    %114 = vector.broadcast %cst_52 : f32 to vector<128x32xf32>
    %115 = arith.select %113, %111, %114 : vector<128x32xi1>, vector<128x32xf32>
    %c0_53 = arith.constant 0 : index
    %c0_54 = arith.constant 0 : index
    %116 = vector.load %arg19[%c0_53, %c0_54] : memref<128x96xf32, #tpu.memory_space<vmem>>, vector<128x32xf32>
    tpu.vector_store %arg19[%c0_53, %c0_54], %115 {strides = array<i32>} : memref<128x96xf32, #tpu.memory_space<vmem>>, vector<128x32xf32>,
    %c0_55 = arith.constant 0 : index
    %c32_56 = arith.constant 32 : index
    %117 = vector.load %arg19[%c0_55, %c32_56] : memref<128x96xf32, #tpu.memory_space<vmem>>, vector<128x32xf32>
    tpu.vector_store %arg19[%c0_55, %c32_56], %110 {strides = array<i32>} : memref<128x96xf32, #tpu.memory_space<vmem>>, vector<128x32xf32>,
    %c127_i32_57 = arith.constant 127 : i32
    %118 = tpu.dynamic_rotate %110 by %c127_i32_57 dim 0 : vector<128x32xf32>, i32 -> vector<128x32xf32>
    %cst_58 = arith.constant 0.000000e+00 : f32
    %119 = vector.shape_cast %89 : vector<128x1xi1> to vector<128x1xi1>
    %120 = vector.broadcast %119 : vector<128x1xi1> to vector<128x32xi1>
    %121 = vector.broadcast %cst_58 : f32 to vector<128x32xf32>
    %122 = arith.select %120, %118, %121 : vector<128x32xi1>, vector<128x32xf32>
    %c0_59 = arith.constant 0 : index
    %c64_60 = arith.constant 64 : index
    %123 = vector.load %arg19[%c0_59, %c64_60] : memref<128x96xf32, #tpu.memory_space<vmem>>, vector<128x32xf32>
    tpu.vector_store %arg19[%c0_59, %c64_60], %122 {strides = array<i32>} : memref<128x96xf32, #tpu.memory_space<vmem>>, vector<128x32xf32>,
    %c0_61 = arith.constant 0 : index
    %c0_62 = arith.constant 0 : index
    %124 = vector.load %arg19[%c0_61, %c0_62] : memref<128x96xf32, #tpu.memory_space<vmem>>, vector<128x96xf32>
    %c0_63 = arith.constant 0 : index
    %c0_64 = arith.constant 0 : index
    %125 = vector.load %arg13[%c0_63, %c0_64] : memref<96x32xf32, #tpu.memory_space<vmem>>, vector<96x32xf32>
    %cst_65 = arith.constant dense<0.000000e+00> : vector<128x32xf32>
    %126 = tpu.matmul %124, %125, %cst_65 {dimension_numbers = #tpu.dot_dimension_numbers<[1], [0], [0], [1], [0, 0, 1, 1], [], []>} : vector<128x96xf32>, vector<96x32xf32>, vector<128x32xf32> -> vector<128x32xf32>
    %c0_66 = arith.constant 0 : index
    %c0_67 = arith.constant 0 : index
    %127 = vector.load %arg14[%c0_66, %c0_67] : memref<1x32xf32, #tpu.memory_space<vmem>>, vector<1x32xf32>
    %128 = vector.broadcast %127 : vector<1x32xf32> to vector<128x32xf32>
    %129 = arith.addf %126, %128 : vector<128x32xf32>
    %cst_68 = arith.constant dense<0.000000e+00> : vector<128x32xf32>
    %130 = tpu.matmul %64, %129, %cst_68 {dimension_numbers = #tpu.dot_dimension_numbers<[1], [0], [0], [1], [0, 0, 1, 1], [], []>} : vector<128x128xf32>, vector<128x32xf32>, vector<128x32xf32> -> vector<128x32xf32>
    %c0_69 = arith.constant 0 : index
    %c0_70 = arith.constant 0 : index
    %131 = vector.load %arg15[%c0_69, %c0_70] : memref<32x32xf32, #tpu.memory_space<vmem>>, vector<32x32xf32>
    %cst_71 = arith.constant dense<0.000000e+00> : vector<128x32xf32>
    %132 = tpu.matmul %23, %131, %cst_71 {dimension_numbers = #tpu.dot_dimension_numbers<[1], [0], [0], [1], [0, 0, 1, 1], [], []>} : vector<128x32xf32>, vector<32x32xf32>, vector<128x32xf32> -> vector<128x32xf32>
    %c0_72 = arith.constant 0 : index
    %c0_73 = arith.constant 0 : index
    %133 = vector.load %arg16[%c0_72, %c0_73] : memref<32x32xf32, #tpu.memory_space<vmem>>, vector<32x32xf32>
    %cst_74 = arith.constant dense<0.000000e+00> : vector<128x32xf32>
    %134 = tpu.matmul %130, %133, %cst_74 {dimension_numbers = #tpu.dot_dimension_numbers<[1], [0], [0], [1], [0, 0, 1, 1], [], []>} : vector<128x32xf32>, vector<32x32xf32>, vector<128x32xf32> -> vector<128x32xf32>
    %135 = arith.addf %132, %134 : vector<128x32xf32>
    %c0_75 = arith.constant 0 : index
    %c0_76 = arith.constant 0 : index
    %136 = vector.load %arg17[%c0_75, %c0_76] : memref<1x32xf32, #tpu.memory_space<vmem>>, vector<1x32xf32>
    %137 = vector.broadcast %136 : vector<1x32xf32> to vector<128x32xf32>
    %138 = arith.addf %135, %137 : vector<128x32xf32>
    %c0_77 = arith.constant 0 : index
    %c0_78 = arith.constant 0 : index
    %139 = vector.load %arg18[%c0_77, %c0_78] : memref<128x32xf32, #tpu.memory_space<vmem>>, vector<128x32xf32>
    tpu.vector_store %arg18[%c0_77, %c0_78], %138 {strides = array<i32>} : memref<128x32xf32, #tpu.memory_space<vmem>>, vector<128x32xf32>,
    return
  }
  func.func @transform_0(%arg0: i32) -> (i32, i32) {
    %c0_i32 = arith.constant 0 : i32
    %c0_i32_0 = arith.constant 0 : i32
    %c0_i32_1 = arith.constant 0 : i32
    return %c0_i32, %c0_i32_0 : i32, i32
  }
  func.func @transform_1(%arg0: i32) -> (i32, i32) {
    %c0_i32 = arith.constant 0 : i32
    %c0_i32_0 = arith.constant 0 : i32
    %c0_i32_1 = arith.constant 0 : i32
    return %c0_i32, %c0_i32_0 : i32, i32
  }
  func.func @transform_2(%arg0: i32) -> (i32, i32) {
    %c0_i32 = arith.constant 0 : i32
    %c0_i32_0 = arith.constant 0 : i32
    %c0_i32_1 = arith.constant 0 : i32
    return %c0_i32, %c0_i32_0 : i32, i32
  }
  func.func @transform_3(%arg0: i32) -> (i32, i32) {
    %c0_i32 = arith.constant 0 : i32
    %c0_i32_0 = arith.constant 0 : i32
    %c0_i32_1 = arith.constant 0 : i32
    return %c0_i32, %c0_i32_0 : i32, i32
  }
  func.func @transform_4(%arg0: i32) -> (i32, i32) {
    %c0_i32 = arith.constant 0 : i32
    %c0_i32_0 = arith.constant 0 : i32
    %c0_i32_1 = arith.constant 0 : i32
    return %c0_i32, %c0_i32_0 : i32, i32
  }
  func.func @transform_5(%arg0: i32) -> (i32, i32) {
    %c0_i32 = arith.constant 0 : i32
    %c0_i32_0 = arith.constant 0 : i32
    %c0_i32_1 = arith.constant 0 : i32
    return %c0_i32, %c0_i32_0 : i32, i32
  }
  func.func @transform_6(%arg0: i32) -> (i32, i32) {
    %c0_i32 = arith.constant 0 : i32
    %c0_i32_0 = arith.constant 0 : i32
    %c0_i32_1 = arith.constant 0 : i32
    return %c0_i32, %c0_i32_0 : i32, i32
  }
  func.func @transform_7(%arg0: i32) -> (i32, i32) {
    %c0_i32 = arith.constant 0 : i32
    %c0_i32_0 = arith.constant 0 : i32
    %c0_i32_1 = arith.constant 0 : i32
    return %c0_i32, %c0_i32_0 : i32, i32
  }
  func.func @transform_8(%arg0: i32) -> (i32, i32) {
    %c0_i32 = arith.constant 0 : i32
    %c0_i32_0 = arith.constant 0 : i32
    %c0_i32_1 = arith.constant 0 : i32
    return %c0_i32, %c0_i32_0 : i32, i32
  }
  func.func @transform_9(%arg0: i32) -> (i32, i32) {
    %c0_i32 = arith.constant 0 : i32
    %c0_i32_0 = arith.constant 0 : i32
    %c0_i32_1 = arith.constant 0 : i32
    return %c0_i32, %c0_i32_0 : i32, i32
  }
  func.func @transform_10(%arg0: i32) -> (i32, i32) {
    %c0_i32 = arith.constant 0 : i32
    %c0_i32_0 = arith.constant 0 : i32
    %c0_i32_1 = arith.constant 0 : i32
    return %c0_i32, %c0_i32_0 : i32, i32
  }
  func.func @transform_11(%arg0: i32) -> (i32, i32) {
    %c0_i32 = arith.constant 0 : i32
    %c0_i32_0 = arith.constant 0 : i32
    %c0_i32_1 = arith.constant 0 : i32
    return %c0_i32, %c0_i32_0 : i32, i32
  }
  func.func @transform_12(%arg0: i32) -> (i32, i32) {
    %c0_i32 = arith.constant 0 : i32
    %c0_i32_0 = arith.constant 0 : i32
    %c0_i32_1 = arith.constant 0 : i32
    return %c0_i32, %c0_i32_0 : i32, i32
  }
  func.func @transform_13(%arg0: i32) -> (i32, i32) {
    %c0_i32 = arith.constant 0 : i32
    %c0_i32_0 = arith.constant 0 : i32
    %c0_i32_1 = arith.constant 0 : i32
    return %c0_i32, %c0_i32_0 : i32, i32
  }
  func.func @transform_14(%arg0: i32) -> (i32, i32) {
    %c0_i32 = arith.constant 0 : i32
    %c0_i32_0 = arith.constant 0 : i32
    %c0_i32_1 = arith.constant 0 : i32
    return %c0_i32, %c0_i32_0 : i32, i32
  }
  func.func @transform_15(%arg0: i32) -> (i32, i32) {
    %c0_i32 = arith.constant 0 : i32
    %c0_i32_0 = arith.constant 0 : i32
    %c0_i32_1 = arith.constant 0 : i32
    return %c0_i32, %c0_i32_0 : i32, i32
  }
  func.func @transform_16(%arg0: i32) -> (i32, i32) {
    %c0_i32 = arith.constant 0 : i32
    %c0_i32_0 = arith.constant 0 : i32
    %c0_i32_1 = arith.constant 0 : i32
    return %c0_i32, %c0_i32_0 : i32, i32
  }
  func.func @transform_17(%arg0: i32) -> (i32, i32) {
    %c0_i32 = arith.constant 0 : i32
    %c0_i32_0 = arith.constant 0 : i32
    %c0_i32_1 = arith.constant 0 : i32
    return %c0_i32, %c0_i32_0 : i32, i32
  }
}

</mosaic_0001>

<bundles_post_ra>
// kernel: nlgnn2_forward.1
= control target key start
LH: loop header
LB: loop body
LE: loop exit
PB: predicated region body
PF: predicated region fallthrough
CT: control target
= control target key end

     0   :  { %vm244_vm0 = vcmask 130048   ;;  %vm7228_vm1 = vcmask 261120   ;;  %s5097_s28 = smov 64   ;;  %s7200_s1 = inlined_call_operand.vmem [shape: f32[128,16], index: 1, kind: input, shape index: {}]   ;;  %s7201_s0 = inlined_call_operand.vmem [shape: f32[128,128], index: 0, kind: input, shape index: {}]   ;;  %s7202_s2 = inlined_call_operand.vmem [shape: f32[16,32], index: 2, kind: input, shape index: {}]   ;;  %s7203_s4 = inlined_call_operand.vmem [shape: f32[32,32], index: 4, kind: input, shape index: {}]   ;;  %s7204_s3 = inlined_call_operand.vmem [shape: f32[1,32], index: 3, kind: input, shape index: {}]   ;;  %s7205_s6 = inlined_call_operand.vmem [shape: f32[32,32], index: 6, kind: input, shape index: {}]   ;;  %s7206_s5 = inlined_call_operand.vmem [shape: f32[1,32], index: 5, kind: input, shape index: {}]   ;;  %s7207_s8 = inlined_call_operand.vmem [shape: f32[1,32], index: 8, kind: input, shape index: {}]   ;;  %s7208_s7 = inlined_call_operand.vmem [shape: f32[1,32], index: 7, kind: input, shape index: {}]   ;;  %s7209_s9 = inlined_call_operand.<no memory space> [shape: f32[1,1], index: 9, kind: input, shape index: {}]   ;;  %s7210_s10 = inlined_call_operand.vmem [shape: f32[96,32], index: 10, kind: input, shape index: {}]   ;;  %s7211_s11 = inlined_call_operand.vmem [shape: f32[1,32], index: 11, kind: input, shape index: {}]   ;;  %s7212_s12 = inlined_call_operand.vmem [shape: f32[96,32], index: 12, kind: input, shape index: {}]   ;;  %s7213_s13 = inlined_call_operand.vmem [shape: f32[1,32], index: 13, kind: input, shape index: {}]   ;;  %s7214_s14 = inlined_call_operand.vmem [shape: f32[32,32], index: 14, kind: input, shape index: {}]   ;;  %s7215_s15 = inlined_call_operand.vmem [shape: f32[32,32], index: 15, kind: input, shape index: {}]   ;;  %s7216_s16 = inlined_call_operand.vmem [shape: f32[1,32], index: 16, kind: input, shape index: {}]   ;;  %s7217_s17 = inlined_call_operand.vmem [shape: f32[128,32], index: 17, kind: output, shape index: {}]  }
   0x1   :  { %7269 = sst [smem:[#allocation23_spill]] %s7200_s1  ;;  %v91_v32 = vld [vmem:[%s7202_s2 + $0x8] sm:$0xff]  ;;  %v90_v33 = vld [vmem:[%s7202_s2] sm:$0xff]  ;;  %v457_v50 = vld [vmem:[%s7203_s4 + $0x18] sm:$0xff] }
   0x2   :  { %7270 = sst [smem:[#allocation24_spill]] %s7201_s0  ;;  %4488 = vmatprep.subr.mxu1 %v91_v32  ;;  %v456_v51 = vld [vmem:[%s7203_s4 + $0x10] sm:$0xff]  ;;  %v455_v52 = vld [vmem:[%s7203_s4 + $0x8] sm:$0xff]  ;;  %v454_v53 = vld [vmem:[%s7203_s4] sm:$0xff] }
   0x3   :  { %s7271_s26 = sld [smem:[#allocation23_spill]]  ;;  %4489 = vmatpush3.msra.mxu1 %v91_v32 }
   0x4   :  { %s7272_s20 = sld [smem:[#allocation24_spill]]  ;;  %4490 = vmatprep.subr.mxu1 %v90_v33 }
   0x5   :  { %4491 = vmatpush3.msra.mxu1 %v90_v33 }
   0x9   :  { %v89_v0 = vld [vmem:[%s7271_s26 + $0x78] sm:$0xff]  ;;  %v88_v1 = vld [vmem:[%s7271_s26 + $0x70] sm:$0xff]  ;;  %v87_v2 = vld [vmem:[%s7271_s26 + $0x68] sm:$0xff] }
   0xa   :  { %4432 = vmatprep.subr.mxu0 %v89_v0  ;;  %v86_v3 = vld [vmem:[%s7271_s26 + $0x60] sm:$0xff]  ;;  %v85_v5 = vld [vmem:[%s7271_s26 + $0x58] sm:$0xff]  ;;  %v84_v6 = vld [vmem:[%s7271_s26 + $0x50] sm:$0xff] }
   0xb   :  { %4433 = vmatpush3.msra.mxu0 %v89_v0  ;;  %v5203_v4 = vld [vmem:[%s7272_s20] sm:$0xff]  ;;  %v83_v7 = vld [vmem:[%s7271_s26 + $0x48] sm:$0xff]  ;;  %v81_v9 = vld [vmem:[%s7271_s26 + $0x38] sm:$0xff] }
   0xc   :  { %4434 = vmatprep.subr.mxu0 %v88_v1  ;;  %4464 = vmatprep.mubr.f32.mxu0 %v5203_v4  ;;  %v82_v8 = vld [vmem:[%s7271_s26 + $0x40] sm:$0xff]  ;;  %v80_v10 = vld [vmem:[%s7271_s26 + $0x30] sm:$0xff]  ;;  %v79_v11 = vld [vmem:[%s7271_s26 + $0x28] sm:$0xff] }
   0xd   :  { %4435 = vmatpush3.msra.mxu0 %v88_v1  ;;  %v78_v12 = vld [vmem:[%s7271_s26 + $0x20] sm:$0xff]  ;;  %v77_v13 = vld [vmem:[%s7271_s26 + $0x18] sm:$0xff]  ;;  %v76_v14 = vld [vmem:[%s7271_s26 + $0x10] sm:$0xff] }
   0xe   :  { %4436 = vmatprep.subr.mxu0 %v87_v2  ;;  %v75_v15 = vld [vmem:[%s7271_s26 + $0x8] sm:$0xff]  ;;  %v74_v16 = vld [vmem:[%s7271_s26] sm:$0xff]  ;;  %v5250_v18 = vld [vmem:[%s7272_s20 + $0x10] sm:$0xff] }
   0xf   :  { %4437 = vmatpush3.msra.mxu0 %v87_v2  ;;  %v5245_v17 = vld [vmem:[%s7272_s20 + $0x8] sm:$0xff]  ;;  %v5257_v19 = vld [vmem:[%s7272_s20 + $0x18] sm:$0xff]  ;;  %v5262_v20 = vld [vmem:[%s7272_s20 + $0x20] sm:$0xff] }
  0x10   :  { %4438 = vmatprep.subr.mxu0 %v86_v3  ;;  %v5269_v21 = vld [vmem:[%s7272_s20 + $0x28] sm:$0xff]  ;;  %v5274_v22 = vld [vmem:[%s7272_s20 + $0x30] sm:$0xff]  ;;  %v5281_v23 = vld [vmem:[%s7272_s20 + $0x38] sm:$0xff] }
  0x11   :  { %4439 = vmatpush3.msra.mxu0 %v86_v3  ;;  %v5286_v24 = vld [vmem:[%s7272_s20 + $0x40] sm:$0xff]  ;;  %v5293_v25 = vld [vmem:[%s7272_s20 + $0x48] sm:$0xff]  ;;  %v5298_v26 = vld [vmem:[%s7272_s20 + $0x50] sm:$0xff] }
  0x12   :  { %4440 = vmatprep.subr.mxu0 %v85_v5  ;;  %v5305_v27 = vld [vmem:[%s7272_s20 + $0x58] sm:$0xff]  ;;  %v5310_v28 = vld [vmem:[%s7272_s20 + $0x60] sm:$0xff]  ;;  %v5317_v29 = vld [vmem:[%s7272_s20 + $0x68] sm:$0xff] }
  0x13   :  { %4441 = vmatpush3.msra.mxu0 %v85_v5  ;;  %v5322_v30 = vld [vmem:[%s7272_s20 + $0x70] sm:$0xff]  ;;  %v5329_v31 = vld [vmem:[%s7272_s20 + $0x78] sm:$0xff]  ;;  %v3838_v5 = vld [vmem:[%s7204_s3] ss:$0 sm:$0xff]  ;;  %s5096_s20 = smov 32  }
  0x14   :  { %4442 = vmatprep.subr.mxu0 %v84_v6 }
  0x15   :  { %4443 = vmatpush3.msra.mxu0 %v84_v6 }
  0x16   :  { %4444 = vmatprep.subr.mxu0 %v83_v7 }
  0x17   :  { %4445 = vmatpush3.msra.mxu0 %v83_v7 }
  0x18   :  { %4446 = vmatprep.subr.mxu0 %v82_v8 }
  0x19   :  { %4447 = vmatpush3.msra.mxu0 %v82_v8 }
  0x1a   :  { %4448 = vmatprep.subr.mxu0 %v81_v9 }
  0x1b   :  { %4449 = vmatpush3.msra.mxu0 %v81_v9 }
  0x1c   :  { %4450 = vmatprep.subr.mxu0 %v80_v10 }
  0x1d   :  { %4451 = vmatpush3.msra.mxu0 %v80_v10 }
  0x1e   :  { %4452 = vmatprep.subr.mxu0 %v79_v11 }
  0x1f   :  { %4453 = vmatpush3.msra.mxu0 %v79_v11 }
  0x20   :  { %4454 = vmatprep.subr.mxu0 %v78_v12 }
  0x21   :  { %4455 = vmatpush3.msra.mxu0 %v78_v12 }
  0x22   :  { %4456 = vmatprep.subr.mxu0 %v77_v13 }
  0x23   :  { %4457 = vmatpush3.msra.mxu0 %v77_v13 }
  0x24   :  { %4458 = vmatprep.subr.mxu0 %v76_v14 }
  0x25   :  { %4459 = vmatpush3.msra.mxu0 %v76_v14 }
  0x26   :  { %4460 = vmatprep.subr.mxu0 %v75_v15 }
  0x27   :  { %4461 = vmatpush3.msra.mxu0 %v75_v15 }
  0x28   :  { %4462 = vmatprep.subr.mxu0 %v74_v16 }
  0x29   :  { %4463 = vmatpush3.msra.mxu0 %v74_v16 }
  0x2a   :  { %4465 = vmatmul.mubr.f32.vlgmr.msra.gmra.mxu0 %v5245_v17  ;;  %4572 = vmatprep.subr.mxu0 %v457_v50 }
  0x2b   :  { %4467 = vmatprep.mubr.f32.mxu0 %v5250_v18  ;;  %4573 = vmatpush3.msra.mxu0 %v457_v50 }
  0x2c   :  { %4574 = vmatprep.subr.mxu0 %v456_v51 }
  0x2d   :  { %4575 = vmatpush3.msra.mxu0 %v456_v51 }
  0x2e   :  { %4468 = vmatmul.mubr.f32.gmra.mxu0 %v5257_v19  ;;  %4576 = vmatprep.subr.mxu0 %v455_v52 }
  0x2f   :  { %4470 = vmatprep.mubr.f32.mxu0 %v5262_v20  ;;  %4577 = vmatpush3.msra.mxu0 %v455_v52 }
  0x30   :  { %4578 = vmatprep.subr.mxu0 %v454_v53 }
  0x31   :  { %4579 = vmatpush3.msra.mxu0 %v454_v53 }
  0x32   :  { %4471 = vmatmul.mubr.f32.gmra.mxu0 %v5269_v21 }
  0x33   :  { %4473 = vmatprep.mubr.f32.mxu0 %v5274_v22 }
  0x36   :  { %4474 = vmatmul.mubr.f32.gmra.mxu0 %v5281_v23 }
  0x37   :  { %4476 = vmatprep.mubr.f32.mxu0 %v5286_v24 }
  0x3a   :  { %4477 = vmatmul.mubr.f32.gmra.mxu0 %v5293_v25 }
  0x3b   :  { %4479 = vmatprep.mubr.f32.mxu0 %v5298_v26 }
  0x3e   :  { %4480 = vmatmul.mubr.f32.gmra.mxu0 %v5305_v27 }
  0x3f   :  { %4482 = vmatprep.mubr.f32.mxu0 %v5310_v28 }
  0x42   :  { %4483 = vmatmul.mubr.f32.gmra.mxu0 %v5317_v29 }
  0x43   :  { %4485 = vmatprep.mubr.f32.mxu0 %v5322_v30 }
  0x46   :  { %4486 = vmatmul.mubr.f32.gmra.mxu0 %v5329_v31 }
  0xea   :  { %v4466_v34 = vpop.f32.mrf.mxu0 }
  0xec   :  { %v159_v35 = vpop.f32.mrf.mxu0 }
  0xed   :  { %4492 = vmatprep.mubr.msk.f32.mxu1 %vm244_vm0, %v159_v35 }
  0xee   :  { %v4469_v36 = vpop.f32.mrf.mxu0  ;;  %4493 = vmatmul.mubr.msk.f32.vlgmr.msra.gmra.mxu1 %vm244_vm0, %v4466_v34 }
  0xf0   :  { %v169_v37 = vpop.f32.mrf.mxu0 }
  0xf1   :  { %4495 = vmatprep.mubr.msk.f32.mxu1 %vm244_vm0, %v169_v37 }
  0xf2   :  { %v4472_v38 = vpop.f32.mrf.mxu0  ;;  %4496 = vmatmul.mubr.msk.f32.gmra.mxu1 %vm244_vm0, %v4469_v36 }
  0xf4   :  { %v179_v39 = vpop.f32.mrf.mxu0 }
  0xf5   :  { %4498 = vmatprep.mubr.msk.f32.mxu1 %vm244_vm0, %v179_v39 }
  0xf6   :  { %v4475_v40 = vpop.f32.mrf.mxu0  ;;  %4499 = vmatmul.mubr.msk.f32.gmra.mxu1 %vm244_vm0, %v4472_v38 }
  0xf8   :  { %v189_v41 = vpop.f32.mrf.mxu0 }
  0xf9   :  { %4501 = vmatprep.mubr.msk.f32.mxu1 %vm244_vm0, %v189_v41 }
  0xfa   :  { %v4478_v42 = vpop.f32.mrf.mxu0  ;;  %4502 = vmatmul.mubr.msk.f32.gmra.mxu1 %vm244_vm0, %v4475_v40 }
  0xfc   :  { %v199_v43 = vpop.f32.mrf.mxu0 }
  0xfd   :  { %4504 = vmatprep.mubr.msk.f32.mxu1 %vm244_vm0, %v199_v43 }
  0xfe   :  { %v4481_v44 = vpop.f32.mrf.mxu0  ;;  %4505 = vmatmul.mubr.msk.f32.gmra.mxu1 %vm244_vm0, %v4478_v42 }
 0x100   :  { %v209_v45 = vpop.f32.mrf.mxu0 }
 0x101   :  { %4507 = vmatprep.mubr.msk.f32.mxu1 %vm244_vm0, %v209_v45 }
 0x102   :  { %v4484_v46 = vpop.f32.mrf.mxu0  ;;  %4508 = vmatmul.mubr.msk.f32.gmra.mxu1 %vm244_vm0, %v4481_v44 }
 0x104   :  { %v219_v47 = vpop.f32.mrf.mxu0 }
 0x105   :  { %4510 = vmatprep.mubr.msk.f32.mxu1 %vm244_vm0, %v219_v47 }
 0x106   :  { %v4487_v48 = vpop.f32.mrf.mxu0  ;;  %4511 = vmatmul.mubr.msk.f32.gmra.mxu1 %vm244_vm0, %v4484_v46 }
 0x108   :  { %v229_v49 = vpop.f32.mrf.mxu0 }
 0x109   :  { %4513 = vmatprep.mubr.msk.f32.mxu1 %vm244_vm0, %v229_v49 }
 0x10a   :  { %4514 = vmatmul.mubr.msk.f32.gmra.mxu1 %vm244_vm0, %v4487_v48 }
 0x10b   :  { %4548 = vmatprep.mubr.f32.mxu1 %v5203_v4 }
 0x1ae   :  { %v5367_v54 = vpop.f32.mrf.mxu1 }
 0x1af   :  { %v365_v49 = vadd.f32 %v5367_v54, %v3838_v5 }
 0x1b0   :  { %v5369_v55 = vpop.f32.mrf.mxu1 }
 0x1b1   :  { %v360_v51 = vadd.f32 %v3838_v5, %v5369_v55  ;;  %v439_v53 = vmax.f32 %v365_v49, 0.0 }
 0x1b2   :  { %v4497_v56 = vpop.f32.mrf.mxu1 }
 0x1b3   :  { %v375_v45 = vadd.f32 %v4497_v56, %v3838_v5  ;;  %v438_v56 = vmax.f32 %v360_v51, 0.0 }
 0x1b4   :  { %v369_v57 = vpop.f32.mrf.mxu1 }
 0x1b5   :  { %v370_v47 = vadd.f32 %v3838_v5, %v369_v57  ;;  %v441_v50 = vmax.f32 %v375_v45, 0.0 }
 0x1b6   :  { %v4500_v58 = vpop.f32.mrf.mxu1 }
 0x1b7   :  { %v385_v41 = vadd.f32 %v4500_v58, %v3838_v5  ;;  %v440_v52 = vmax.f32 %v370_v47, 0.0 }
 0x1b8   :  { %v379_v59 = vpop.f32.mrf.mxu1 }
 0x1b9   :  { %v380_v43 = vadd.f32 %v3838_v5, %v379_v59  ;;  %v443_v46 = vmax.f32 %v385_v41, 0.0 }
 0x1ba   :  { %v4503_v60 = vpop.f32.mrf.mxu1 }
 0x1bb   :  { %v395_v37 = vadd.f32 %v4503_v60, %v3838_v5  ;;  %v442_v48 = vmax.f32 %v380_v43, 0.0 }
 0x1bc   :  { %v389_v61 = vpop.f32.mrf.mxu1 }
 0x1bd   :  { %v390_v39 = vadd.f32 %v3838_v5, %v389_v61  ;;  %v445_v42 = vmax.f32 %v395_v37, 0.0 }
 0x1be   :  { %v4506_v62 = vpop.f32.mrf.mxu1 }
 0x1bf   :  { %v405_v33 = vadd.f32 %v4506_v62, %v3838_v5  ;;  %v444_v44 = vmax.f32 %v390_v39, 0.0 }
 0x1c0   :  { %v399_v63 = vpop.f32.mrf.mxu1 }
 0x1c1   :  { %v400_v35 = vadd.f32 %v3838_v5, %v399_v63  ;;  %v447_v38 = vmax.f32 %v405_v33, 0.0 }
 0x1c2   :  { %v4509_v0 = vpop.f32.mrf.mxu1 }
 0x1c3   :  { %v415_v14 = vadd.f32 %v4509_v0, %v3838_v5  ;;  %v446_v40 = vmax.f32 %v400_v35, 0.0 }
 0x1c4   :  { %v409_v1 = vpop.f32.mrf.mxu1 }
 0x1c5   :  { %v410_v16 = vadd.f32 %v3838_v5, %v409_v1  ;;  %v449_v34 = vmax.f32 %v415_v14, 0.0 }
 0x1c6   :  { %v4512_v2 = vpop.f32.mrf.mxu1 }
 0x1c7   :  { %v425_v9 = vadd.f32 %v4512_v2, %v3838_v5  ;;  %v448_v36 = vmax.f32 %v410_v16, 0.0 }
 0x1c8   :  { %v419_v3 = vpop.f32.mrf.mxu1 }
 0x1c9   :  { %v420_v12 = vadd.f32 %v3838_v5, %v419_v3  ;;  %v451_v15 = vmax.f32 %v425_v9, 0.0  ;;  %v821_v9 = vld [vmem:[%s7205_s6 + $0x8] sm:$0xff] }
 0x1ca   :  { %v4515_v6 = vpop.f32.mrf.mxu1 }
 0x1cb   :  { %v435_v7 = vadd.f32 %v4515_v6, %v3838_v5  ;;  %v450_v32 = vmax.f32 %v420_v12, 0.0 }
 0x1cc   :  { %v429_v8 = vpop.f32.mrf.mxu1 }
 0x1cd   :  { %v453_v10 = vmax.f32 %v435_v7, 0.0  ;;  %v430_v11 = vadd.f32 %v3838_v5, %v429_v8  ;;  %v823_v7 = vld [vmem:[%s7205_s6 + $0x18] sm:$0xff]  ;;  %v822_v8 = vld [vmem:[%s7205_s6 + $0x10] sm:$0xff] }
 0x1ce   :  { %4660 = vmatprep.subr.mxu0 %v823_v7 }
 0x1cf   :  { %v452_v13 = vmax.f32 %v430_v11, 0.0  ;;  %4516 = vmatprep.subr.mxu1 %v453_v10 }
 0x1d0   :  { %4517 = vmatpush3.msra.mxu1 %v453_v10  ;;  %v820_v10 = vld [vmem:[%s7205_s6] sm:$0xff] }
 0x1d1   :  { %4518 = vmatprep.subr.mxu1 %v452_v13 }
 0x1d2   :  { %4519 = vmatpush3.msra.mxu1 %v452_v13 }
 0x1d3   :  { %4520 = vmatprep.subr.mxu1 %v451_v15 }
 0x1d4   :  { %4521 = vmatpush3.msra.mxu1 %v451_v15 }
 0x1d5   :  { %4522 = vmatprep.subr.mxu1 %v450_v32 }
 0x1d6   :  { %4523 = vmatpush3.msra.mxu1 %v450_v32 }
 0x1d7   :  { %4524 = vmatprep.subr.mxu1 %v449_v34 }
 0x1d8   :  { %4525 = vmatpush3.msra.mxu1 %v449_v34 }
 0x1d9   :  { %4526 = vmatprep.subr.mxu1 %v448_v36 }
 0x1da   :  { %4527 = vmatpush3.msra.mxu1 %v448_v36 }
 0x1db   :  { %4528 = vmatprep.subr.mxu1 %v447_v38 }
 0x1dc   :  { %4529 = vmatpush3.msra.mxu1 %v447_v38 }
 0x1dd   :  { %4530 = vmatprep.subr.mxu1 %v446_v40 }
 0x1de   :  { %4531 = vmatpush3.msra.mxu1 %v446_v40  ;;  %v3855_v40 = vld [vmem:[%s7206_s5] ss:$0 sm:$0xff] }
 0x1df   :  { %4532 = vmatprep.subr.mxu1 %v445_v42 }
 0x1e0   :  { %4533 = vmatpush3.msra.mxu1 %v445_v42 }
 0x1e1   :  { %4534 = vmatprep.subr.mxu1 %v444_v44 }
 0x1e2   :  { %4535 = vmatpush3.msra.mxu1 %v444_v44 }
 0x1e3   :  { %4536 = vmatprep.subr.mxu1 %v443_v46 }
 0x1e4   :  { %4537 = vmatpush3.msra.mxu1 %v443_v46 }
 0x1e5   :  { %4538 = vmatprep.subr.mxu1 %v442_v48 }
 0x1e6   :  { %4539 = vmatpush3.msra.mxu1 %v442_v48 }
 0x1e7   :  { %4540 = vmatprep.subr.mxu1 %v441_v50 }
 0x1e8   :  { %4541 = vmatpush3.msra.mxu1 %v441_v50 }
 0x1e9   :  { %4542 = vmatprep.subr.mxu1 %v440_v52 }
 0x1ea   :  { %4543 = vmatpush3.msra.mxu1 %v440_v52 }
 0x1eb   :  { %4544 = vmatprep.subr.mxu1 %v439_v53 }
 0x1ec   :  { %4545 = vmatpush3.msra.mxu1 %v439_v53 }
 0x1ed   :  { %4546 = vmatprep.subr.mxu1 %v438_v56 }
 0x1ee   :  { %4547 = vmatpush3.msra.mxu1 %v438_v56 }
 0x1ef   :  { %4549 = vmatmul.mubr.f32.vlgmr.msra.gmra.mxu1 %v5245_v17 }
 0x1f0   :  { %4551 = vmatprep.mubr.f32.mxu1 %v5250_v18 }
 0x1f3   :  { %4552 = vmatmul.mubr.f32.gmra.mxu1 %v5257_v19 }
 0x1f4   :  { %4554 = vmatprep.mubr.f32.mxu1 %v5262_v20 }
 0x1f7   :  { %4555 = vmatmul.mubr.f32.gmra.mxu1 %v5269_v21 }
 0x1f8   :  { %4557 = vmatprep.mubr.f32.mxu1 %v5274_v22 }
 0x1fb   :  { %4558 = vmatmul.mubr.f32.gmra.mxu1 %v5281_v23 }
 0x1fc   :  { %4560 = vmatprep.mubr.f32.mxu1 %v5286_v24 }
 0x1ff   :  { %4561 = vmatmul.mubr.f32.gmra.mxu1 %v5293_v25 }
 0x200   :  { %4563 = vmatprep.mubr.f32.mxu1 %v5298_v26 }
 0x203   :  { %4564 = vmatmul.mubr.f32.gmra.mxu1 %v5305_v27 }
 0x204   :  { %4566 = vmatprep.mubr.f32.mxu1 %v5310_v28 }
 0x207   :  { %4567 = vmatmul.mubr.f32.gmra.mxu1 %v5317_v29 }
 0x208   :  { %4569 = vmatprep.mubr.f32.mxu1 %v5322_v30 }
 0x20b   :  { %4570 = vmatmul.mubr.f32.gmra.mxu1 %v5329_v31 }
 0x20c   :  { %4636 = vmatprep.mubr.f32.mxu1 %v5203_v4 }
 0x2af   :  { %v4550_v54 = vpop.f32.mrf.mxu1 }
 0x2b1   :  { %v525_v55 = vpop.f32.mrf.mxu1 }
 0x2b2   :  { %4580 = vmatprep.mubr.msk.f32.mxu0 %vm7228_vm1, %v525_v55 }
 0x2b3   :  { %v4553_v57 = vpop.f32.mrf.mxu1  ;;  %4581 = vmatmul.mubr.msk.f32.vlgmr.msra.gmra.mxu0 %vm7228_vm1, %v4550_v54 }
 0x2b4   :  { %4661 = vmatpush3.msra.mxu0 %v823_v7 }
 0x2b5   :  { %v535_v58 = vpop.f32.mrf.mxu1  ;;  %4662 = vmatprep.subr.mxu0 %v822_v8 }
 0x2b6   :  { %4583 = vmatprep.mubr.msk.f32.mxu0 %vm7228_vm1, %v535_v58  ;;  %4663 = vmatpush3.msra.mxu0 %v822_v8 }
 0x2b7   :  { %v4556_v59 = vpop.f32.mrf.mxu1  ;;  %4584 = vmatmul.mubr.msk.f32.gmra.mxu0 %vm7228_vm1, %v4553_v57  ;;  %4664 = vmatprep.subr.mxu0 %v821_v9 }
 0x2b8   :  { %4665 = vmatpush3.msra.mxu0 %v821_v9 }
 0x2b9   :  { %v545_v60 = vpop.f32.mrf.mxu1  ;;  %4666 = vmatprep.subr.mxu0 %v820_v10 }
 0x2ba   :  { %4586 = vmatprep.mubr.msk.f32.mxu0 %vm7228_vm1, %v545_v60  ;;  %4667 = vmatpush3.msra.mxu0 %v820_v10 }
 0x2bb   :  { %v4559_v61 = vpop.f32.mrf.mxu1  ;;  %4587 = vmatmul.mubr.msk.f32.gmra.mxu0 %vm7228_vm1, %v4556_v59 }
 0x2bd   :  { %v555_v4 = vpop.f32.mrf.mxu1 }
 0x2be   :  { %4589 = vmatprep.mubr.msk.f32.mxu0 %vm7228_vm1, %v555_v4 }
 0x2bf   :  { %v4562_v62 = vpop.f32.mrf.mxu1  ;;  %4590 = vmatmul.mubr.msk.f32.gmra.mxu0 %vm7228_vm1, %v4559_v61 }
 0x2c1   :  { %v565_v63 = vpop.f32.mrf.mxu1 }
 0x2c2   :  { %4592 = vmatprep.mubr.msk.f32.mxu0 %vm7228_vm1, %v565_v63 }
 0x2c3   :  { %v4565_v0 = vpop.f32.mrf.mxu1  ;;  %4593 = vmatmul.mubr.msk.f32.gmra.mxu0 %vm7228_vm1, %v4562_v62 }
 0x2c5   :  { %v575_v1 = vpop.f32.mrf.mxu1 }
 0x2c6   :  { %4595 = vmatprep.mubr.msk.f32.mxu0 %vm7228_vm1, %v575_v1 }
 0x2c7   :  { %v4568_v2 = vpop.f32.mrf.mxu1  ;;  %4596 = vmatmul.mubr.msk.f32.gmra.mxu0 %vm7228_vm1, %v4565_v0 }
 0x2c9   :  { %v585_v3 = vpop.f32.mrf.mxu1 }
 0x2ca   :  { %4598 = vmatprep.mubr.msk.f32.mxu0 %vm7228_vm1, %v585_v3 }
 0x2cb   :  { %v4571_v5 = vpop.f32.mrf.mxu1  ;;  %4599 = vmatmul.mubr.msk.f32.gmra.mxu0 %vm7228_vm1, %v4568_v2 }
 0x2cd   :  { %v595_v6 = vpop.f32.mrf.mxu1 }
 0x2ce   :  { %4601 = vmatprep.mubr.msk.f32.mxu0 %vm7228_vm1, %v595_v6 }
 0x2cf   :  { %4602 = vmatmul.mubr.msk.f32.gmra.mxu0 %vm7228_vm1, %v4571_v5 }
 0x373   :  { %v5420_v11 = vpop.f32.mrf.mxu0 }
 0x374   :  { %v731_v5 = vadd.f32 %v5420_v11, %v3855_v40 }
 0x375   :  { %v5422_v12 = vpop.f32.mrf.mxu0 }
 0x376   :  { %v726_v7 = vadd.f32 %v3855_v40, %v5422_v12  ;;  %v805_v9 = vmax.f32 %v731_v5, 0.0  ;;  %v5463_v12 = vld [vmem:[%s7207_s8] ss:$0 sm:$0xff] }
 0x377   :  { %v4585_v13 = vpop.f32.mrf.mxu0 }
 0x378   :  { %v741_v0 = vadd.f32 %v4585_v13, %v3855_v40  ;;  %v804_v10 = vmax.f32 %v726_v7, 0.0 }
 0x379   :  { %v735_v14 = vpop.f32.mrf.mxu0 }
 0x37a   :  { %v736_v2 = vadd.f32 %v3855_v40, %v735_v14  ;;  %v807_v6 = vmax.f32 %v741_v0, 0.0 }
 0x37b   :  { %v4588_v15 = vpop.f32.mrf.mxu0 }
 0x37c   :  { %v751_v61 = vadd.f32 %v4588_v15, %v3855_v40  ;;  %v806_v8 = vmax.f32 %v736_v2, 0.0 }
 0x37d   :  { %v745_v16 = vpop.f32.mrf.mxu0 }
 0x37e   :  { %v746_v62 = vadd.f32 %v3855_v40, %v745_v16  ;;  %v809_v1 = vmax.f32 %v751_v61, 0.0 }
 0x37f   :  { %v4591_v32 = vpop.f32.mrf.mxu0 }
 0x380   :  { %v761_v57 = vadd.f32 %v4591_v32, %v3855_v40  ;;  %v808_v3 = vmax.f32 %v746_v62, 0.0 }
 0x381   :  { %v755_v33 = vpop.f32.mrf.mxu0 }
 0x382   :  { %v756_v59 = vadd.f32 %v3855_v40, %v755_v33  ;;  %v811_v4 = vmax.f32 %v761_v57, 0.0 }
 0x383   :  { %v4594_v34 = vpop.f32.mrf.mxu0 }
 0x384   :  { %v771_v53 = vadd.f32 %v4594_v34, %v3855_v40  ;;  %v810_v63 = vmax.f32 %v756_v59, 0.0 }
 0x385   :  { %v765_v35 = vpop.f32.mrf.mxu0 }
 0x386   :  { %v766_v54 = vadd.f32 %v3855_v40, %v765_v35  ;;  %v813_v58 = vmax.f32 %v771_v53, 0.0 }
 0x387   :  { %v4597_v36 = vpop.f32.mrf.mxu0 }
 0x388   :  { %v781_v49 = vadd.f32 %v4597_v36, %v3855_v40  ;;  %v812_v60 = vmax.f32 %v766_v54, 0.0 }
 0x389   :  { %v775_v37 = vpop.f32.mrf.mxu0 }
 0x38a   :  { %v776_v51 = vadd.f32 %v3855_v40, %v775_v37  ;;  %v815_v56 = vmax.f32 %v781_v49, 0.0 }
 0x38b   :  { %v4600_v38 = vpop.f32.mrf.mxu0 }
 0x38c   :  { %v791_v44 = vadd.f32 %v4600_v38, %v3855_v40  ;;  %v814_v55 = vmax.f32 %v776_v51, 0.0 }
 0x38d   :  { %v785_v39 = vpop.f32.mrf.mxu0 }
 0x38e   :  { %v786_v47 = vadd.f32 %v3855_v40, %v785_v39  ;;  %v817_v50 = vmax.f32 %v791_v44, 0.0 }
 0x38f   :  { %v4603_v41 = vpop.f32.mrf.mxu0 }
 0x390   :  { %v801_v42 = vadd.f32 %v4603_v41, %v3855_v40  ;;  %v816_v52 = vmax.f32 %v786_v47, 0.0 }
 0x391   :  { %v795_v43 = vpop.f32.mrf.mxu0 }
 0x392   :  { %v819_v45 = vmax.f32 %v801_v42, 0.0  ;;  %v796_v46 = vadd.f32 %v3855_v40, %v795_v43  ;;  %v3872_v42 = vld [vmem:[%s7208_s7] ss:$0 sm:$0xff] }
 0x394   :  { %v818_v48 = vmax.f32 %v796_v46, 0.0  ;;  %4604 = vmatprep.subr.mxu1 %v819_v45 }
 0x395   :  { %4605 = vmatpush3.msra.mxu1 %v819_v45 }
 0x396   :  { %4606 = vmatprep.subr.mxu1 %v818_v48 }
 0x397   :  { %4607 = vmatpush3.msra.mxu1 %v818_v48 }
 0x398   :  { %4608 = vmatprep.subr.mxu1 %v817_v50 }
 0x399   :  { %4609 = vmatpush3.msra.mxu1 %v817_v50 }
 0x39a   :  { %4610 = vmatprep.subr.mxu1 %v816_v52 }
 0x39b   :  { %4611 = vmatpush3.msra.mxu1 %v816_v52 }
 0x39c   :  { %4612 = vmatprep.subr.mxu1 %v815_v56 }
 0x39d   :  { %4613 = vmatpush3.msra.mxu1 %v815_v56 }
 0x39e   :  { %4614 = vmatprep.subr.mxu1 %v814_v55 }
 0x39f   :  { %4615 = vmatpush3.msra.mxu1 %v814_v55 }
 0x3a0   :  { %4616 = vmatprep.subr.mxu1 %v813_v58 }
 0x3a1   :  { %4617 = vmatpush3.msra.mxu1 %v813_v58 }
 0x3a2   :  { %4618 = vmatprep.subr.mxu1 %v812_v60 }
 0x3a3   :  { %4619 = vmatpush3.msra.mxu1 %v812_v60 }
 0x3a4   :  { %4620 = vmatprep.subr.mxu1 %v811_v4 }
 0x3a5   :  { %4621 = vmatpush3.msra.mxu1 %v811_v4 }
 0x3a6   :  { %4622 = vmatprep.subr.mxu1 %v810_v63 }
 0x3a7   :  { %4623 = vmatpush3.msra.mxu1 %v810_v63 }
 0x3a8   :  { %4624 = vmatprep.subr.mxu1 %v809_v1 }
 0x3a9   :  { %4625 = vmatpush3.msra.mxu1 %v809_v1 }
 0x3aa   :  { %4626 = vmatprep.subr.mxu1 %v808_v3 }
 0x3ab   :  { %4627 = vmatpush3.msra.mxu1 %v808_v3  ;;  %v1370_v3 = vlaneseq }
 0x3ac   :  { %4628 = vmatprep.subr.mxu1 %v807_v6 }
 0x3ad   :  { %4629 = vmatpush3.msra.mxu1 %v807_v6  ;;  %v5614_v7 = vshrl.u32 %v1370_v3, 7 }
 0x3ae   :  { %4630 = vmatprep.subr.mxu1 %v806_v8 }
 0x3af   :  { %4631 = vmatpush3.msra.mxu1 %v806_v8 }
 0x3b0   :  { %4632 = vmatprep.subr.mxu1 %v805_v9 }
 0x3b1   :  { %4633 = vmatpush3.msra.mxu1 %v805_v9  ;;  %v5619_v9 = vadd.s32 104, %v5614_v7 }
 0x3b2   :  { %4634 = vmatprep.subr.mxu1 %v804_v10 }
 0x3b3   :  { %4635 = vmatpush3.msra.mxu1 %v804_v10 }
 0x3b4   :  { %4637 = vmatmul.mubr.f32.vlgmr.msra.gmra.mxu1 %v5245_v17 }
 0x3b5   :  { %4639 = vmatprep.mubr.f32.mxu1 %v5250_v18 }
 0x3b8   :  { %4640 = vmatmul.mubr.f32.gmra.mxu1 %v5257_v19 }
 0x3b9   :  { %4642 = vmatprep.mubr.f32.mxu1 %v5262_v20 }
 0x3bc   :  { %4643 = vmatmul.mubr.f32.gmra.mxu1 %v5269_v21 }
 0x3bd   :  { %4645 = vmatprep.mubr.f32.mxu1 %v5274_v22 }
 0x3c0   :  { %4646 = vmatmul.mubr.f32.gmra.mxu1 %v5281_v23 }
 0x3c1   :  { %4648 = vmatprep.mubr.f32.mxu1 %v5286_v24 }
 0x3c4   :  { %4649 = vmatmul.mubr.f32.gmra.mxu1 %v5293_v25 }
 0x3c5   :  { %4651 = vmatprep.mubr.f32.mxu1 %v5298_v26 }
 0x3c8   :  { %4652 = vmatmul.mubr.f32.gmra.mxu1 %v5305_v27 }
 0x3c9   :  { %4654 = vmatprep.mubr.f32.mxu1 %v5310_v28 }
 0x3cc   :  { %4655 = vmatmul.mubr.f32.gmra.mxu1 %v5317_v29 }
 0x3cd   :  { %4657 = vmatprep.mubr.f32.mxu1 %v5322_v30 }
 0x3d0   :  { %4658 = vmatmul.mubr.f32.gmra.mxu1 %v5329_v31 }
 0x3d1   :  { %4724 = vmatprep.mubr.msk.f32.mxu1 %vm7228_vm1, %v5463_v12 }
 0x474   :  { %v4638_v17 = vpop.f32.mrf.mxu1 }
 0x476   :  { %v891_v18 = vpop.f32.mrf.mxu1 }
 0x477   :  { %4668 = vmatprep.mubr.msk.f32.mxu0 %vm7228_vm1, %v891_v18 }
 0x478   :  { %v4641_v19 = vpop.f32.mrf.mxu1  ;;  %4669 = vmatmul.mubr.msk.f32.vlgmr.msra.gmra.mxu0 %vm7228_vm1, %v4638_v17  ;;  %v5623_v17 = vand.u32 127, %v1370_v3  ;;  %v5721_v3 = vadd.s32 8, %v5614_v7 }
 0x47a   :  { %v901_v20 = vpop.f32.mrf.mxu1  ;;  %vm1402_vm2 = vcmp.eq.s32.totalorder %v5619_v9, %v5623_v17  ;;  %vm1389_vm15 = vcmp.eq.s32.totalorder %v5614_v7, %v5623_v17 }
 0x47b   :  { %4671 = vmatprep.mubr.msk.f32.mxu0 %vm7228_vm1, %v901_v20  ;;  %v5633_v20 = vadd.s32 120, %v5614_v7 }
 0x47c   :  { %v4644_v21 = vpop.f32.mrf.mxu1  ;;  %4672 = vmatmul.mubr.msk.f32.gmra.mxu0 %vm7228_vm1, %v4641_v19  ;;  %v5630_v19 = vadd.s32 96, %v5614_v7 }
 0x47d   :  { %vm1404_vm4 = vcmp.eq.s32.totalorder %v5633_v20, %v5623_v17 }
 0x47e   :  { %v911_v22 = vpop.f32.mrf.mxu1  ;;  %vm1401_vm3 = vcmp.eq.s32.totalorder %v5630_v19, %v5623_v17 }
 0x47f   :  { %4674 = vmatprep.mubr.msk.f32.mxu0 %vm7228_vm1, %v911_v22 }
 0x480   :  { %v4647_v23 = vpop.f32.mrf.mxu1  ;;  %4675 = vmatmul.mubr.msk.f32.gmra.mxu0 %vm7228_vm1, %v4644_v21 }
 0x482   :  { %v921_v24 = vpop.f32.mrf.mxu1 }
 0x483   :  { %4677 = vmatprep.mubr.msk.f32.mxu0 %vm7228_vm1, %v921_v24  ;;  %v5645_v24 = vadd.s32 80, %v5614_v7 }
 0x484   :  { %v4650_v25 = vpop.f32.mrf.mxu1  ;;  %4678 = vmatmul.mubr.msk.f32.gmra.mxu0 %vm7228_vm1, %v4647_v23 }
 0x485   :  { %7289 = vst [vmem:[#allocation20_spill] sm:$0xff] %v5645_v24  ;;  %vm1399_vm5 = vcmp.eq.s32.totalorder %v5645_v24, %v5623_v17 }
 0x486   :  { %v931_v26 = vpop.f32.mrf.mxu1 }
 0x487   :  { %4680 = vmatprep.mubr.msk.f32.mxu0 %vm7228_vm1, %v931_v26  ;;  %v22_v26 = vstv %s7209_s9 }
 0x488   :  { %v4653_v27 = vpop.f32.mrf.mxu1  ;;  %4681 = vmatmul.mubr.msk.f32.gmra.mxu0 %vm7228_vm1, %v4650_v25  ;;  %v5648_v25 = vadd.s32 112, %v5614_v7  ;;  %23 = vst [vmem:[#allocation3] sm:$0x1] %v22_v26 }
 0x48a   :  { %v941_v28 = vpop.f32.mrf.mxu1  ;;  %vm1403_vm6 = vcmp.eq.s32.totalorder %v5648_v25, %v5623_v17 }
 0x48b   :  { %4683 = vmatprep.mubr.msk.f32.mxu0 %vm7228_vm1, %v941_v28 }
 0x48c   :  { %v4656_v29 = vpop.f32.mrf.mxu1  ;;  %4684 = vmatmul.mubr.msk.f32.gmra.mxu0 %vm7228_vm1, %v4653_v27 }
 0x48e   :  { %v951_v30 = vpop.f32.mrf.mxu1 }
 0x48f   :  { %4686 = vmatprep.mubr.msk.f32.mxu0 %vm7228_vm1, %v951_v30 }
 0x490   :  { %v4659_v31 = vpop.f32.mrf.mxu1  ;;  %4687 = vmatmul.mubr.msk.f32.gmra.mxu0 %vm7228_vm1, %v4656_v29 }
 0x492   :  { %v961_v11 = vpop.f32.mrf.mxu1 }
 0x493   :  { %4689 = vmatprep.mubr.msk.f32.mxu0 %vm7228_vm1, %v961_v11  ;;  %v5667_v11 = vadd.s32 88, %v5614_v7 }
 0x494   :  { %4690 = vmatmul.mubr.msk.f32.gmra.mxu0 %vm7228_vm1, %v4659_v31  ;;  %v5664_v31 = vadd.s32 64, %v5614_v7 }
 0x495   :  { %7290 = vst [vmem:[#allocation21_spill] sm:$0xff] %v5667_v11  ;;  %vm1400_vm8 = vcmp.eq.s32.totalorder %v5667_v11, %v5623_v17 }
 0x496   :  { %vm1397_vm7 = vcmp.eq.s32.totalorder %v5664_v31, %v5623_v17 }
 0x538   :  { %v4670_v13 = vpop.f32.mrf.mxu0 }
 0x539   :  { %v5552_v59 = vadd.f32 %v4670_v13, %v3872_v42 }
 0x53a   :  { %v1090_v14 = vpop.f32.mrf.mxu0 }
 0x53b   :  { %7287 = vst [vmem:[#allocation18_spill] sm:$0xff] %v5552_v59  ;;  %v5558_v60 = vadd.f32 %v3872_v42, %v1090_v14  ;;  %v5676_v14 = vadd.s32 48, %v5614_v7 }
 0x53c   :  { %v4673_v15 = vpop.f32.mrf.mxu0 }
 0x53d   :  { %v5540_v57 = vadd.f32 %v4673_v15, %v3872_v42  ;;  %7288 = vst [vmem:[#allocation19_spill] sm:$0xff] %v5558_v60  ;;  %v5679_v15 = vadd.s32 72, %v5614_v7  ;;  %vm1395_vm9 = vcmp.eq.s32.totalorder %v5676_v14, %v5623_v17 }
 0x53e   :  { %v1100_v16 = vpop.f32.mrf.mxu0 }
 0x53f   :  { %7285 = vst [vmem:[#allocation16_spill] sm:$0xff] %v5540_v57  ;;  %v5546_v58 = vadd.f32 %v3872_v42, %v1100_v16  ;;  %vm1398_vm10 = vcmp.eq.s32.totalorder %v5679_v15, %v5623_v17 }
 0x540   :  { %v4676_v32 = vpop.f32.mrf.mxu0 }
 0x541   :  { %v5528_v54 = vadd.f32 %v4676_v32, %v3872_v42  ;;  %7286 = vst [vmem:[#allocation17_spill] sm:$0xff] %v5546_v58 }
 0x542   :  { %v1110_v33 = vpop.f32.mrf.mxu0 }
 0x543   :  { %7283 = vst [vmem:[#allocation14_spill] sm:$0xff] %v5528_v54  ;;  %v5534_v55 = vadd.f32 %v3872_v42, %v1110_v33  ;;  %v5093_v33 = vmov 0  }
 0x544   :  { %v4679_v34 = vpop.f32.mrf.mxu0  ;;  %5092 = vset.pattern.permute.xlu1 %v5093_v33  ;;  %5091 = vset.pattern.permute.xlu0 %v5093_v33 }
 0x545   :  { %v5516_v53 = vadd.f32 %v4679_v34, %v3872_v42  ;;  %7284 = vst [vmem:[#allocation15_spill] sm:$0xff] %v5534_v55  ;;  %v5688_v34 = vadd.s32 32, %v5614_v7 }
 0x546   :  { %v1120_v35 = vpop.f32.mrf.mxu0 }
 0x547   :  { %7281 = vst [vmem:[#allocation12_spill] sm:$0xff] %v5516_v53  ;;  %v5522_v56 = vadd.f32 %v3872_v42, %v1120_v35  ;;  %v5691_v35 = vadd.s32 56, %v5614_v7  ;;  %vm1393_vm11 = vcmp.eq.s32.totalorder %v5688_v34, %v5623_v17 }
 0x548   :  { %v4682_v36 = vpop.f32.mrf.mxu0 }
 0x549   :  { %v5504_v51 = vadd.f32 %v4682_v36, %v3872_v42  ;;  %7282 = vst [vmem:[#allocation13_spill] sm:$0xff] %v5522_v56  ;;  %vm1396_vm12 = vcmp.eq.s32.totalorder %v5691_v35, %v5623_v17 }
 0x54a   :  { %v1130_v37 = vpop.f32.mrf.mxu0 }
 0x54b   :  { %7279 = vst [vmem:[#allocation10_spill] sm:$0xff] %v5504_v51  ;;  %v5510_v52 = vadd.f32 %v3872_v42, %v1130_v37 }
 0x54c   :  { %v4685_v38 = vpop.f32.mrf.mxu0 }
 0x54d   :  { %v5492_v49 = vadd.f32 %v4685_v38, %v3872_v42  ;;  %7280 = vst [vmem:[#allocation11_spill] sm:$0xff] %v5510_v52  ;;  %v5700_v38 = vadd.s32 16, %v5614_v7 }
 0x54e   :  { %v1140_v39 = vpop.f32.mrf.mxu0 }
 0x54f   :  { %7277 = vst [vmem:[#allocation8_spill] sm:$0xff] %v5492_v49  ;;  %v5498_v50 = vadd.f32 %v3872_v42, %v1140_v39  ;;  %v5703_v39 = vadd.s32 40, %v5614_v7  ;;  %vm1391_vm13 = vcmp.eq.s32.totalorder %v5700_v38, %v5623_v17 }
 0x550   :  { %v4688_v40 = vpop.f32.mrf.mxu0 }
 0x551   :  { %v5480_v47 = vadd.f32 %v4688_v40, %v3872_v42  ;;  %7278 = vst [vmem:[#allocation9_spill] sm:$0xff] %v5498_v50  ;;  %vm1394_vm14 = vcmp.eq.s32.totalorder %v5703_v39, %v5623_v17 }
 0x552   :  { %v1150_v41 = vpop.f32.mrf.mxu0 }
 0x553   :  { %7275 = vst [vmem:[#allocation6_spill] sm:$0xff] %v5480_v47  ;;  %v5486_v48 = vadd.f32 %v3872_v42, %v1150_v41 }
 0x554   :  { %v4691_v43 = vpop.f32.mrf.mxu0 }
 0x555   :  { %v5470_v44 = vadd.f32 %v4691_v43, %v3872_v42  ;;  %7276 = vst [vmem:[#allocation7_spill] sm:$0xff] %v5486_v48 }
 0x556   :  { %v1160_v45 = vpop.f32.mrf.mxu0 }
 0x557   :  { %7273 = vst [vmem:[#allocation4_spill] sm:$0xff] %v5470_v44  ;;  %v5472_v46 = vadd.f32 %v3872_v42, %v1160_v45  ;;  %4692 = vmatprep.subr.msk.mxu1 %vm7228_vm1, %v5470_v44  ;;  %v5712_v42 = vadd.s32 24, %v5614_v7 }
 0x558   :  { %4693 = vmatpush3.xpose.msk.msra.mxu1 %vm7228_vm1, %v5470_v44 }
 0x559   :  { %7274 = vst [vmem:[#allocation5_spill] sm:$0xff] %v5472_v46  ;;  %4694 = vmatprep.subr.msk.mxu1 %vm7228_vm1, %v5472_v46  ;;  %vm1392_vm0 = vcmp.eq.s32.totalorder %v5712_v42, %v5623_v17 }
 0x55c   :  { %4695 = vmatpush3.xpose.msk.msra.mxu1 %vm7228_vm1, %v5472_v46 }
 0x55d   :  { %4696 = vmatprep.subr.msk.mxu1 %vm7228_vm1, %v5480_v47 }
 0x560   :  { %4697 = vmatpush3.xpose.msk.msra.mxu1 %vm7228_vm1, %v5480_v47  ;;  %v7317_v47 = vmov 0 }
 0x561   :  { %4698 = vmatprep.subr.msk.mxu1 %vm7228_vm1, %v5486_v48 }
 0x564   :  { %4699 = vmatpush3.xpose.msk.msra.mxu1 %vm7228_vm1, %v5486_v48 }
 0x565   :  { %4700 = vmatprep.subr.msk.mxu1 %vm7228_vm1, %v5492_v49 }
 0x568   :  { %4701 = vmatpush3.xpose.msk.msra.mxu1 %vm7228_vm1, %v5492_v49  ;;  %v7406_v49 = vld [vmem:[#allocation6_spill] sm:$0xff] }
 0x569   :  { %4702 = vmatprep.subr.msk.mxu1 %vm7228_vm1, %v5498_v50 }
 0x56c   :  { %4703 = vmatpush3.xpose.msk.msra.mxu1 %vm7228_vm1, %v5498_v50  ;;  %v7306_v50 = vmov 0 }
 0x56d   :  { %4704 = vmatprep.subr.msk.mxu1 %vm7228_vm1, %v5504_v51 }
 0x570   :  { %4705 = vmatpush3.xpose.msk.msra.mxu1 %vm7228_vm1, %v5504_v51 }
 0x571   :  { %4706 = vmatprep.subr.msk.mxu1 %vm7228_vm1, %v5510_v52 }
 0x574   :  { %4707 = vmatpush3.xpose.msk.msra.mxu1 %vm7228_vm1, %v5510_v52 }
 0x575   :  { %4708 = vmatprep.subr.msk.mxu1 %vm7228_vm1, %v5516_v53 }
 0x578   :  { %4709 = vmatpush3.xpose.msk.msra.mxu1 %vm7228_vm1, %v5516_v53 }
 0x579   :  { %4710 = vmatprep.subr.msk.mxu1 %vm7228_vm1, %v5522_v56 }
 0x57c   :  { %4711 = vmatpush3.xpose.msk.msra.mxu1 %vm7228_vm1, %v5522_v56 }
 0x57d   :  { %4712 = vmatprep.subr.msk.mxu1 %vm7228_vm1, %v5528_v54 }
 0x580   :  { %4713 = vmatpush3.xpose.msk.msra.mxu1 %vm7228_vm1, %v5528_v54  ;;  %v7395_v54 = vld [vmem:[#allocation21_spill] sm:$0xff] }
 0x581   :  { %4714 = vmatprep.subr.msk.mxu1 %vm7228_vm1, %v5534_v55 }
 0x584   :  { %4715 = vmatpush3.xpose.msk.msra.mxu1 %vm7228_vm1, %v5534_v55  ;;  %v7353_v55 = vmov 0 }
 0x585   :  { %4716 = vmatprep.subr.msk.mxu1 %vm7228_vm1, %v5540_v57 }
 0x588   :  { %4717 = vmatpush3.xpose.msk.msra.mxu1 %vm7228_vm1, %v5540_v57 }
 0x589   :  { %4718 = vmatprep.subr.msk.mxu1 %vm7228_vm1, %v5546_v58 }
 0x58c   :  { %4719 = vmatpush3.xpose.msk.msra.mxu1 %vm7228_vm1, %v5546_v58  ;;  %v7312_v58 = vmov 0 }
 0x58d   :  { %4720 = vmatprep.subr.msk.mxu1 %vm7228_vm1, %v5552_v59 }
 0x590   :  { %4721 = vmatpush3.xpose.msk.msra.mxu1 %vm7228_vm1, %v5552_v59 }
 0x591   :  { %4722 = vmatprep.subr.msk.mxu1 %vm7228_vm1, %v5558_v60 }
 0x594   :  { %4723 = vmatpush3.xpose.msk.msra.mxu1 %vm7228_vm1, %v5558_v60 }
 0x597   :  { %4725 = vmatmul.mubr.msk.f32.vlgmr.msra.gmra.mxu1 %vm7228_vm1, %v5463_v12 }
 0x598   :  { %4727 = vmatprep.mubr.msk.f32.mxu1 %vm7228_vm1, %v5463_v12 }
 0x59b   :  { %4728 = vmatmul.mubr.msk.f32.gmra.mxu1 %vm7228_vm1, %v5463_v12 }
 0x59c   :  { %4730 = vmatprep.mubr.msk.f32.mxu1 %vm7228_vm1, %v5463_v12 }
 0x59f   :  { %4731 = vmatmul.mubr.msk.f32.gmra.mxu1 %vm7228_vm1, %v5463_v12 }
 0x5a0   :  { %4733 = vmatprep.mubr.msk.f32.mxu1 %vm7228_vm1, %v5463_v12 }
 0x5a3   :  { %4734 = vmatmul.mubr.msk.f32.gmra.mxu1 %vm7228_vm1, %v5463_v12 }
 0x5a4   :  { %4736 = vmatprep.mubr.msk.f32.mxu1 %vm7228_vm1, %v5463_v12 }
 0x5a7   :  { %4737 = vmatmul.mubr.msk.f32.gmra.mxu1 %vm7228_vm1, %v5463_v12 }
 0x5a8   :  { %4739 = vmatprep.mubr.msk.f32.mxu1 %vm7228_vm1, %v5463_v12 }
 0x5ab   :  { %4740 = vmatmul.mubr.msk.f32.gmra.mxu1 %vm7228_vm1, %v5463_v12 }
 0x5ac   :  { %4742 = vmatprep.mubr.msk.f32.mxu1 %vm7228_vm1, %v5463_v12 }
 0x5af   :  { %4743 = vmatmul.mubr.msk.f32.gmra.mxu1 %vm7228_vm1, %v5463_v12 }
 0x5b0   :  { %4745 = vmatprep.mubr.msk.f32.mxu1 %vm7228_vm1, %v5463_v12 }
 0x5b3   :  { %4746 = vmatmul.mubr.msk.f32.gmra.mxu1 %vm7228_vm1, %v5463_v12 }
 0x657   :  { %v5596_v61 = vpop.f32.mrf.mxu1 }
 0x659   :  { %v5598_v4 = vpop.f32.mrf.mxu1 }
 0x65b   :  { %v5600_v62 = vpop.f32.mrf.mxu1 }
 0x65c   :  { %v1408_v26 = vsel %vm1392_vm0, %v5600_v62, 0.0  ;;  %vm1493_vm0 = vcmp.lt.s32.totalorder %v5664_v31, %v5623_v17 }
 0x65d   :  { %v5602_v63 = vpop.f32.mrf.mxu1 }
 0x65e   :  { %v1407_v43 = vsel %vm1391_vm13, %v5602_v63, 0.0 }
 0x65f   :  { %v5604_v0 = vpop.f32.mrf.mxu1 }
 0x660   :  { %v1410_v45 = vsel %vm1394_vm14, %v5604_v0, 0.0  ;;  %vm1492_vm14 = vcmp.lt.s32.totalorder %v5691_v35, %v5623_v17 }
 0x661   :  { %v5606_v1 = vpop.f32.mrf.mxu1 }
 0x662   :  { %v1409_v40 = vsel %vm1393_vm11, %v5606_v1, 0.0 }
 0x663   :  { %v5608_v2 = vpop.f32.mrf.mxu1 }
 0x664   :  { %v1412_v41 = vsel %vm1396_vm12, %v5608_v2, 0.0  ;;  %vm1487_vm12 = vcmp.lt.s32.totalorder %v5700_v38, %v5623_v17 }
 0x665   :  { %v5610_v5 = vpop.f32.mrf.mxu1 }
 0x666   :  { %v1411_v36 = vsel %vm1395_vm9, %v5610_v5, 0.0 }
 0x667   :  { %v5612_v6 = vpop.f32.mrf.mxu1 }
 0x668   :  { %v1414_v37 = vsel %vm1398_vm10, %v5612_v6, 0.0  ;;  %vm1489_vm10 = vcmp.lt.s32.totalorder %v5688_v34, %v5623_v17 }
 0x669   :  { %v5616_v8 = vpop.f32.mrf.mxu1 }
 0x66a   :  { %v1413_v16 = vsel %vm1397_vm7, %v5616_v8, 0.0 }
 0x66b   :  { %v5621_v10 = vpop.f32.mrf.mxu1 }
 0x66c   :  { %v1416_v32 = vsel %vm1400_vm8, %v5621_v10, 0.0  ;;  %vm1491_vm8 = vcmp.lt.s32.totalorder %v5676_v14, %v5623_v17 }
 0x66d   :  { %v5625_v18 = vpop.f32.mrf.mxu1 }
 0x66e   :  { %v1415_v12 = vsel %vm1399_vm5, %v5625_v18, 0.0 }
 0x66f   :  { %v5635_v21 = vpop.f32.mrf.mxu1 }
 0x670   :  { %v1418_v22 = vsel %vm1402_vm2, %v5635_v21, 0.0  ;;  %vm1390_vm2 = vcmp.eq.s32.totalorder %v5721_v3, %v5623_v17 }
 0x671   :  { %1447 = vadd.xlane.f32.xlu1 %v1418_v22  ;;  %v5638_v23 = vpop.f32.mrf.mxu1  ;;  %v1405_v22 = vsel %vm1389_vm15, %v5598_v4, 0.0 }
 0x672   :  { %v1417_v28 = vsel %vm1401_vm3, %v5638_v23, 0.0 }
 0x673   :  { %v5653_v27 = vpop.f32.mrf.mxu1 }
 0x674   :  { %v1420_v29 = vsel %vm1404_vm4, %v5653_v27, 0.0  ;;  %vm1562_vm4 = vcmp.lt.s32.totalorder %v5623_v17, %v5619_v9 }
 0x675   :  { %1445 = vadd.xlane.f32.xlu1 %v1417_v28  ;;  %1451 = vadd.xlane.f32.xlu0 %v1420_v29  ;;  %v5657_v30 = vpop.f32.mrf.mxu1  ;;  %v1406_v28 = vsel %vm1390_vm2, %v5596_v61, 0.0  ;;  %v5728_v29 = vld [vmem:[#allocation3] ss:$0 sm:$0xff] }
 0x676   :  { %v1419_v13 = vsel %vm1403_vm6, %v5657_v30, 0.0 }
 0x679   :  { %1441 = vadd.xlane.f32.xlu1 %v1415_v12  ;;  %1449 = vadd.xlane.f32.xlu0 %v1419_v13 }
 0x67d   :  { %1437 = vadd.xlane.f32.xlu1 %v1413_v16  ;;  %1443 = vadd.xlane.f32.xlu0 %v1416_v32 }
 0x681   :  { %1433 = vadd.xlane.f32.xlu1 %v1411_v36  ;;  %1439 = vadd.xlane.f32.xlu0 %v1414_v37  ;;  %v7220_v37 = vmov 0.0  }
 0x685   :  { %1429 = vadd.xlane.f32.xlu1 %v1409_v40  ;;  %1435 = vadd.xlane.f32.xlu0 %v1412_v41 }
 0x689   :  { %1425 = vadd.xlane.f32.xlu1 %v1407_v43  ;;  %1431 = vadd.xlane.f32.xlu0 %v1410_v45 }
 0x68d   :  { %1421 = vadd.xlane.f32.xlu1 %v1405_v22  ;;  %1427 = vadd.xlane.f32.xlu0 %v1408_v26 }
 0x691   :  { %1423 = vadd.xlane.f32.xlu0 %v1406_v28 }
 0x6fa   :  { %v5730_v12 = vpop.xlane.xlu1 %1447 }
 0x6fb   :  { %vm7234_vm3 = vcmp.eq.f32.partialorder %v5730_v12, %v5635_v21  ;;  %v1847_v13 = vadd.f32 %v5728_v29, %v5730_v12  ;;  %vm1546_vm5 = vcmp.lt.f32.partialorder %v5635_v21, %v5730_v12 }
 0x6fc   :  { %vm1578_vm6 = vmand %vm7234_vm3, %vm1562_vm4 }
 0x6fd   :  { %1917 = vperm.xlu1 %5092, %v1847_v13   ;;  %vm1594_vm7 = vmor %vm1546_vm5, %vm1578_vm6 }
 0x6fe   :  { %v5740_v16 = vpop.xlane.xlu1 %1445  ;;  %v5742_v32 = vpop.xlane.xlu0 %1451  ;;  %v5752_v40 = vsel %vm1594_vm7, 1.0, %v7220_v37 }
 0x6ff   :  { %v1846_v33 = vadd.f32 %v5728_v29, %v5740_v16  ;;  %v1849_v36 = vadd.f32 %v5728_v29, %v5742_v32  ;;  %7291 = vst [vmem:[#allocation22_spill] sm:$0xff] %v5752_v40 }
 0x701   :  { %1912 = vperm.xlu1 %5092, %v1846_v33   ;;  %1927 = vperm.xlu0 %5091, %v1849_v36  }
 0x702   :  { %v5754_v41 = vpop.xlane.xlu1 %1441  ;;  %v5756_v43 = vpop.xlane.xlu0 %1449 }
 0x703   :  { %v1848_v36 = vadd.f32 %v5728_v29, %v5756_v43 }
 0x706   :  { %v5758_v45 = vpop.xlane.xlu1 %1437  ;;  %v5760_v22 = vpop.xlane.xlu0 %1443 }
 0x707   :  { %v1845_v26 = vadd.f32 %v5728_v29, %v5760_v22  ;;  %vm7246_vm2 = vcmp.eq.f32.partialorder %v5758_v45, %v5616_v8  ;;  %v1842_v51 = vadd.f32 %v5728_v29, %v5758_v45 }
 0x708   :  { %vm5855_vm3 = vmand %vm7246_vm2, %vm1493_vm0 }
 0x709   :  { %1907 = vperm.xlu1 %5092, %v1845_v26  }
 0x70a   :  { %v5764_v28 = vpop.xlane.xlu1 %1433  ;;  %v5766_v13 = vpop.xlane.xlu0 %1439 }
 0x70b   :  { %v1840_v33 = vadd.f32 %v5728_v29, %v5764_v28  ;;  %vm7229_vm9 = vcmp.eq.f32.partialorder %v5764_v28, %v5610_v5 }
 0x70c   :  { %vm5793_vm13 = vmand %vm7229_vm9, %vm1491_vm8  ;;  %vm1490_vm8 = vcmp.lt.s32.totalorder %v5703_v39, %v5623_v17  ;;  %vm7250_vm9 = vcmp.eq.f32.partialorder %v5766_v13, %v5612_v6 }
 0x70d   :  { %1882 = vperm.xlu0 %5091, %v1840_v33   ;;  %1922 = vperm.xlu1 %5092, %v1848_v36   ;;  %v1844_v33 = vadd.f32 %v5728_v29, %v5754_v41  ;;  %v7334_v36 = vmov 0.0  }
 0x70e   :  { %v5772_v37 = vpop.xlane.xlu1 %1429  ;;  %v5774_v40 = vpop.xlane.xlu0 %1435 }
 0x70f   :  { %vm7232_vm11 = vcmp.eq.f32.partialorder %v5772_v37, %v5606_v1  ;;  %v1838_v26 = vadd.f32 %v5728_v29, %v5772_v37  ;;  %vm7237_vm15 = vcmp.eq.f32.partialorder %v5774_v40, %v5608_v2  ;;  %v1841_v52 = vadd.f32 %v5728_v29, %v5774_v40 }
 0x710   :  { %vm5812_vm4 = vmand %vm7232_vm11, %vm1489_vm10  ;;  %vm1494_vm10 = vcmp.lt.s32.totalorder %v5679_v15, %v5623_v17  ;;  %vm1485_vm11 = vcmp.lt.s32.totalorder %v5614_v7, %v5623_v17 }
 0x711   :  { %1872 = vperm.xlu0 %5091, %v1838_v26   ;;  %1902 = vperm.xlu1 %5092, %v1844_v33   ;;  %v1843_v33 = vadd.f32 %v5728_v29, %v5766_v13  ;;  %vm5891_vm0 = vmand %vm7250_vm9, %vm1494_vm10  ;;  %vm7310_vm9 = vcmp.lt.s32.totalorder %v5645_v24, %v5623_v17 }
 0x712   :  { %v5801_v60 = vpop.xlane.xlu1 %1425  ;;  %v5803_v59 = vpop.xlane.xlu0 %1431 }
 0x713   :  { %vm7233_vm5 = vcmp.eq.f32.partialorder %v5801_v60, %v5602_v63  ;;  %vm1471_vm6 = vcmp.lt.f32.partialorder %v5801_v60, %v5602_v63  ;;  %vm7247_vm1 = vcmp.eq.f32.partialorder %v5803_v59, %v5604_v0  ;;  %v1836_v26 = vadd.f32 %v5728_v29, %v5801_v60 }
 0x714   :  { %vm1503_vm7 = vmand %vm7233_vm5, %vm1487_vm12 }
 0x715   :  { %vm5841_vm12 = vmand %vm7237_vm15, %vm1492_vm14  ;;  %vm1473_vm14 = vcmp.lt.f32.partialorder %v5772_v37, %v5606_v1  ;;  %1862 = vperm.xlu0 %5091, %v1836_v26   ;;  %1897 = vperm.xlu1 %5092, %v1843_v33   ;;  %v7362_v26 = vmov 0 }
 0x716   :  { %vm5861_vm15 = vmor %vm1471_vm6, %vm1503_vm7  ;;  %v1422_v56 = vpop.xlane.xlu1 %1421  ;;  %v5867_v53 = vpop.xlane.xlu0 %1427 }
 0x717   :  { %vm5877_vm6 = vmand %vm7247_vm1, %vm1490_vm8  ;;  %vm7253_vm7 = vcmp.eq.f32.partialorder %v1422_v56, %v5598_v4  ;;  %vm1469_vm2 = vcmp.lt.f32.partialorder %v1422_v56, %v5598_v4  ;;  %v1834_v33 = vadd.f32 %v5728_v29, %v1422_v56  ;;  %vm7311_vm8 = vcmp.eq.f32.partialorder %v5754_v41, %v5625_v18 }
 0x718   :  { %vm1501_vm1 = vmand %vm7253_vm7, %vm1485_vm11  ;;  %vm7319_vm5 = vcmp.lt.f32.partialorder %v5867_v53, %v5600_v62 }
 0x719   :  { %vm5916_vm11 = vmor %vm1473_vm14, %vm5812_vm4  ;;  %vm7315_vm14 = vcmp.eq.f32.partialorder %v5867_v53, %v5600_v62  ;;  %1852 = vperm.xlu0 %5091, %v1834_v33   ;;  %1892 = vperm.xlu1 %5092, %v1842_v51   ;;  %v7324_v51 = vmov 0 }
 0x71a   :  { %v7307_v50 = vsel %vm5916_vm11, 4294967295, %v7306_v50  ;;  %vm5920_vm7 = vmor %vm1469_vm2, %vm1501_vm1  ;;  %vm7314_vm2 = vcmp.lt.s32.totalorder %v5712_v42, %v5623_v17  ;;  %v5946_v48 = vpop.xlane.xlu0 %1423  ;;  %vm7330_vm11 = vcmp.lt.s32.totalorder %v5630_v19, %v5623_v17 }
 0x71b   :  { %vm5934_vm4 = vmand %vm7311_vm8, %vm7310_vm9  ;;  %vm7316_vm8 = vcmp.lt.f32.partialorder %v5803_v59, %v5604_v0  ;;  %vm1470_vm9 = vcmp.lt.f32.partialorder %v5946_v48, %v5596_v61  ;;  %v3922_v24 = vsel %vm5920_vm7, 1.0, %v7334_v36  ;;  %vm7337_vm7 = vcmp.lt.f32.partialorder %v5774_v40, %v5608_v2 }
 0x71c   :  { %v7313_v58 = vsel %vm5934_vm4, 4294967295, %v7312_v58  ;;  %vm1504_vm10 = vmand %vm7315_vm14, %vm7314_vm2  ;;  %vm7262_vm14 = vcmp.eq.f32.partialorder %v5946_v48, %v5596_v61 }
 0x71d   :  { %vm5955_vm1 = vmor %vm7316_vm8, %vm5877_vm6  ;;  %vm7322_vm6 = vcmp.lt.s32.totalorder %v5667_v11, %v5623_v17  ;;  %vm7323_vm8 = vcmp.eq.f32.partialorder %v5760_v22, %v5621_v10  ;;  %1887 = vperm.xlu1 %5092, %v1841_v52  }
 0x71e   :  { %v7318_v47 = vsel %vm5955_vm1, 4294967295, %v7317_v47  ;;  %vm5962_vm2 = vmor %vm7319_vm5, %vm1504_vm10  ;;  %vm7326_vm10 = vcmp.lt.s32.totalorder %v5721_v3, %v5623_v17  ;;  %vm7327_vm5 = vcmp.lt.f32.partialorder %v5764_v28, %v5610_v5 }
 0x71f   :  { %vm5978_vm1 = vmand %vm7323_vm8, %vm7322_vm6  ;;  %vm7331_vm6 = vcmp.eq.f32.partialorder %v5740_v16, %v5638_v23 }
 0x720   :  { %v7325_v51 = vsel %vm5978_vm1, 4294967295, %v7324_v51  ;;  %vm1502_vm4 = vmand %vm7262_vm14, %vm7326_vm10 }
 0x721   :  { %vm6002_vm1 = vmor %vm7327_vm5, %vm5793_vm13  ;;  %vm7342_vm13 = vcmp.eq.f32.partialorder %v5730_v12, %v5635_v21 }
 0x722   :  { %vm1518_vm10 = vmor %vm1470_vm9, %vm1502_vm4  ;;  %vm7335_vm4 = vcmp.lt.s32.totalorder %v5623_v17, %v5614_v7  ;;  %vm7336_vm9 = vcmp.eq.f32.partialorder %v1422_v56, %v5598_v4 }
 0x723   :  { %vm6014_vm8 = vmand %vm7331_vm6, %vm7330_vm11  ;;  %v3923_v11 = vsel %vm1518_vm10, 1.0, %v7334_v36  ;;  %vm1552_vm11 = vcmp.lt.s32.totalorder %v5623_v17, %v5712_v42  ;;  %vm7341_vm6 = vcmp.lt.s32.totalorder %v5619_v9, %v5623_v17 }
 0x724   :  { %vm1565_vm5 = vmand %vm7336_vm9, %vm7335_vm4  ;;  %v1629_v52 = vadd.f32 %v3923_v11, %v3922_v24  ;;  %vm7340_vm4 = vcmp.lt.f32.partialorder %v5598_v4, %v1422_v56  ;;  %v3924_v24 = vsel %vm5861_vm15, 1.0, %v7334_v36  ;;  %v1839_v56 = vadd.f32 %v5728_v29, %v5803_v59 }
 0x725   :  { %vm6040_vm10 = vmor %vm7337_vm7, %vm5841_vm12  ;;  %vm7345_vm12 = vcmp.lt.s32.totalorder %v5623_v17, %v5721_v3  ;;  %vm7359_vm15 = vcmp.lt.f32.partialorder %v5600_v62, %v5867_v53  ;;  %vm7361_vm7 = vcmp.eq.f32.partialorder %v5742_v32, %v5653_v27 }
 0x726   :  { %vm1581_vm9 = vmor %vm7340_vm4, %vm1565_vm5  ;;  %vm7346_vm5 = vcmp.eq.f32.partialorder %v5946_v48, %v5596_v61  ;;  %vm7347_vm4 = vcmp.lt.f32.partialorder %v5758_v45, %v5616_v8  ;;  %v1630_v11 = vadd.f32 %v3924_v24, %v1629_v52  ;;  %1877 = vperm.xlu1 %5092, %v1839_v56  }
 0x727   :  { %vm6054_vm14 = vmand %vm7342_vm13, %vm7341_vm6  ;;  %v6064_v4 = vsel %vm1581_vm9, 1.0, %v7334_v36  ;;  %vm7351_vm6 = vcmp.lt.s32.totalorder %v5648_v25, %v5623_v17 }
 0x728   :  { %vm1566_vm13 = vmand %vm7346_vm5, %vm7345_vm12  ;;  %vm7350_vm12 = vcmp.lt.f32.partialorder %v5596_v61, %v5946_v48  ;;  %v3925_v61 = vsel %vm5962_vm2, 1.0, %v7334_v36  ;;  %vm7356_vm2 = vcmp.lt.f32.partialorder %v5766_v13, %v5612_v6 }
 0x729   :  { %vm6083_vm9 = vmor %vm7347_vm4, %vm5855_vm3  ;;  %vm7352_vm3 = vcmp.eq.f32.partialorder %v5756_v43, %v5657_v30  ;;  %v1631_v24 = vadd.f32 %v3925_v61, %v1630_v11  ;;  %v7398_v61 = vld [vmem:[#allocation20_spill] sm:$0xff] }
 0x72a   :  { %vm1582_vm5 = vmor %vm7350_vm12, %vm1566_vm13  ;;  %vm7355_vm13 = vcmp.eq.f32.partialorder %v5867_v53, %v5600_v62  ;;  %v1837_v62 = vadd.f32 %v5728_v29, %v5867_v53 }
 0x72b   :  { %vm6100_vm4 = vmand %vm7352_vm3, %vm7351_vm6  ;;  %v6108_v52 = vsel %vm1582_vm5, 1.0, %v7334_v36  ;;  %vm1535_vm6 = vcmp.lt.f32.partialorder %v5602_v63, %v5801_v60  ;;  %vm7360_vm3 = vcmp.lt.s32.totalorder %v5633_v20, %v5623_v17 }
 0x72c   :  { %v7354_v55 = vsel %vm6100_vm4, 4294967295, %v7353_v55  ;;  %vm1568_vm12 = vmand %vm7355_vm13, %vm1552_vm11  ;;  %1867 = vperm.xlu1 %5092, %v1837_v62  }
 0x72d   :  { %vm6125_vm5 = vmor %vm7356_vm2, %vm5891_vm0  ;;  %vm7364_vm0 = vnez %v7307_v50  ;;  %vm7367_vm2 = vnez %v7313_v58  ;;  %v7369_v50 = vmov 0 }
 0x72e   :  { %vm1584_vm11 = vmor %vm7359_vm15, %vm1568_vm12  ;;  %v3926_v56 = vsel %vm7364_vm0, 1.0, %v7334_v36  ;;  %vm7365_vm15 = vcmp.lt.s32.totalorder %v5623_v17, %v5700_v38  ;;  %vm7366_vm12 = vcmp.eq.f32.partialorder %v5801_v60, %v5602_v63  ;;  %vm7368_vm0 = vcmp.lt.f32.partialorder %v5754_v41, %v5625_v18 }
 0x72f   :  { %vm6140_vm4 = vmand %vm7361_vm7, %vm7360_vm3  ;;  %v6150_v11 = vsel %vm1584_vm11, 1.0, %v7334_v36  ;;  %vm1538_vm3 = vcmp.lt.f32.partialorder %v5604_v0, %v5803_v59  ;;  %v1632_v53 = vadd.f32 %v3926_v56, %v1631_v24 }
 0x730   :  { %v7363_v26 = vsel %vm6140_vm4, 4294967295, %v7362_v26  ;;  %vm1567_vm7 = vmand %vm7366_vm12, %vm7365_vm15  ;;  %vm7371_vm12 = vnez %v7318_v47  ;;  %vm7374_vm4 = vnez %v7325_v51  ;;  %vm1555_vm15 = vcmp.lt.s32.totalorder %v5623_v17, %v5676_v14 }
 0x731   :  { %vm6165_vm13 = vmor %vm7368_vm0, %vm7367_vm2  ;;  %v3927_v60 = vsel %vm7371_vm12, 1.0, %v7334_v36  ;;  %vm7372_vm2 = vcmp.lt.s32.totalorder %v5623_v17, %v5703_v39  ;;  %vm1537_vm0 = vcmp.lt.f32.partialorder %v5606_v1, %v5772_v37  ;;  %vm7375_vm12 = vcmp.lt.f32.partialorder %v5760_v22, %v5621_v10 }
 0x732   :  { %v7370_v50 = vsel %vm6165_vm13, 4294967295, %v7369_v50  ;;  %vm1583_vm11 = vmor %vm1535_vm6, %vm1567_vm7  ;;  %vm7373_vm6 = vcmp.eq.f32.partialorder %v5803_v59, %v5604_v0  ;;  %v1633_v58 = vadd.f32 %v3927_v60, %v1632_v53  ;;  %v3928_v59 = vsel %vm6002_vm1, 1.0, %v7334_v36 }
 0x733   :  { %v6177_v63 = vsel %vm1583_vm11, 1.0, %v7334_v36  ;;  %vm1570_vm7 = vmand %vm7373_vm6, %vm7372_vm2  ;;  %vm1556_vm2 = vcmp.lt.s32.totalorder %v5623_v17, %v5691_v35  ;;  %v1835_v0 = vadd.f32 %v5728_v29, %v5946_v48  ;;  %vm7379_vm6 = vcmp.eq.f32.partialorder %v5772_v37, %v5606_v1  ;;  %v7404_v29 = vld [vmem:[#allocation4_spill] sm:$0xff] }
 0x734   :  { %vm6194_vm11 = vmor %vm7375_vm12, %vm7374_vm4  ;;  %vm7378_vm4 = vcmp.lt.s32.totalorder %v5623_v17, %v5688_v34  ;;  %vm7380_vm1 = vcmp.lt.f32.partialorder %v5740_v16, %v5638_v23  ;;  %v1634_v48 = vadd.f32 %v3928_v59, %v1633_v58  ;;  %v3929_v1 = vsel %vm6040_vm10, 1.0, %v7334_v36 }
 0x735   :  { %vm1586_vm13 = vmor %vm1538_vm3, %vm1570_vm7  ;;  %vm1540_vm7 = vcmp.lt.f32.partialorder %v5608_v2, %v5774_v40  ;;  %1857 = vperm.xlu1 %5092, %v1835_v0   ;;  %v3933_v33 = vsel %vm6194_vm11, 1.0, %v7334_v36  ;;  %vm7400_vm11 = vcmp.eq.f32.partialorder %v5754_v41, %v5625_v18 }
 0x736   :  { %v6206_v51 = vsel %vm1586_vm13, 1.0, %v7334_v36  ;;  %vm1569_vm3 = vmand %vm7379_vm6, %vm7378_vm4  ;;  %vm1483_vm4 = vcmp.lt.f32.partialorder %v5756_v43, %v5657_v30  ;;  %v1635_v37 = vadd.f32 %v3929_v1, %v1634_v48  ;;  %v5095_v1 = vmov 1.0  }
 0x737   :  { %vm6221_vm12 = vmor %vm7380_vm1, %vm6014_vm8  ;;  %vm7383_vm8 = vcmp.eq.f32.partialorder %v5774_v40, %v5608_v2  ;;  %v3930_v2 = vsel %vm6083_vm9, 1.0, %v7334_v36 }
 0x738   :  { %vm1585_vm13 = vmor %vm1537_vm0, %vm1569_vm3  ;;  %vm1539_vm0 = vcmp.lt.f32.partialorder %v5610_v5, %v5764_v28  ;;  %vm7384_vm3 = vcmp.lt.f32.partialorder %v5730_v12, %v5635_v21  ;;  %v1636_v12 = vadd.f32 %v3930_v2, %v1635_v37 }
 0x739   :  { %v6233_v44 = vsel %vm1585_vm13, 1.0, %v7334_v36  ;;  %vm1572_vm6 = vmand %vm7383_vm8, %vm1556_vm2  ;;  %vm1558_vm13 = vcmp.lt.s32.totalorder %v5623_v17, %v5679_v15  ;;  %vm1484_vm2 = vcmp.lt.f32.partialorder %v5742_v32, %v5653_v27 }
 0x73a   :  { %vm6245_vm1 = vmor %vm7384_vm3, %vm6054_vm14  ;;  %vm7387_vm14 = vcmp.eq.f32.partialorder %v5764_v28, %v5610_v5  ;;  %v3931_v5 = vsel %vm6125_vm5, 1.0, %v7334_v36  ;;  %vm1560_vm5 = vcmp.lt.s32.totalorder %v5623_v17, %v7395_v54 }
 0x73b   :  { %vm1588_vm10 = vmor %vm1540_vm7, %vm1572_vm6  ;;  %vm1542_vm7 = vcmp.lt.f32.partialorder %v5612_v6, %v5766_v13  ;;  %vm7388_vm6 = vnez %v7354_v55  ;;  %v1637_v57 = vadd.f32 %v3931_v5, %v1636_v12  ;;  %v7405_v12 = vld [vmem:[#allocation5_spill] sm:$0xff] }
 0x73c   :  { %v6257_v40 = vsel %vm1588_vm10, 1.0, %v7334_v36  ;;  %vm1571_vm8 = vmand %vm7387_vm14, %vm1555_vm15  ;;  %vm1557_vm10 = vcmp.lt.s32.totalorder %v5623_v17, %v5664_v31  ;;  %vm7391_vm15 = vcmp.eq.f32.partialorder %v5766_v13, %v5612_v6 }
 0x73d   :  { %vm6269_vm3 = vmor %vm1483_vm4, %vm7388_vm6  ;;  %vm1541_vm4 = vcmp.lt.f32.partialorder %v5616_v8, %v5758_v45  ;;  %vm7392_vm6 = vnez %v7363_v26 }
 0x73e   :  { %vm1587_vm9 = vmor %vm1539_vm0, %vm1571_vm8 }
 0x73f   :  { %v6279_v28 = vsel %vm1587_vm9, 1.0, %v7334_v36  ;;  %vm1574_vm14 = vmand %vm7391_vm15, %vm1558_vm13  ;;  %vm7396_vm9 = vnez %v7370_v50  ;;  %vm7397_vm13 = vcmp.eq.f32.partialorder %v5758_v45, %v5616_v8  ;;  %v3934_v45 = vsel %vm6221_vm12, 1.0, %v7334_v36 }
 0x740   :  { %vm6288_vm0 = vmor %vm1484_vm2, %vm7392_vm6  ;;  %v3932_v55 = vsel %vm7396_vm9, 1.0, %v7334_v36  ;;  %vm1544_vm2 = vcmp.lt.f32.partialorder %v5621_v10, %v5760_v22  ;;  %vm7401_vm12 = vcmp.eq.f32.partialorder %v5740_v16, %v5638_v23 }
 0x741   :  { %vm1590_vm8 = vmor %vm1542_vm7, %vm1574_vm14  ;;  %v1638_v13 = vadd.f32 %v3932_v55, %v1637_v57  ;;  %vm1559_vm7 = vcmp.lt.s32.totalorder %v5623_v17, %v7398_v61  ;;  %vm7399_vm14 = vcmp.eq.f32.partialorder %v5760_v22, %v5621_v10  ;;  %v3935_v22 = vsel %vm6245_vm1, 1.0, %v7334_v36 }
 0x742   :  { %v6298_v6 = vsel %vm1590_vm8, 1.0, %v7334_v36  ;;  %vm1573_vm15 = vmand %vm7397_vm13, %vm1557_vm10  ;;  %vm1543_vm10 = vcmp.lt.f32.partialorder %v5625_v18, %v5754_v41  ;;  %v3936_v41 = vsel %vm6269_vm3, 1.0, %v7334_v36  ;;  %vm7402_vm1 = vcmp.eq.f32.partialorder %v5742_v32, %v5653_v27 }
 0x743   :  { %vm1589_vm6 = vmor %vm1541_vm4, %vm1573_vm15  ;;  %v1639_v8 = vadd.f32 %v3933_v33, %v1638_v13  ;;  %vm1561_vm4 = vcmp.lt.s32.totalorder %v5623_v17, %v5630_v19  ;;  %vm7403_vm3 = vcmp.eq.f32.partialorder %v5756_v43, %v5657_v30  ;;  %v7407_v13 = vld [vmem:[#allocation7_spill] sm:$0xff] }
 0x744   :  { %v6311_v24 = vsel %vm1589_vm6, 1.0, %v7334_v36  ;;  %vm1576_vm8 = vmand %vm7399_vm14, %vm1560_vm5  ;;  %vm1545_vm5 = vcmp.lt.f32.partialorder %v5638_v23, %v5740_v16  ;;  %v3937_v16 = vsel %vm6288_vm0, 1.0, %v7334_v36 }
 0x745   :  { %vm1592_vm9 = vmor %vm1544_vm2, %vm1576_vm8  ;;  %v1640_v10 = vadd.f32 %v3934_v45, %v1639_v8  ;;  %vm1564_vm2 = vcmp.lt.s32.totalorder %v5623_v17, %v5633_v20  ;;  %vm1563_vm8 = vcmp.lt.s32.totalorder %v5623_v17, %v5648_v25  ;;  %v7408_v8 = vld [vmem:[#allocation8_spill] sm:$0xff] }
 0x746   :  { %v6324_v26 = vsel %vm1592_vm9, 1.0, %v7334_v36  ;;  %vm1575_vm13 = vmand %vm7400_vm11, %vm1559_vm7  ;;  %vm1548_vm7 = vcmp.lt.f32.partialorder %v5653_v27, %v5742_v32  ;;  %vm1547_vm9 = vcmp.lt.f32.partialorder %v5657_v30, %v5756_v43 }
 0x747   :  { %vm1591_vm15 = vmor %vm1543_vm10, %vm1575_vm13  ;;  %v1641_v18 = vadd.f32 %v3935_v22, %v1640_v10  ;;  %v7409_v22 = vld [vmem:[#allocation9_spill] sm:$0xff] }
 0x748   :  { %v6337_v56 = vsel %vm1591_vm15, 1.0, %v7334_v36  ;;  %vm1577_vm6 = vmand %vm7401_vm12, %vm1561_vm4 }
 0x749   :  { %vm1593_vm14 = vmor %vm1545_vm5, %vm1577_vm6  ;;  %v1642_v23 = vadd.f32 %v3936_v41, %v1641_v18 }
 0x74a   :  { %v6350_v62 = vsel %vm1593_vm14, 1.0, %v7334_v36  ;;  %vm1580_vm10 = vmand %vm7402_vm1, %vm1564_vm2 }
 0x74b   :  { %vm1596_vm4 = vmor %vm1548_vm7, %vm1580_vm10  ;;  %v1643_v53 = vadd.f32 %v3937_v16, %v1642_v23  ;;  %v7410_v23 = vld [vmem:[#allocation10_spill] sm:$0xff] }
 0x74c   :  { %v6361_v50 = vsel %vm1596_vm4, 1.0, %v7334_v36  ;;  %vm1579_vm11 = vmand %vm7403_vm3, %vm1563_vm8 }
 0x74d   :  { %vm1595_vm13 = vmor %vm1547_vm9, %vm1579_vm11  ;;  %v1644_v32 = vrot.slane %v1643_v53, 4 }
 0x74e   :  { %v6367_v27 = vsel %vm1595_vm13, 1.0, %v7334_v36 }
 0x74f   :  { %v1645_v60 = vadd.f32 %v1644_v32, %v1643_v53  ;;  %v7411_v32 = vld [vmem:[#allocation11_spill] sm:$0xff] }
 0x751   :  { %v1646_v47 = vrot.slane %v1645_v60, 2 }
 0x753   :  { %v1647_v58 = vadd.f32 %v1646_v47, %v1645_v60 }
 0x755   :  { %v1648_v59 = vrot.slane %v1647_v58, 1 }
 0x757   :  { %v1649_v0 = vadd.f32 %v1648_v59, %v1647_v58  ;;  %v7412_v59 = vld [vmem:[#allocation12_spill] sm:$0xff] }
 0x759   :  { %v5052_v46 = vtrunc.f32 %v1649_v0 }
 0x75b   :  { %v6369_v48 = vcvt.f32.s32 %v5052_v46  ;;  %v7413_v46 = vld [vmem:[#allocation13_spill] sm:$0xff] }
 0x75d   :  { %vm1715_vm0 = vcmp.eq.s32.totalorder %v5614_v7, %v6369_v48  ;;  %vm1716_vm5 = vcmp.eq.s32.totalorder %v5721_v3, %v6369_v48  ;;  %vm1717_vm15 = vcmp.eq.s32.totalorder %v5700_v38, %v6369_v48  ;;  %vm1718_vm2 = vcmp.eq.s32.totalorder %v5712_v42, %v6369_v48  ;;  %v2577_v3 = vld [vmem:[%s7210_s10 + $0x10] sm:$0xff] }
 0x75e   :  { %4780 = vmatprep.mubr.msk.f32.mxu0 %vm1715_vm0, %v5095_v1  ;;  %vm1719_vm12 = vcmp.eq.s32.totalorder %v5688_v34, %v6369_v48  ;;  %vm1720_vm6 = vcmp.eq.s32.totalorder %v5703_v39, %v6369_v48  ;;  %vm1721_vm7 = vcmp.eq.s32.totalorder %v5676_v14, %v6369_v48  ;;  %vm1722_vm14 = vcmp.eq.s32.totalorder %v5691_v35, %v6369_v48  ;;  %v2582_v14 = vld [vmem:[%s7210_s10 + $0x38] sm:$0xff]  ;;  %v2580_v34 = vld [vmem:[%s7210_s10 + $0x28] sm:$0xff]  ;;  %v2579_v35 = vld [vmem:[%s7210_s10 + $0x20] sm:$0xff] }
 0x75f   :  { %vm1723_vm8 = vcmp.eq.s32.totalorder %v5664_v31, %v6369_v48  ;;  %vm1724_vm1 = vcmp.eq.s32.totalorder %v5679_v15, %v6369_v48  ;;  %vm1725_vm10 = vcmp.eq.s32.totalorder %v7398_v61, %v6369_v48  ;;  %vm1726_vm9 = vcmp.eq.s32.totalorder %v7395_v54, %v6369_v48  ;;  %v2583_v31 = vld [vmem:[%s7210_s10 + $0x40] sm:$0xff]  ;;  %v2581_v15 = vld [vmem:[%s7210_s10 + $0x30] sm:$0xff]  ;;  %v2578_v39 = vld [vmem:[%s7210_s10 + $0x18] sm:$0xff] }
 0x760   :  { %vm1727_vm4 = vcmp.eq.s32.totalorder %v5630_v19, %v6369_v48  ;;  %vm1728_vm3 = vcmp.eq.s32.totalorder %v5619_v9, %v6369_v48  ;;  %vm1729_vm11 = vcmp.eq.s32.totalorder %v5648_v25, %v6369_v48  ;;  %vm1730_vm13 = vcmp.eq.s32.totalorder %v5633_v20, %v6369_v48  ;;  %v2586_v19 = vld [vmem:[%s7210_s10 + $0x58] sm:$0xff]  ;;  %v2585_v9 = vld [vmem:[%s7210_s10 + $0x50] sm:$0xff]  ;;  %v2584_v25 = vld [vmem:[%s7210_s10 + $0x48] sm:$0xff] }
 0x761   :  { %vm2413_vm0 = vcmp.lt.s32.totalorder %v5614_v7, 7 }
 0x778   :  { %v1918_v30 = vpop.permute.xlu1 %1917 }
 0x779   :  { %v1943_v57 = vmul.f32 %v1918_v30, %v7406_v49 }
 0x77c   :  { %v1928_v43 = vpop.permute.xlu0 %1927  ;;  %v1913_v37 = vpop.permute.xlu1 %1912 }
 0x77d   :  { %v1945_v36 = vmul.f32 %v1928_v43, %v7404_v29  ;;  %v1942_v33 = vmul.f32 %v1913_v37, %v7407_v13 }
 0x77f   :  { %4748 = vmatprep.subr.mxu0 %v1945_v36 }
 0x780   :  { %4749 = vmatpush3.msra.mxu0 %v1945_v36  ;;  %v7414_v36 = vld [vmem:[#allocation14_spill] sm:$0xff] }
 0x784   :  { %v1908_v2 = vpop.permute.xlu1 %1907 }
 0x785   :  { %v1941_v45 = vmul.f32 %v1908_v2, %v7408_v8 }
 0x788   :  { %v1923_v21 = vpop.permute.xlu1 %1922  ;;  %v1883_v41 = vpop.permute.xlu0 %1882 }
 0x789   :  { %v1944_v5 = vmul.f32 %v1923_v21, %v7405_v12  ;;  %v1936_v30 = vmul.f32 %v1883_v41, %v7413_v46  ;;  %v7415_v21 = vld [vmem:[#allocation15_spill] sm:$0xff] }
 0x78b   :  { %4750 = vmatprep.subr.mxu0 %v1944_v5 }
 0x78c   :  { %v1903_v55 = vpop.permute.xlu1 %1902  ;;  %4751 = vmatpush3.msra.mxu0 %v1944_v5  ;;  %v1873_v47 = vpop.permute.xlu0 %1872 }
 0x78d   :  { %4752 = vmatprep.subr.mxu0 %v1943_v57  ;;  %v1940_v18 = vmul.f32 %v1903_v55, %v7409_v22  ;;  %v1934_v5 = vmul.f32 %v1873_v47, %v7415_v21  ;;  %v7416_v55 = vld [vmem:[#allocation16_spill] sm:$0xff] }
 0x78e   :  { %4753 = vmatpush3.msra.mxu0 %v1943_v57 }
 0x78f   :  { %4754 = vmatprep.subr.mxu0 %v1942_v33 }
 0x790   :  { %v1898_v10 = vpop.permute.xlu1 %1897  ;;  %4755 = vmatpush3.msra.mxu0 %v1942_v33  ;;  %v1863_v2 = vpop.permute.xlu0 %1862 }
 0x791   :  { %4756 = vmatprep.subr.mxu0 %v1941_v45  ;;  %v1939_v16 = vmul.f32 %v1898_v10, %v7410_v23 }
 0x792   :  { %4757 = vmatpush3.msra.mxu0 %v1941_v45  ;;  %v7417_v45 = vld [vmem:[#allocation17_spill] sm:$0xff] }
 0x793   :  { %4758 = vmatprep.subr.mxu0 %v1940_v18  ;;  %v1932_v10 = vmul.f32 %v1863_v2, %v7417_v45 }
 0x794   :  { %v1893_v53 = vpop.permute.xlu1 %1892  ;;  %4759 = vmatpush3.msra.mxu0 %v1940_v18  ;;  %v1853_v18 = vpop.permute.xlu0 %1852 }
 0x795   :  { %v1938_v60 = vmul.f32 %v1893_v53, %v7411_v32  ;;  %4760 = vmatprep.subr.mxu0 %v1939_v16 }
 0x796   :  { %4761 = vmatpush3.msra.mxu0 %v1939_v16  ;;  %v7418_v16 = vld [vmem:[#allocation18_spill] sm:$0xff] }
 0x797   :  { %4762 = vmatprep.subr.mxu0 %v1938_v60 }
 0x798   :  { %v1888_v58 = vpop.permute.xlu1 %1887  ;;  %4763 = vmatpush3.msra.mxu0 %v1938_v60  ;;  %v7419_v60 = vld [vmem:[#allocation19_spill] sm:$0xff] }
 0x799   :  { %v1937_v0 = vmul.f32 %v1888_v58, %v7412_v59  ;;  %v1930_v58 = vmul.f32 %v1853_v18, %v7419_v60 }
 0x79b   :  { %4764 = vmatprep.subr.mxu0 %v1937_v0 }
 0x79c   :  { %4765 = vmatpush3.msra.mxu0 %v1937_v0 }
 0x79d   :  { %4766 = vmatprep.subr.mxu0 %v1936_v30 }
 0x79e   :  { %4767 = vmatpush3.msra.mxu0 %v1936_v30  ;;  %v2576_v30 = vld [vmem:[%s7210_s10 + $0x8] sm:$0xff] }
 0x7a1   :  { %v1878_v43 = vpop.permute.xlu1 %1877 }
 0x7a2   :  { %v1935_v37 = vmul.f32 %v1878_v43, %v7414_v36 }
 0x7a4   :  { %4768 = vmatprep.subr.mxu0 %v1935_v37 }
 0x7a5   :  { %4769 = vmatpush3.msra.mxu0 %v1935_v37 }
 0x7a6   :  { %4770 = vmatprep.subr.mxu0 %v1934_v5 }
 0x7a7   :  { %v1868_v57 = vpop.permute.xlu1 %1867  ;;  %4771 = vmatpush3.msra.mxu0 %v1934_v5  ;;  %v2575_v5 = vld [vmem:[%s7210_s10] sm:$0xff] }
 0x7a8   :  { %v1933_v33 = vmul.f32 %v1868_v57, %v7416_v55 }
 0x7aa   :  { %4772 = vmatprep.subr.mxu0 %v1933_v33 }
 0x7ab   :  { %4773 = vmatpush3.msra.mxu0 %v1933_v33 }
 0x7ac   :  { %4774 = vmatprep.subr.mxu0 %v1932_v10 }
 0x7ad   :  { %4775 = vmatpush3.msra.mxu0 %v1932_v10 }
 0x7b0   :  { %v1858_v41 = vpop.permute.xlu1 %1857 }
 0x7b1   :  { %v1931_v53 = vmul.f32 %v1858_v41, %v7418_v16 }
 0x7b3   :  { %4776 = vmatprep.subr.mxu0 %v1931_v53 }
 0x7b4   :  { %4777 = vmatpush3.msra.mxu0 %v1931_v53 }
 0x7b5   :  { %4778 = vmatprep.subr.mxu0 %v1930_v58 }
 0x7b6   :  { %4779 = vmatpush3.msra.mxu0 %v1930_v58 }
 0x7b7   :  { %4781 = vmatmul.mubr.msk.f32.vlgmr.msra.gmra.mxu0 %vm1716_vm5, %v5095_v1  ;;  %4804 = vmatprep.subr.mxu0 %v2586_v19  ;;  %vm2235_vm5 = vcmp.lt.s32.totalorder %v5614_v7, 1 }
 0x7b8   :  { %4783 = vmatprep.mubr.msk.f32.mxu0 %vm1717_vm15, %v5095_v1  ;;  %4805 = vmatpush3.msra.mxu0 %v2586_v19  ;;  %vm7420_vm15 = vcmask 261120  }
 0x7b9   :  { %4806 = vmatprep.subr.mxu0 %v2585_v9 }
 0x7ba   :  { %4807 = vmatpush3.msra.mxu0 %v2585_v9 }
 0x7bb   :  { %4784 = vmatmul.mubr.msk.f32.gmra.mxu0 %vm1718_vm2, %v5095_v1  ;;  %4808 = vmatprep.subr.mxu0 %v2584_v25  ;;  %vm7421_vm2 = vmmov %vm7420_vm15 }
 0x7bc   :  { %4786 = vmatprep.mubr.msk.f32.mxu0 %vm1719_vm12, %v5095_v1  ;;  %4809 = vmatpush3.msra.mxu0 %v2584_v25  ;;  %vm7422_vm12 = vmmov %vm7421_vm2 }
 0x7bd   :  { %4810 = vmatprep.subr.mxu0 %v2583_v31 }
 0x7be   :  { %4811 = vmatpush3.msra.mxu0 %v2583_v31 }
 0x7bf   :  { %4787 = vmatmul.mubr.msk.f32.gmra.mxu0 %vm1720_vm6, %v5095_v1  ;;  %4812 = vmatprep.subr.mxu0 %v2582_v14  ;;  %vm7423_vm6 = vmmov %vm7421_vm2 }
 0x7c0   :  { %4789 = vmatprep.mubr.msk.f32.mxu0 %vm1721_vm7, %v5095_v1  ;;  %4813 = vmatpush3.msra.mxu0 %v2582_v14  ;;  %vm7424_vm7 = vmmov %vm7421_vm2 }
 0x7c1   :  { %4814 = vmatprep.subr.mxu0 %v2581_v15 }
 0x7c2   :  { %4815 = vmatpush3.msra.mxu0 %v2581_v15 }
 0x7c3   :  { %4790 = vmatmul.mubr.msk.f32.gmra.mxu0 %vm1722_vm14, %v5095_v1  ;;  %4816 = vmatprep.subr.mxu0 %v2580_v34  ;;  %vm7425_vm14 = vmmov %vm7421_vm2 }
 0x7c4   :  { %4792 = vmatprep.mubr.msk.f32.mxu0 %vm1723_vm8, %v5095_v1  ;;  %4817 = vmatpush3.msra.mxu0 %v2580_v34  ;;  %vm7426_vm8 = vmmov %vm7421_vm2 }
 0x7c5   :  { %4818 = vmatprep.subr.mxu0 %v2579_v35 }
 0x7c6   :  { %4819 = vmatpush3.msra.mxu0 %v2579_v35 }
 0x7c7   :  { %4793 = vmatmul.mubr.msk.f32.gmra.mxu0 %vm1724_vm1, %v5095_v1  ;;  %4820 = vmatprep.subr.mxu0 %v2578_v39  ;;  %vm7427_vm1 = vmmov %vm7421_vm2 }
 0x7c8   :  { %4795 = vmatprep.mubr.msk.f32.mxu0 %vm1725_vm10, %v5095_v1  ;;  %4821 = vmatpush3.msra.mxu0 %v2578_v39  ;;  %vm7428_vm10 = vmmov %vm7427_vm1 }
 0x7c9   :  { %4822 = vmatprep.subr.mxu0 %v2577_v3 }
 0x7ca   :  { %4823 = vmatpush3.msra.mxu0 %v2577_v3 }
 0x7cb   :  { %4796 = vmatmul.mubr.msk.f32.gmra.mxu0 %vm1726_vm9, %v5095_v1  ;;  %4824 = vmatprep.subr.mxu0 %v2576_v30  ;;  %vm7429_vm9 = vmmov %vm7427_vm1 }
 0x7cc   :  { %4798 = vmatprep.mubr.msk.f32.mxu0 %vm1727_vm4, %v5095_v1  ;;  %4825 = vmatpush3.msra.mxu0 %v2576_v30  ;;  %vm7430_vm4 = vmmov %vm7427_vm1 }
 0x7cd   :  { %4826 = vmatprep.subr.mxu0 %v2575_v5 }
 0x7ce   :  { %4827 = vmatpush3.msra.mxu0 %v2575_v5 }
 0x7cf   :  { %4799 = vmatmul.mubr.msk.f32.gmra.mxu0 %vm1728_vm3, %v5095_v1 }
 0x7d0   :  { %4801 = vmatprep.mubr.msk.f32.mxu0 %vm1729_vm11, %v5095_v1  ;;  %vm7431_vm11 = vmmov %vm7427_vm1 }
 0x7d3   :  { %4802 = vmatmul.mubr.msk.f32.gmra.mxu0 %vm1730_vm13, %v5095_v1  ;;  %vm7432_vm13 = vmmov %vm7427_vm1 }
 0x877   :  { %v4782_v38 = vpop.f32.mrf.mxu0 }
 0x878   :  { %2334 = vrot.lane.b32.xlu0 %v4782_v38, %s5096_s20  ;;  %v2220_v54 = vrot.slane %v4782_v38, 7  ;;  %v2398_v61 = vrot.slane %v4782_v38, 1 }
 0x879   :  { %v6463_v42 = vpop.f32.mrf.mxu0 }
 0x87a   :  { %v2219_v48 = vrot.slane %v6463_v42, 7  ;;  %v2397_v47 = vrot.slane %v6463_v42, 1  ;;  %2332 = vrot.lane.b32.xlu1 %v6463_v42, %s5096_s20 }
 0x87b   :  { %v4785_v0 = vpop.f32.mrf.mxu0 }
 0x87c   :  { %2338 = vrot.lane.b32.xlu0 %v4785_v0, %s5096_s20  ;;  %v2428_v43 = vsel %vm2413_vm0, %v2397_v47, %v2398_v61  ;;  %v2250_v37 = vsel %vm2235_vm5, %v2219_v48, %v2220_v54  ;;  %v2222_v33 = vrot.slane %v4785_v0, 7  ;;  %v2400_v9 = vrot.slane %v4785_v0, 1 }
 0x87d   :  { %v2022_v2 = vpop.f32.mrf.mxu0  ;;  %2301 = vst.msk [vmem:[#allocation2 + $0x8] sm:$0xff] %vm7420_vm15, %v2250_v37  ;;  %vm7433_vm15 = vmmov %vm7427_vm1 }
 0x87e   :  { %v2221_v57 = vrot.slane %v2022_v2, 7  ;;  %2494 = vrot.lane.b32.xlu1 %v2428_v43, %s5097_s28  ;;  %v2399_v10 = vrot.slane %v2022_v2, 1 }
 0x87f   :  { %v6491_v18 = vpop.f32.mrf.mxu0 }
 0x880   :  { %2342 = vrot.lane.b32.xlu0 %v6491_v18, %s5096_s20  ;;  %v2248_v53 = vsel %vm2235_vm5, %v2221_v57, %v2222_v33  ;;  %v2249_v58 = vsel %vm2235_vm5, %v2220_v54, %v2221_v57  ;;  %v2224_v25 = vrot.slane %v6491_v18, 7  ;;  %v2427_v14 = vsel %vm2413_vm0, %v2398_v61, %v2399_v10 }
 0x881   :  { %v2032_v41 = vpop.f32.mrf.mxu0  ;;  %2303 = vst.msk [vmem:[#allocation2 + $0x18] sm:$0xff] %vm7421_vm2, %v2248_v53  ;;  %v2426_v34 = vsel %vm2413_vm0, %v2399_v10, %v2400_v9  ;;  %vm7434_vm2 = vmmov %vm7427_vm1 }
 0x882   :  { %v2223_v19 = vrot.slane %v2032_v41, 7  ;;  %2336 = vrot.lane.b32.xlu1 %v2022_v2, %s5096_s20  ;;  %2302 = vst.msk [vmem:[#allocation2 + $0x10] sm:$0xff] %vm7422_vm12, %v2249_v58  ;;  %v2401_v3 = vrot.slane %v2032_v41, 1  ;;  %v2402_v2 = vrot.slane %v6491_v18, 1  ;;  %vm7435_vm12 = vmmov %vm7427_vm1 }
 0x883   :  { %v6503_v31 = vpop.f32.mrf.mxu0 }
 0x884   :  { %2496 = vrot.lane.b32.xlu0 %v2427_v14, %s5097_s28  ;;  %v2246_v35 = vsel %vm2235_vm5, %v2223_v19, %v2224_v25  ;;  %v2247_v38 = vsel %vm2235_vm5, %v2222_v33, %v2223_v19  ;;  %v2226_v54 = vrot.slane %v6503_v31, 7  ;;  %v2425_v33 = vsel %vm2413_vm0, %v2400_v9, %v2401_v3 }
 0x885   :  { %v2042_v15 = vpop.f32.mrf.mxu0  ;;  %2305 = vst.msk [vmem:[#allocation2 + $0x28] sm:$0xff] %vm7423_vm6, %v2246_v35  ;;  %v2424_v53 = vsel %vm2413_vm0, %v2401_v3, %v2402_v2  ;;  %v6549_v14 = vadd.s32 4294967295, %v5614_v7  ;;  %v2404_v3 = vrot.slane %v6503_v31, 1 }
 0x886   :  { %v2225_v39 = vrot.slane %v2042_v15, 7  ;;  %2498 = vrot.lane.b32.xlu1 %v2426_v34, %s5097_s28  ;;  %2304 = vst.msk [vmem:[#allocation2 + $0x20] sm:$0xff] %vm7424_vm7, %v2247_v38  ;;  %v2403_v19 = vrot.slane %v2042_v15, 1  ;;  %vm2380_vm7 = vcmask 523520  }
 0x887   :  { %v6518_v61 = vpop.f32.mrf.mxu0  ;;  %vm2107_vm3 = vcmp.ge.s32.totalorder %v6549_v14, 0 }
 0x888   :  { %2346 = vrot.lane.b32.xlu0 %v6503_v31, %s5096_s20  ;;  %v2244_v30 = vsel %vm2235_vm5, %v2225_v39, %v2226_v54  ;;  %v2245_v43 = vsel %vm2235_vm5, %v2224_v25, %v2225_v39  ;;  %v2228_v5 = vrot.slane %v6518_v61, 7 }
 0x889   :  { %v2052_v0 = vpop.f32.mrf.mxu0  ;;  %2307 = vst.msk [vmem:[#allocation2 + $0x38] sm:$0xff] %vm7425_vm14, %v2244_v30  ;;  %vm2542_vm14 = vcmask 785920  }
 0x88a   :  { %v2227_v37 = vrot.slane %v2052_v0, 7  ;;  %2340 = vrot.lane.b32.xlu1 %v2032_v41, %s5096_s20  ;;  %2306 = vst.msk [vmem:[#allocation2 + $0x30] sm:$0xff] %vm7426_vm8, %v2245_v43  ;;  %v2423_v43 = vsel %vm2413_vm0, %v2402_v2, %v2403_v19  ;;  %vm2594_vm8 = vcmask 785408  }
 0x88b   :  { %v6531_v57 = vpop.f32.mrf.mxu0 }
 0x88c   :  { %2500 = vrot.lane.b32.xlu0 %v2425_v33, %s5097_s28  ;;  %v2242_v41 = vsel %vm2235_vm5, %v2227_v37, %v2228_v5  ;;  %v2243_v58 = vsel %vm2235_vm5, %v2226_v54, %v2227_v37  ;;  %v2230_v9 = vrot.slane %v6531_v57, 7 }
 0x88d   :  { %v2062_v10 = vpop.f32.mrf.mxu0  ;;  %2309 = vst.msk [vmem:[#allocation2 + $0x48] sm:$0xff] %vm7427_vm1, %v2242_v41  ;;  %v2405_v41 = vrot.slane %v2052_v0, 1 }
 0x88e   :  { %v2229_v18 = vrot.slane %v2062_v10, 7  ;;  %2502 = vrot.lane.b32.xlu1 %v2424_v53, %s5097_s28  ;;  %2308 = vst.msk [vmem:[#allocation2 + $0x40] sm:$0xff] %vm7428_vm10, %v2243_v58  ;;  %vm7436_vm10 = vmmov %vm7427_vm1 }
 0x88f   :  { %v4800_v25 = vpop.f32.mrf.mxu0 }
 0x890   :  { %2350 = vrot.lane.b32.xlu0 %v6518_v61, %s5096_s20  ;;  %v2240_v35 = vsel %vm2235_vm5, %v2229_v18, %v2230_v9  ;;  %v2241_v38 = vsel %vm2235_vm5, %v2228_v5, %v2229_v18  ;;  %v2232_v54 = vrot.slane %v4800_v25, 7 }
 0x891   :  { %v2072_v34 = vpop.f32.mrf.mxu0  ;;  %2311 = vst.msk [vmem:[#allocation2 + $0x58] sm:$0xff] %vm7429_vm9, %v2240_v35  ;;  %vm7437_vm9 = vmmov %vm7427_vm1 }
 0x892   :  { %v2231_v39 = vrot.slane %v2072_v34, 7  ;;  %2344 = vrot.lane.b32.xlu1 %v2042_v15, %s5096_s20  ;;  %2310 = vst.msk [vmem:[#allocation2 + $0x50] sm:$0xff] %vm7430_vm4, %v2241_v38  ;;  %v2422_v15 = vsel %vm2413_vm0, %v2403_v19, %v2404_v3  ;;  %v2407_v38 = vrot.slane %v2062_v10, 1  ;;  %vm7438_vm4 = vmmov %vm7427_vm1 }
 0x893   :  { %v4803_v30 = vpop.f32.mrf.mxu0 }
 0x894   :  { %v2234_v37 = vrot.slane %v4803_v30, 7  ;;  %2504 = vrot.lane.b32.xlu0 %v2423_v43, %s5097_s28  ;;  %v2238_v33 = vsel %vm2235_vm5, %v2231_v39, %v2232_v54  ;;  %v2239_v31 = vsel %vm2235_vm5, %v2230_v9, %v2231_v39  ;;  %v2421_v9 = vsel %vm2413_vm0, %v2404_v3, %v2405_v41 }
 0x895   :  { %v2082_v5 = vpop.f32.mrf.mxu0  ;;  %2313 = vst.msk [vmem:[#allocation2 + $0x68] sm:$0xff] %vm7431_vm11, %v2238_v33  ;;  %v2408_v39 = vrot.slane %v6531_v57, 1  ;;  %v2409_v3 = vrot.slane %v2072_v34, 1  ;;  %vm7439_vm11 = vmmov %vm7427_vm1 }
 0x896   :  { %v2233_v53 = vrot.slane %v2082_v5, 7  ;;  %2506 = vrot.lane.b32.xlu1 %v2422_v15, %s5097_s28  ;;  %v2251_v2 = vsel %vm2235_vm5, %v2234_v37, %v2219_v48  ;;  %2312 = vst.msk [vmem:[#allocation2 + $0x60] sm:$0xff] %vm7432_vm13, %v2239_v31  ;;  %v2406_v48 = vrot.slane %v6518_v61, 1  ;;  %v2411_v43 = vrot.slane %v2082_v5, 1  ;;  %vm7440_vm13 = vmmov %vm7427_vm1 }
 0x897   :  { %v2284_v58 = vsel %vm2107_vm3, %v2251_v2, 0.0 }
 0x898   :  { %2354 = vrot.lane.b32.xlu0 %v6531_v57, %s5096_s20  ;;  %2300 = vst.msk [vmem:[#allocation2] sm:$0xff] %vm7433_vm15, %v2284_v58  ;;  %v2236_v18 = vsel %vm2235_vm5, %v2233_v53, %v2234_v37  ;;  %v2237_v19 = vsel %vm2235_vm5, %v2232_v54, %v2233_v53  ;;  %v2420_v35 = vsel %vm2413_vm0, %v2405_v41, %v2406_v48  ;;  %v2410_v54 = vrot.slane %v4800_v25, 1  ;;  %vm7441_vm15 = vmmov %vm7427_vm1 }
 0x899   :  { %2315 = vst.msk [vmem:[#allocation2 + $0x78] sm:$0xff] %vm7434_vm2, %v2236_v18  ;;  %v2419_v61 = vsel %vm2413_vm0, %v2406_v48, %v2407_v38  ;;  %v2417_v57 = vsel %vm2413_vm0, %v2408_v39, %v2409_v3  ;;  %v6610_v37 = vadd.s32 1, %v5633_v20  ;;  %vm7442_vm2 = vmmov %vm7427_vm1 }
 0x89a   :  { %2314 = vst.msk [vmem:[#allocation2 + $0x70] sm:$0xff] %vm7435_vm12, %v2237_v19  ;;  %2348 = vrot.lane.b32.xlu1 %v2052_v0, %s5096_s20  ;;  %v2418_v0 = vsel %vm2413_vm0, %v2407_v38, %v2408_v39  ;;  %v2416_v15 = vsel %vm2413_vm0, %v2409_v3, %v2410_v54  ;;  %v2415_v33 = vsel %vm2413_vm0, %v2410_v54, %v2411_v43  ;;  %vm7443_vm12 = vmmov %vm7427_vm1 }
 0x89b   :  { %vm2202_vm6 = vcmp.lt.s32.totalorder %v6610_v37, 128 }
 0x89c   :  { %2508 = vrot.lane.b32.xlu0 %v2421_v9, %s5097_s28 }
 0x89e   :  { %2510 = vrot.lane.b32.xlu1 %v2420_v35, %s5097_s28 }
 0x8a0   :  { %2358 = vrot.lane.b32.xlu0 %v4800_v25, %s5096_s20 }
 0x8a2   :  { %2352 = vrot.lane.b32.xlu1 %v2062_v10, %s5096_s20  ;;  %v2412_v10 = vrot.slane %v4803_v30, 1 }
 0x8a4   :  { %2512 = vrot.lane.b32.xlu0 %v2419_v61, %s5097_s28  ;;  %v2429_v25 = vsel %vm2413_vm0, %v2412_v10, %v2397_v47 }
 0x8a5   :  { %v2477_v20 = vsel %vm2202_vm6, %v2429_v25, 0.0 }
 0x8a6   :  { %2514 = vrot.lane.b32.xlu1 %v2418_v0, %s5097_s28 }
 0x8a8   :  { %2362 = vrot.lane.b32.xlu0 %v4803_v30, %s5096_s20 }
 0x8aa   :  { %2356 = vrot.lane.b32.xlu1 %v2072_v34, %s5096_s20  ;;  %v2414_v34 = vsel %vm2413_vm0, %v2411_v43, %v2412_v10 }
 0x8ac   :  { %2516 = vrot.lane.b32.xlu0 %v2417_v57, %s5097_s28 }
 0x8ae   :  { %2518 = vrot.lane.b32.xlu1 %v2416_v15, %s5097_s28 }
 0x8b0   :  { %2520 = vrot.lane.b32.xlu0 %v2415_v33, %s5097_s28 }
 0x8b2   :  { %2360 = vrot.lane.b32.xlu1 %v2082_v5, %s5096_s20 }
 0x8b4   :  { %2524 = vrot.lane.b32.xlu0 %v2477_v20, %s5097_s28 }
 0x8b6   :  { %2522 = vrot.lane.b32.xlu1 %v2414_v34, %s5097_s28 }
 0x8ea   :  { %v2335_v30 = vpop.permute.xlu0 %2334 }
 0x8eb   :  { %2382 = vst.msk [vmem:[#allocation2 + $0x8] sm:$0xff] %vm2380_vm7, %v2335_v30 }
 0x8ec   :  { %v2333_v42 = vpop.permute.xlu1 %2332 }
 0x8ed   :  { %2381 = vst.msk [vmem:[#allocation2] sm:$0xff] %vm2380_vm7, %v2333_v42 }
 0x8ee   :  { %v2339_v47 = vpop.permute.xlu0 %2338 }
 0x8ef   :  { %2384 = vst.msk [vmem:[#allocation2 + $0x18] sm:$0xff] %vm2380_vm7, %v2339_v47 }
 0x8f0   :  { %v2495_v5 = vpop.permute.xlu1 %2494 }
 0x8f1   :  { %2543 = vst.msk [vmem:[#allocation2] sm:$0xff] %vm2542_vm14, %v2495_v5 }
 0x8f2   :  { %v2343_v31 = vpop.permute.xlu0 %2342 }
 0x8f3   :  { %2386 = vst.msk [vmem:[#allocation2 + $0x28] sm:$0xff] %vm2380_vm7, %v2343_v31 }
 0x8f4   :  { %v2337_v53 = vpop.permute.xlu1 %2336 }
 0x8f5   :  { %2383 = vst.msk [vmem:[#allocation2 + $0x10] sm:$0xff] %vm2380_vm7, %v2337_v53 }
 0x8f6   :  { %v2497_v2 = vpop.permute.xlu0 %2496 }
 0x8f7   :  { %2544 = vst.msk [vmem:[#allocation2 + $0x8] sm:$0xff] %vm2542_vm14, %v2497_v2 }
 0x8f8   :  { %v2499_v41 = vpop.permute.xlu1 %2498  ;;  %v2559_v58 = vld [vmem:[#allocation2] sm:$0xff] }
 0x8f9   :  { %2545 = vst.msk [vmem:[#allocation2 + $0x10] sm:$0xff] %vm2542_vm14, %v2499_v41  ;;  %4828 = vmatprep.mubr.msk.f32.mxu0 %vm2594_vm8, %v2559_v58 }
 0x8fa   :  { %v2347_v18 = vpop.permute.xlu0 %2346 }
 0x8fb   :  { %2388 = vst.msk [vmem:[#allocation2 + $0x38] sm:$0xff] %vm2380_vm7, %v2347_v18 }
 0x8fc   :  { %v2341_v19 = vpop.permute.xlu1 %2340 }
 0x8fd   :  { %2385 = vst.msk [vmem:[#allocation2 + $0x20] sm:$0xff] %vm2380_vm7, %v2341_v19 }
 0x8fe   :  { %v2501_v48 = vpop.permute.xlu0 %2500  ;;  %v2560_v9 = vld [vmem:[#allocation2 + $0x8] sm:$0xff] }
 0x8ff   :  { %2546 = vst.msk [vmem:[#allocation2 + $0x18] sm:$0xff] %vm2542_vm14, %v2501_v48  ;;  %4829 = vmatmul.mubr.msk.f32.vlgmr.msra.gmra.mxu0 %vm2594_vm8, %v2560_v9 }
 0x900   :  { %v2503_v35 = vpop.permute.xlu1 %2502  ;;  %v2561_v38 = vld [vmem:[#allocation2 + $0x10] sm:$0xff] }
 0x901   :  { %2547 = vst.msk [vmem:[#allocation2 + $0x20] sm:$0xff] %vm2542_vm14, %v2503_v35  ;;  %4831 = vmatprep.mubr.msk.f32.mxu0 %vm2594_vm8, %v2561_v38 }
 0x902   :  { %v2351_v39 = vpop.permute.xlu0 %2350 }
 0x903   :  { %2390 = vst.msk [vmem:[#allocation2 + $0x48] sm:$0xff] %vm2380_vm7, %v2351_v39 }
 0x904   :  { %v2345_v61 = vpop.permute.xlu1 %2344 }
 0x905   :  { %2387 = vst.msk [vmem:[#allocation2 + $0x30] sm:$0xff] %vm2380_vm7, %v2345_v61 }
 0x906   :  { %v2505_v0 = vpop.permute.xlu0 %2504  ;;  %v2562_v3 = vld [vmem:[#allocation2 + $0x18] sm:$0xff] }
 0x907   :  { %2548 = vst.msk [vmem:[#allocation2 + $0x28] sm:$0xff] %vm2542_vm14, %v2505_v0  ;;  %4832 = vmatmul.mubr.msk.f32.gmra.mxu0 %vm2594_vm8, %v2562_v3 }
 0x908   :  { %v2507_v54 = vpop.permute.xlu1 %2506  ;;  %v2563_v43 = vld [vmem:[#allocation2 + $0x20] sm:$0xff] }
 0x909   :  { %2549 = vst.msk [vmem:[#allocation2 + $0x30] sm:$0xff] %vm2542_vm14, %v2507_v54  ;;  %4834 = vmatprep.mubr.msk.f32.mxu0 %vm2594_vm8, %v2563_v43  ;;  %v3103_v43 = vld [vmem:[%s7212_s12 + $0x58] sm:$0xff] }
 0x90a   :  { %v2355_v57 = vpop.permute.xlu0 %2354  ;;  %4852 = vmatprep.subr.mxu1 %v3103_v43 }
 0x90b   :  { %2392 = vst.msk [vmem:[#allocation2 + $0x58] sm:$0xff] %vm2380_vm7, %v2355_v57  ;;  %v6684_v57 = vld [vmem:[%s7211_s11] ss:$0 sm:$0xff]  ;;  %4853 = vmatpush3.msra.mxu1 %v3103_v43  ;;  %v3094_v43 = vld [vmem:[%s7212_s12 + $0x10] sm:$0xff] }
 0x90c   :  { %v2349_v10 = vpop.permute.xlu1 %2348 }
 0x90d   :  { %2389 = vst.msk [vmem:[#allocation2 + $0x40] sm:$0xff] %vm2380_vm7, %v2349_v10  ;;  %v3102_v10 = vld [vmem:[%s7212_s12 + $0x50] sm:$0xff] }
 0x90e   :  { %v2509_v15 = vpop.permute.xlu0 %2508  ;;  %v2564_v33 = vld [vmem:[#allocation2 + $0x28] sm:$0xff]  ;;  %4854 = vmatprep.subr.mxu1 %v3102_v10 }
 0x90f   :  { %2550 = vst.msk [vmem:[#allocation2 + $0x38] sm:$0xff] %vm2542_vm14, %v2509_v15  ;;  %4835 = vmatmul.mubr.msk.f32.gmra.mxu0 %vm2594_vm8, %v2564_v33  ;;  %4855 = vmatpush3.msra.mxu1 %v3102_v10  ;;  %v3101_v33 = vld [vmem:[%s7212_s12 + $0x48] sm:$0xff] }
 0x910   :  { %v2511_v25 = vpop.permute.xlu1 %2510  ;;  %v2565_v20 = vld [vmem:[#allocation2 + $0x30] sm:$0xff]  ;;  %4856 = vmatprep.subr.mxu1 %v3101_v33 }
 0x911   :  { %2551 = vst.msk [vmem:[#allocation2 + $0x40] sm:$0xff] %vm2542_vm14, %v2511_v25  ;;  %4837 = vmatprep.mubr.msk.f32.mxu0 %vm2594_vm8, %v2565_v20  ;;  %4857 = vmatpush3.msra.mxu1 %v3101_v33 }
 0x912   :  { %v2359_v34 = vpop.permute.xlu0 %2358 }
 0x913   :  { %2394 = vst.msk [vmem:[#allocation2 + $0x68] sm:$0xff] %vm2380_vm7, %v2359_v34  ;;  %v3100_v34 = vld [vmem:[%s7212_s12 + $0x40] sm:$0xff] }
 0x914   :  { %v2353_v30 = vpop.permute.xlu1 %2352  ;;  %4858 = vmatprep.subr.mxu1 %v3100_v34 }
 0x915   :  { %2391 = vst.msk [vmem:[#allocation2 + $0x50] sm:$0xff] %vm2380_vm7, %v2353_v30  ;;  %4859 = vmatpush3.msra.mxu1 %v3100_v34  ;;  %v3093_v34 = vld [vmem:[%s7212_s12 + $0x8] sm:$0xff] }
 0x916   :  { %v2513_v42 = vpop.permute.xlu0 %2512  ;;  %v2566_v47 = vld [vmem:[#allocation2 + $0x38] sm:$0xff] }
 0x917   :  { %2552 = vst.msk [vmem:[#allocation2 + $0x48] sm:$0xff] %vm2542_vm14, %v2513_v42  ;;  %4838 = vmatmul.mubr.msk.f32.gmra.mxu0 %vm2594_vm8, %v2566_v47  ;;  %v3099_v47 = vld [vmem:[%s7212_s12 + $0x38] sm:$0xff] }
 0x918   :  { %v2515_v5 = vpop.permute.xlu1 %2514  ;;  %v2567_v31 = vld [vmem:[#allocation2 + $0x40] sm:$0xff]  ;;  %4860 = vmatprep.subr.mxu1 %v3099_v47 }
 0x919   :  { %2553 = vst.msk [vmem:[#allocation2 + $0x50] sm:$0xff] %vm2542_vm14, %v2515_v5  ;;  %4840 = vmatprep.mubr.msk.f32.mxu0 %vm2594_vm8, %v2567_v31  ;;  %4861 = vmatpush3.msra.mxu1 %v3099_v47  ;;  %v3098_v31 = vld [vmem:[%s7212_s12 + $0x30] sm:$0xff] }
 0x91a   :  { %v2363_v53 = vpop.permute.xlu0 %2362  ;;  %4862 = vmatprep.subr.mxu1 %v3098_v31 }
 0x91b   :  { %2396 = vst.msk [vmem:[#allocation2 + $0x78] sm:$0xff] %vm2380_vm7, %v2363_v53  ;;  %4863 = vmatpush3.msra.mxu1 %v3098_v31 }
 0x91c   :  { %v2357_v2 = vpop.permute.xlu1 %2356 }
 0x91d   :  { %2393 = vst.msk [vmem:[#allocation2 + $0x60] sm:$0xff] %vm2380_vm7, %v2357_v2 }
 0x91e   :  { %v2517_v41 = vpop.permute.xlu0 %2516  ;;  %v2568_v58 = vld [vmem:[#allocation2 + $0x48] sm:$0xff] }
 0x91f   :  { %2554 = vst.msk [vmem:[#allocation2 + $0x58] sm:$0xff] %vm2542_vm14, %v2517_v41  ;;  %4841 = vmatmul.mubr.msk.f32.gmra.mxu0 %vm2594_vm8, %v2568_v58 }
 0x920   :  { %v2519_v18 = vpop.permute.xlu1 %2518  ;;  %v2569_v19 = vld [vmem:[#allocation2 + $0x50] sm:$0xff] }
 0x921   :  { %2555 = vst.msk [vmem:[#allocation2 + $0x60] sm:$0xff] %vm2542_vm14, %v2519_v18  ;;  %4843 = vmatprep.mubr.msk.f32.mxu0 %vm2594_vm8, %v2569_v19  ;;  %v3097_v19 = vld [vmem:[%s7212_s12 + $0x28] sm:$0xff] }
 0x922   :  { %v2521_v48 = vpop.permute.xlu0 %2520  ;;  %4864 = vmatprep.subr.mxu1 %v3097_v19 }
 0x923   :  { %2556 = vst.msk [vmem:[#allocation2 + $0x68] sm:$0xff] %vm2542_vm14, %v2521_v48  ;;  %4865 = vmatpush3.msra.mxu1 %v3097_v19  ;;  %v3092_v19 = vld [vmem:[%s7212_s12] sm:$0xff] }
 0x924   :  { %v2361_v9 = vpop.permute.xlu1 %2360 }
 0x925   :  { %2395 = vst.msk [vmem:[#allocation2 + $0x70] sm:$0xff] %vm2380_vm7, %v2361_v9 }
 0x926   :  { %v2525_v35 = vpop.permute.xlu0 %2524  ;;  %v2570_v38 = vld [vmem:[#allocation2 + $0x58] sm:$0xff] }
 0x927   :  { %2558 = vst.msk [vmem:[#allocation2 + $0x78] sm:$0xff] %vm2542_vm14, %v2525_v35  ;;  %4844 = vmatmul.mubr.msk.f32.gmra.mxu0 %vm2594_vm8, %v2570_v38 }
 0x928   :  { %v2523_v39 = vpop.permute.xlu1 %2522  ;;  %v2571_v61 = vld [vmem:[#allocation2 + $0x60] sm:$0xff] }
 0x929   :  { %2557 = vst.msk [vmem:[#allocation2 + $0x70] sm:$0xff] %vm2542_vm14, %v2523_v39  ;;  %4846 = vmatprep.mubr.msk.f32.mxu0 %vm2594_vm8, %v2571_v61  ;;  %v3096_v39 = vld [vmem:[%s7212_s12 + $0x20] sm:$0xff] }
 0x92a   :  { %v2572_v0 = vld [vmem:[#allocation2 + $0x68] sm:$0xff]  ;;  %4866 = vmatprep.subr.mxu1 %v3096_v39 }
 0x92b   :  { %4847 = vmatmul.mubr.msk.f32.gmra.mxu0 %vm2594_vm8, %v2572_v0  ;;  %4867 = vmatpush3.msra.mxu1 %v3096_v39 }
 0x92e   :  { %v2574_v54 = vld [vmem:[#allocation2 + $0x78] sm:$0xff] }
 0x930   :  { %v2573_v3 = vld [vmem:[#allocation2 + $0x70] sm:$0xff] }
 0x931   :  { %4849 = vmatprep.mubr.msk.f32.mxu0 %vm2594_vm8, %v2573_v3  ;;  %v3095_v3 = vld [vmem:[%s7212_s12 + $0x18] sm:$0xff] }
 0x932   :  { %4850 = vmatmul.mubr.msk.f32.gmra.mxu0 %vm2594_vm8, %v2574_v54  ;;  %4868 = vmatprep.subr.mxu1 %v3095_v3 }
 0x933   :  { %4869 = vmatpush3.msra.mxu1 %v3095_v3 }
 0x934   :  { %4870 = vmatprep.subr.mxu1 %v3094_v43 }
 0x935   :  { %4871 = vmatpush3.msra.mxu1 %v3094_v43 }
 0x936   :  { %4872 = vmatprep.subr.mxu1 %v3093_v34 }
 0x937   :  { %4873 = vmatpush3.msra.mxu1 %v3093_v34 }
 0x938   :  { %4874 = vmatprep.subr.mxu1 %v3092_v19 }
 0x939   :  { %4875 = vmatpush3.msra.mxu1 %v3092_v19 }
 0x9bf   :  { %v4830_v15 = vpop.f32.mrf.mxu0 }
 0x9c0   :  { %v2715_v25 = vadd.f32 %v4830_v15, %v6684_v57 }
 0x9c1   :  { %v2709_v20 = vpop.f32.mrf.mxu0 }
 0x9c2   :  { %v6696_v30 = vmax.f32 %v2715_v25, 0.0  ;;  %v2710_v42 = vadd.f32 %v6684_v57, %v2709_v20 }
 0x9c4   :  { %v6702_v5 = vmax.f32 %v2710_v42, 0.0  ;;  %2886 = vrot.lane.b32.xlu0 %v6696_v30, %s5096_s20  ;;  %v2805_v53 = vrot.slane %v6696_v30, 7  ;;  %v2949_v2 = vrot.slane %v6696_v30, 1 }
 0x9c6   :  { %v2804_v41 = vrot.slane %v6702_v5, 7  ;;  %v2948_v58 = vrot.slane %v6702_v5, 1  ;;  %2884 = vrot.lane.b32.xlu1 %v6702_v5, %s5096_s20 }
 0x9c7   :  { %v4833_v18 = vpop.f32.mrf.mxu0 }
 0x9c8   :  { %v2725_v48 = vadd.f32 %v4833_v18, %v6684_v57  ;;  %v2978_v9 = vsel %vm2413_vm0, %v2948_v58, %v2949_v2  ;;  %v2834_v35 = vsel %vm2235_vm5, %v2804_v41, %v2805_v53 }
 0x9c9   :  { %v2719_v38 = vpop.f32.mrf.mxu0  ;;  %2853 = vst.msk [vmem:[#allocation2 + $0x8] sm:$0xff] %vm7427_vm1, %v2834_v35 }
 0x9ca   :  { %v6731_v61 = vmax.f32 %v2725_v48, 0.0  ;;  %v2720_v0 = vadd.f32 %v6684_v57, %v2719_v38  ;;  %3012 = vrot.lane.b32.xlu1 %v2978_v9, %s5097_s28 }
 0x9cc   :  { %v2790_v54 = vmax.f32 %v2720_v0, 0.0  ;;  %2890 = vrot.lane.b32.xlu0 %v6731_v61, %s5096_s20  ;;  %v2807_v10 = vrot.slane %v6731_v61, 7  ;;  %v2951_v15 = vrot.slane %v6731_v61, 1 }
 0x9ce   :  { %v2806_v33 = vrot.slane %v2790_v54, 7  ;;  %v2950_v25 = vrot.slane %v2790_v54, 1  ;;  %2888 = vrot.lane.b32.xlu1 %v2790_v54, %s5096_s20 }
 0x9cf   :  { %v4836_v20 = vpop.f32.mrf.mxu0 }
 0x9d0   :  { %v2735_v30 = vadd.f32 %v4836_v20, %v6684_v57  ;;  %v2976_v42 = vsel %vm2413_vm0, %v2950_v25, %v2951_v15  ;;  %v2832_v47 = vsel %vm2235_vm5, %v2806_v33, %v2807_v10  ;;  %v2833_v18 = vsel %vm2235_vm5, %v2805_v53, %v2806_v33 }
 0x9d1   :  { %v2729_v31 = vpop.f32.mrf.mxu0  ;;  %2855 = vst.msk [vmem:[#allocation2 + $0x18] sm:$0xff] %vm7436_vm10, %v2832_v47  ;;  %v2977_v3 = vsel %vm2413_vm0, %v2949_v2, %v2950_v25  ;;  %vm7444_vm10 = vmmov %vm7427_vm1 }
 0x9d2   :  { %v2793_v48 = vmax.f32 %v2735_v30, 0.0  ;;  %v2730_v9 = vadd.f32 %v6684_v57, %v2729_v31  ;;  %3016 = vrot.lane.b32.xlu1 %v2976_v42, %s5097_s28  ;;  %2854 = vst.msk [vmem:[#allocation2 + $0x10] sm:$0xff] %vm7437_vm9, %v2833_v18  ;;  %vm7445_vm9 = vmmov %vm7427_vm1 }
 0x9d4   :  { %v2792_v35 = vmax.f32 %v2730_v9, 0.0  ;;  %2894 = vrot.lane.b32.xlu0 %v2793_v48, %s5096_s20  ;;  %v2809_v38 = vrot.slane %v2793_v48, 7  ;;  %v2953_v39 = vrot.slane %v2793_v48, 1 }
 0x9d6   :  { %v2808_v53 = vrot.slane %v2792_v35, 7  ;;  %v2952_v61 = vrot.slane %v2792_v35, 1  ;;  %2892 = vrot.lane.b32.xlu1 %v2792_v35, %s5096_s20 }
 0x9d7   :  { %v4839_v0 = vpop.f32.mrf.mxu0 }
 0x9d8   :  { %v2745_v54 = vadd.f32 %v4839_v0, %v6684_v57  ;;  %3014 = vrot.lane.b32.xlu0 %v2977_v3, %s5097_s28  ;;  %v2974_v43 = vsel %vm2413_vm0, %v2952_v61, %v2953_v39  ;;  %v2830_v33 = vsel %vm2235_vm5, %v2808_v53, %v2809_v38  ;;  %v2831_v34 = vsel %vm2235_vm5, %v2807_v10, %v2808_v53 }
 0x9d9   :  { %v2739_v20 = vpop.f32.mrf.mxu0  ;;  %2857 = vst.msk [vmem:[#allocation2 + $0x28] sm:$0xff] %vm7438_vm4, %v2830_v33  ;;  %v2975_v10 = vsel %vm2413_vm0, %v2951_v15, %v2952_v61  ;;  %vm7446_vm4 = vmmov %vm7427_vm1 }
 0x9da   :  { %v2795_v30 = vmax.f32 %v2745_v54, 0.0  ;;  %v2740_v42 = vadd.f32 %v6684_v57, %v2739_v20  ;;  %3020 = vrot.lane.b32.xlu1 %v2974_v43, %s5097_s28  ;;  %2856 = vst.msk [vmem:[#allocation2 + $0x20] sm:$0xff] %vm7439_vm11, %v2831_v34  ;;  %vm7447_vm11 = vmmov %vm7427_vm1 }
 0x9dc   :  { %v2794_v2 = vmax.f32 %v2740_v42, 0.0  ;;  %2898 = vrot.lane.b32.xlu0 %v2795_v30, %s5096_s20  ;;  %v2811_v25 = vrot.slane %v2795_v30, 7  ;;  %v2955_v47 = vrot.slane %v2795_v30, 1 }
 0x9de   :  { %v2810_v31 = vrot.slane %v2794_v2, 7  ;;  %v2954_v18 = vrot.slane %v2794_v2, 1  ;;  %2896 = vrot.lane.b32.xlu1 %v2794_v2, %s5096_s20 }
 0x9df   :  { %v4842_v19 = vpop.f32.mrf.mxu0 }
 0x9e0   :  { %v2755_v48 = vadd.f32 %v4842_v19, %v6684_v57  ;;  %3018 = vrot.lane.b32.xlu0 %v2975_v10, %s5097_s28  ;;  %v2972_v9 = vsel %vm2413_vm0, %v2954_v18, %v2955_v47  ;;  %v2828_v35 = vsel %vm2235_vm5, %v2810_v31, %v2811_v25  ;;  %v2829_v0 = vsel %vm2235_vm5, %v2809_v38, %v2810_v31 }
 0x9e1   :  { %v2749_v53 = vpop.f32.mrf.mxu0  ;;  %2859 = vst.msk [vmem:[#allocation2 + $0x38] sm:$0xff] %vm7440_vm13, %v2828_v35  ;;  %v2973_v34 = vsel %vm2413_vm0, %v2953_v39, %v2954_v18  ;;  %vm7448_vm13 = vmmov %vm7427_vm1 }
 0x9e2   :  { %v6792_v3 = vmax.f32 %v2755_v48, 0.0  ;;  %v2750_v15 = vadd.f32 %v6684_v57, %v2749_v53  ;;  %3024 = vrot.lane.b32.xlu1 %v2972_v9, %s5097_s28  ;;  %2858 = vst.msk [vmem:[#allocation2 + $0x30] sm:$0xff] %vm7441_vm15, %v2829_v0  ;;  %vm7449_vm15 = vmmov %vm7427_vm1 }
 0x9e4   :  { %v2796_v61 = vmax.f32 %v2750_v15, 0.0  ;;  %2902 = vrot.lane.b32.xlu0 %v6792_v3, %s5096_s20  ;;  %v2813_v54 = vrot.slane %v6792_v3, 7  ;;  %v2957_v43 = vrot.slane %v6792_v3, 1 }
 0x9e6   :  { %v2812_v33 = vrot.slane %v2796_v61, 7  ;;  %v2956_v20 = vrot.slane %v2796_v61, 1  ;;  %2900 = vrot.lane.b32.xlu1 %v2796_v61, %s5096_s20 }
 0x9e7   :  { %v4845_v38 = vpop.f32.mrf.mxu0 }
 0x9e8   :  { %v2765_v30 = vadd.f32 %v4845_v38, %v6684_v57  ;;  %3022 = vrot.lane.b32.xlu0 %v2973_v34, %s5097_s28  ;;  %v2970_v42 = vsel %vm2413_vm0, %v2956_v20, %v2957_v43  ;;  %v2826_v2 = vsel %vm2235_vm5, %v2812_v33, %v2813_v54  ;;  %v2827_v19 = vsel %vm2235_vm5, %v2811_v25, %v2812_v33 }
 0x9e9   :  { %v2759_v31 = vpop.f32.mrf.mxu0  ;;  %2861 = vst.msk [vmem:[#allocation2 + $0x48] sm:$0xff] %vm7442_vm2, %v2826_v2  ;;  %v2971_v33 = vsel %vm2413_vm0, %v2955_v47, %v2956_v20 }
 0x9ea   :  { %v2799_v10 = vmax.f32 %v2765_v30, 0.0  ;;  %v2760_v48 = vadd.f32 %v6684_v57, %v2759_v31  ;;  %3028 = vrot.lane.b32.xlu1 %v2970_v42, %s5097_s28  ;;  %2860 = vst.msk [vmem:[#allocation2 + $0x40] sm:$0xff] %vm7443_vm12, %v2827_v19 }
 0x9eb   :  { %v4848_v39 = vpop.f32.mrf.mxu0 }
 0x9ec   :  { %v2798_v18 = vmax.f32 %v2760_v48, 0.0  ;;  %v2775_v9 = vadd.f32 %v4848_v39, %v6684_v57  ;;  %2906 = vrot.lane.b32.xlu0 %v2799_v10, %s5096_s20  ;;  %v2959_v35 = vrot.slane %v2799_v10, 1  ;;  %v2815_v61 = vrot.slane %v2799_v10, 7 }
 0x9ed   :  { %v2769_v53 = vpop.f32.mrf.mxu0 }
 0x9ee   :  { %v2814_v0 = vrot.slane %v2798_v18, 7  ;;  %v2958_v3 = vrot.slane %v2798_v18, 1  ;;  %v2801_v15 = vmax.f32 %v2775_v9, 0.0  ;;  %v2770_v25 = vadd.f32 %v6684_v57, %v2769_v53  ;;  %2904 = vrot.lane.b32.xlu1 %v2798_v18, %s5096_s20 }
 0x9f0   :  { %v2800_v38 = vmax.f32 %v2770_v25, 0.0  ;;  %3026 = vrot.lane.b32.xlu0 %v2971_v33, %s5097_s28  ;;  %v2968_v34 = vsel %vm2413_vm0, %v2958_v3, %v2959_v35  ;;  %v2824_v30 = vsel %vm2235_vm5, %v2814_v0, %v2815_v61  ;;  %v2825_v42 = vsel %vm2235_vm5, %v2813_v54, %v2814_v0 }
 0x9f1   :  { %v2817_v2 = vrot.slane %v2801_v15, 7  ;;  %2863 = vst.msk [vmem:[#allocation2 + $0x58] sm:$0xff] %vm7427_vm1, %v2824_v30  ;;  %v2961_v9 = vrot.slane %v2801_v15, 1  ;;  %v2969_v25 = vsel %vm2413_vm0, %v2957_v43, %v2958_v3 }
 0x9f2   :  { %v2816_v31 = vrot.slane %v2800_v38, 7  ;;  %3032 = vrot.lane.b32.xlu1 %v2968_v34, %s5097_s28  ;;  %v4851_v19 = vpop.f32.mrf.mxu0  ;;  %2862 = vst.msk [vmem:[#allocation2 + $0x50] sm:$0xff] %vm7444_vm10, %v2825_v42  ;;  %v2960_v48 = vrot.slane %v2800_v38, 1 }
 0x9f3   :  { %v2785_v47 = vadd.f32 %v4851_v19, %v6684_v57 }
 0x9f4   :  { %2910 = vrot.lane.b32.xlu0 %v2801_v15, %s5096_s20  ;;  %v2779_v20 = vpop.f32.mrf.mxu0  ;;  %v2822_v10 = vsel %vm2235_vm5, %v2816_v31, %v2817_v2  ;;  %v2823_v54 = vsel %vm2235_vm5, %v2815_v61, %v2816_v31  ;;  %v2966_v61 = vsel %vm2413_vm0, %v2960_v48, %v2961_v9  ;;  %v2967_v14 = vsel %vm2413_vm0, %v2959_v35, %v2960_v48 }
 0x9f5   :  { %v2803_v39 = vmax.f32 %v2785_v47, 0.0  ;;  %v2780_v18 = vadd.f32 %v6684_v57, %v2779_v20  ;;  %2865 = vst.msk [vmem:[#allocation2 + $0x68] sm:$0xff] %vm7445_vm9, %v2822_v10 }
 0x9f6   :  { %2864 = vst.msk [vmem:[#allocation2 + $0x60] sm:$0xff] %vm7446_vm4, %v2823_v54  ;;  %2908 = vrot.lane.b32.xlu1 %v2800_v38, %s5096_s20 }
 0x9f7   :  { %v2819_v53 = vrot.slane %v2803_v39, 7  ;;  %v2802_v0 = vmax.f32 %v2780_v18, 0.0  ;;  %v2963_v38 = vrot.slane %v2803_v39, 1 }
 0x9f8   :  { %3030 = vrot.lane.b32.xlu0 %v2969_v25, %s5097_s28 }
 0x9f9   :  { %v2818_v33 = vrot.slane %v2802_v0, 7  ;;  %v2835_v57 = vsel %vm2235_vm5, %v2819_v53, %v2804_v41  ;;  %v2962_v41 = vrot.slane %v2802_v0, 1  ;;  %v2979_v42 = vsel %vm2413_vm0, %v2963_v38, %v2948_v58 }
 0x9fa   :  { %3036 = vrot.lane.b32.xlu1 %v2966_v61, %s5097_s28  ;;  %v2836_v15 = vsel %vm2107_vm3, %v2835_v57, 0.0  ;;  %v2995_v35 = vsel %vm2202_vm6, %v2979_v42, 0.0 }
 0x9fb   :  { %2852 = vst.msk [vmem:[#allocation2] sm:$0xff] %vm7447_vm11, %v2836_v15  ;;  %v2820_v43 = vsel %vm2235_vm5, %v2818_v33, %v2819_v53  ;;  %v2821_v3 = vsel %vm2235_vm5, %v2817_v2, %v2818_v33  ;;  %v2964_v34 = vsel %vm2413_vm0, %v2962_v41, %v2963_v38  ;;  %v2965_v30 = vsel %vm2413_vm0, %v2961_v9, %v2962_v41 }
 0x9fc   :  { %2914 = vrot.lane.b32.xlu0 %v2803_v39, %s5096_s20  ;;  %2867 = vst.msk [vmem:[#allocation2 + $0x78] sm:$0xff] %vm7448_vm13, %v2820_v43 }
 0x9fd   :  { %2866 = vst.msk [vmem:[#allocation2 + $0x70] sm:$0xff] %vm7449_vm15, %v2821_v3 }
 0x9fe   :  { %2912 = vrot.lane.b32.xlu1 %v2802_v0, %s5096_s20 }
 0xa00   :  { %3034 = vrot.lane.b32.xlu0 %v2967_v14, %s5097_s28 }
 0xa02   :  { %3040 = vrot.lane.b32.xlu1 %v2964_v34, %s5097_s28 }
 0xa04   :  { %3038 = vrot.lane.b32.xlu0 %v2965_v30, %s5097_s28 }
 0xa08   :  { %3042 = vrot.lane.b32.xlu0 %v2995_v35, %s5097_s28 }
 0xa26   :  { %1682 = vadd.xlane.f32.xlu1 %v6064_v4 }
 0xa27   :  { %1684 = vadd.xlane.f32.xlu0 %v6108_v52 }
 0xa2a   :  { %1688 = vadd.xlane.f32.xlu1 %v6150_v11 }
 0xa2b   :  { %1686 = vadd.xlane.f32.xlu0 %v6177_v63  ;;  %v7450_v63 = vld [vmem:[#allocation22_spill] sm:$0xff] }
 0xa2e   :  { %1692 = vadd.xlane.f32.xlu1 %v6206_v51 }
 0xa2f   :  { %1690 = vadd.xlane.f32.xlu0 %v6233_v44 }
 0xa32   :  { %1696 = vadd.xlane.f32.xlu1 %v6257_v40 }
 0xa33   :  { %1694 = vadd.xlane.f32.xlu0 %v6279_v28 }
 0xa36   :  { %v2887_v7 = vpop.permute.xlu0 %2886  ;;  %1700 = vadd.xlane.f32.xlu1 %v6298_v6 }
 0xa37   :  { %2933 = vst.msk [vmem:[#allocation2 + $0x8] sm:$0xff] %vm2380_vm7, %v2887_v7  ;;  %1698 = vadd.xlane.f32.xlu0 %v6311_v24 }
 0xa38   :  { %v2885_v4 = vpop.permute.xlu1 %2884 }
 0xa39   :  { %2932 = vst.msk [vmem:[#allocation2] sm:$0xff] %vm2380_vm7, %v2885_v4 }
 0xa3a   :  { %1704 = vadd.xlane.f32.xlu1 %v6324_v26 }
 0xa3b   :  { %1702 = vadd.xlane.f32.xlu0 %v6337_v56 }
 0xa3c   :  { %v3013_v52 = vpop.permute.xlu1 %3012 }
 0xa3d   :  { %3060 = vst.msk [vmem:[#allocation2] sm:$0xff] %vm2542_vm14, %v3013_v52 }
 0xa3e   :  { %v2891_v11 = vpop.permute.xlu0 %2890  ;;  %1708 = vadd.xlane.f32.xlu1 %v7450_v63 }
 0xa3f   :  { %2935 = vst.msk [vmem:[#allocation2 + $0x18] sm:$0xff] %vm2380_vm7, %v2891_v11  ;;  %1706 = vadd.xlane.f32.xlu0 %v6350_v62 }
 0xa40   :  { %v2889_v51 = vpop.permute.xlu1 %2888 }
 0xa41   :  { %2934 = vst.msk [vmem:[#allocation2 + $0x10] sm:$0xff] %vm2380_vm7, %v2889_v51 }
 0xa42   :  { %1712 = vadd.xlane.f32.xlu1 %v6361_v50 }
 0xa43   :  { %1710 = vadd.xlane.f32.xlu0 %v6367_v27 }
 0xa44   :  { %v3017_v44 = vpop.permute.xlu1 %3016  ;;  %v3076_v40 = vld [vmem:[#allocation2] sm:$0xff] }
 0xa45   :  { %3062 = vst.msk [vmem:[#allocation2 + $0x10] sm:$0xff] %vm2542_vm14, %v3017_v44  ;;  %4876 = vmatprep.mubr.msk.f32.mxu1 %vm2594_vm8, %v3076_v40 }
 0xa46   :  { %v2895_v28 = vpop.permute.xlu0 %2894 }
 0xa47   :  { %2937 = vst.msk [vmem:[#allocation2 + $0x28] sm:$0xff] %vm2380_vm7, %v2895_v28 }
 0xa48   :  { %v2893_v6 = vpop.permute.xlu1 %2892 }
 0xa49   :  { %2936 = vst.msk [vmem:[#allocation2 + $0x20] sm:$0xff] %vm2380_vm7, %v2893_v6 }
 0xa4a   :  { %v3015_v24 = vpop.permute.xlu0 %3014 }
 0xa4b   :  { %3061 = vst.msk [vmem:[#allocation2 + $0x8] sm:$0xff] %vm2542_vm14, %v3015_v24 }
 0xa4c   :  { %v3021_v26 = vpop.permute.xlu1 %3020  ;;  %v3078_v37 = vld [vmem:[#allocation2 + $0x10] sm:$0xff] }
 0xa4d   :  { %3064 = vst.msk [vmem:[#allocation2 + $0x20] sm:$0xff] %vm2542_vm14, %v3021_v26 }
 0xa4e   :  { %v2899_v56 = vpop.permute.xlu0 %2898 }
 0xa4f   :  { %2939 = vst.msk [vmem:[#allocation2 + $0x38] sm:$0xff] %vm2380_vm7, %v2899_v56 }
 0xa50   :  { %v2897_v62 = vpop.permute.xlu1 %2896 }
 0xa51   :  { %2938 = vst.msk [vmem:[#allocation2 + $0x30] sm:$0xff] %vm2380_vm7, %v2897_v62 }
 0xa52   :  { %v3019_v50 = vpop.permute.xlu0 %3018  ;;  %v3077_v27 = vld [vmem:[#allocation2 + $0x8] sm:$0xff] }
 0xa53   :  { %3063 = vst.msk [vmem:[#allocation2 + $0x18] sm:$0xff] %vm2542_vm14, %v3019_v50  ;;  %4877 = vmatmul.mubr.msk.f32.vlgmr.msra.gmra.mxu1 %vm2594_vm8, %v3077_v27 }
 0xa54   :  { %v3025_v5 = vpop.permute.xlu1 %3024  ;;  %4879 = vmatprep.mubr.msk.f32.mxu1 %vm2594_vm8, %v3078_v37  ;;  %v3080_v47 = vld [vmem:[#allocation2 + $0x20] sm:$0xff] }
 0xa55   :  { %3066 = vst.msk [vmem:[#allocation2 + $0x30] sm:$0xff] %vm2542_vm14, %v3025_v5 }
 0xa56   :  { %v2903_v58 = vpop.permute.xlu0 %2902 }
 0xa57   :  { %2941 = vst.msk [vmem:[#allocation2 + $0x48] sm:$0xff] %vm2380_vm7, %v2903_v58 }
 0xa58   :  { %v2901_v2 = vpop.permute.xlu1 %2900 }
 0xa59   :  { %2940 = vst.msk [vmem:[#allocation2 + $0x40] sm:$0xff] %vm2380_vm7, %v2901_v2 }
 0xa5a   :  { %v3023_v31 = vpop.permute.xlu0 %3022  ;;  %v3079_v19 = vld [vmem:[#allocation2 + $0x18] sm:$0xff] }
 0xa5b   :  { %3065 = vst.msk [vmem:[#allocation2 + $0x28] sm:$0xff] %vm2542_vm14, %v3023_v31  ;;  %4880 = vmatmul.mubr.msk.f32.gmra.mxu1 %vm2594_vm8, %v3079_v19 }
 0xa5c   :  { %v3029_v20 = vpop.permute.xlu1 %3028  ;;  %4882 = vmatprep.mubr.msk.f32.mxu1 %vm2594_vm8, %v3080_v47  ;;  %v3082_v18 = vld [vmem:[#allocation2 + $0x30] sm:$0xff] }
 0xa5d   :  { %3068 = vst.msk [vmem:[#allocation2 + $0x40] sm:$0xff] %vm2542_vm14, %v3029_v20 }
 0xa5e   :  { %v2907_v10 = vpop.permute.xlu0 %2906 }
 0xa5f   :  { %2943 = vst.msk [vmem:[#allocation2 + $0x58] sm:$0xff] %vm2380_vm7, %v2907_v10 }
 0xa60   :  { %v2905_v54 = vpop.permute.xlu1 %2904 }
 0xa61   :  { %2942 = vst.msk [vmem:[#allocation2 + $0x50] sm:$0xff] %vm2380_vm7, %v2905_v54 }
 0xa62   :  { %v3027_v48 = vpop.permute.xlu0 %3026  ;;  %v3081_v39 = vld [vmem:[#allocation2 + $0x28] sm:$0xff] }
 0xa63   :  { %3067 = vst.msk [vmem:[#allocation2 + $0x38] sm:$0xff] %vm2542_vm14, %v3027_v48  ;;  %4883 = vmatmul.mubr.msk.f32.gmra.mxu1 %vm2594_vm8, %v3081_v39 }
 0xa64   :  { %v3033_v9 = vpop.permute.xlu1 %3032  ;;  %4885 = vmatprep.mubr.msk.f32.mxu1 %vm2594_vm8, %v3082_v18  ;;  %v3084_v61 = vld [vmem:[#allocation2 + $0x40] sm:$0xff] }
 0xa65   :  { %3070 = vst.msk [vmem:[#allocation2 + $0x50] sm:$0xff] %vm2542_vm14, %v3033_v9  ;;  %v6974_v9 = vld [vmem:[%s7213_s13] ss:$0 sm:$0xff] }
 0xa66   :  { %v2911_v53 = vpop.permute.xlu0 %2910 }
 0xa67   :  { %2945 = vst.msk [vmem:[#allocation2 + $0x68] sm:$0xff] %vm2380_vm7, %v2911_v53 }
 0xa68   :  { %v2909_v0 = vpop.permute.xlu1 %2908 }
 0xa69   :  { %2944 = vst.msk [vmem:[#allocation2 + $0x60] sm:$0xff] %vm2380_vm7, %v2909_v0 }
 0xa6a   :  { %v3031_v25 = vpop.permute.xlu0 %3030  ;;  %v3083_v33 = vld [vmem:[#allocation2 + $0x38] sm:$0xff] }
 0xa6b   :  { %3069 = vst.msk [vmem:[#allocation2 + $0x48] sm:$0xff] %vm2542_vm14, %v3031_v25  ;;  %4886 = vmatmul.mubr.msk.f32.gmra.mxu1 %vm2594_vm8, %v3083_v33 }
 0xa6c   :  { %v3037_v57 = vpop.permute.xlu1 %3036  ;;  %4888 = vmatprep.mubr.msk.f32.mxu1 %vm2594_vm8, %v3084_v61  ;;  %v3086_v38 = vld [vmem:[#allocation2 + $0x50] sm:$0xff] }
 0xa6d   :  { %3072 = vst.msk [vmem:[#allocation2 + $0x60] sm:$0xff] %vm2542_vm14, %v3037_v57 }
 0xa6e   :  { %v2915_v15 = vpop.permute.xlu0 %2914 }
 0xa6f   :  { %2947 = vst.msk [vmem:[#allocation2 + $0x78] sm:$0xff] %vm2380_vm7, %v2915_v15 }
 0xa70   :  { %v2913_v43 = vpop.permute.xlu1 %2912 }
 0xa71   :  { %2946 = vst.msk [vmem:[#allocation2 + $0x70] sm:$0xff] %vm2380_vm7, %v2913_v43 }
 0xa72   :  { %v3035_v3 = vpop.permute.xlu0 %3034  ;;  %v3085_v41 = vld [vmem:[#allocation2 + $0x48] sm:$0xff] }
 0xa73   :  { %3071 = vst.msk [vmem:[#allocation2 + $0x58] sm:$0xff] %vm2542_vm14, %v3035_v3  ;;  %4889 = vmatmul.mubr.msk.f32.gmra.mxu1 %vm2594_vm8, %v3085_v41 }
 0xa74   :  { %4891 = vmatprep.mubr.msk.f32.mxu1 %vm2594_vm8, %v3086_v38  ;;  %v3041_v14 = vpop.permute.xlu1 %3040  ;;  %v3088_v35 = vld [vmem:[#allocation2 + $0x60] sm:$0xff] }
 0xa75   :  { %3074 = vst.msk [vmem:[#allocation2 + $0x70] sm:$0xff] %vm2542_vm14, %v3041_v14 }
 0xa76   :  { %v3039_v34 = vpop.permute.xlu0 %3038 }
 0xa77   :  { %3073 = vst.msk [vmem:[#allocation2 + $0x68] sm:$0xff] %vm2542_vm14, %v3039_v34 }
 0xa7a   :  { %v3043_v30 = vpop.permute.xlu0 %3042  ;;  %v3087_v42 = vld [vmem:[#allocation2 + $0x58] sm:$0xff] }
 0xa7b   :  { %3075 = vst.msk [vmem:[#allocation2 + $0x78] sm:$0xff] %vm2542_vm14, %v3043_v30  ;;  %4892 = vmatmul.mubr.msk.f32.gmra.mxu1 %vm2594_vm8, %v3087_v42 }
 0xa7c   :  { %4894 = vmatprep.mubr.msk.f32.mxu1 %vm2594_vm8, %v3088_v35  ;;  %v3090_v4 = vld [vmem:[#allocation2 + $0x70] sm:$0xff] }
 0xa7e   :  { %v3089_v7 = vld [vmem:[#allocation2 + $0x68] sm:$0xff] }
 0xa7f   :  { %4895 = vmatmul.mubr.msk.f32.gmra.mxu1 %vm2594_vm8, %v3089_v7 }
 0xa80   :  { %4897 = vmatprep.mubr.msk.f32.mxu1 %vm2594_vm8, %v3090_v4 }
 0xa82   :  { %v3091_v52 = vld [vmem:[#allocation2 + $0x78] sm:$0xff] }
 0xa83   :  { %4898 = vmatmul.mubr.msk.f32.gmra.mxu1 %vm2594_vm8, %v3091_v52 }
 0xaaf   :  { %v1683_v11 = vpop.xlane.xlu1 %1682 }
 0xab0   :  { %v5054_v63 = vtrunc.f32 %v1683_v11  ;;  %v6943_v51 = vpop.xlane.xlu0 %1684 }
 0xab1   :  { %v5056_v11 = vtrunc.f32 %v6943_v51 }
 0xab2   :  { %v5055_v44 = vcvt.f32.s32 %v5054_v63 }
 0xab3   :  { %v6969_v48 = vpop.xlane.xlu1 %1688  ;;  %v5057_v51 = vcvt.f32.s32 %v5056_v11 }
 0xab4   :  { %vm1779_vm0 = vcmp.eq.s32.totalorder %v5623_v17, %v5055_v44  ;;  %v6946_v40 = vpop.xlane.xlu0 %1686 }
 0xab5   :  { %4932 = vmatprep.mubr.msk.f32.mxu0 %vm1779_vm0, %v5095_v1  ;;  %vm1780_vm3 = vcmp.eq.s32.totalorder %v5623_v17, %v5057_v51  ;;  %vm7451_vm0 = vcmask 261120  }
 0xab7   :  { %v6976_v0 = vpop.xlane.xlu1 %1692 }
 0xab8   :  { %v6949_v28 = vpop.xlane.xlu0 %1690 }
 0xabb   :  { %v6981_v15 = vpop.xlane.xlu1 %1696 }
 0xabc   :  { %v6951_v6 = vpop.xlane.xlu0 %1694 }
 0xabf   :  { %v6986_v38 = vpop.xlane.xlu1 %1700 }
 0xac0   :  { %v6953_v24 = vpop.xlane.xlu0 %1698 }
 0xac3   :  { %v1705_v42 = vpop.xlane.xlu1 %1704 }
 0xac4   :  { %v1703_v26 = vpop.xlane.xlu0 %1702 }
 0xac5   :  { %v5074_v56 = vtrunc.f32 %v1703_v26  ;;  %v5058_v26 = vtrunc.f32 %v6946_v40 }
 0xac7   :  { %v5075_v62 = vcvt.f32.s32 %v5074_v56  ;;  %v1709_v63 = vpop.xlane.xlu1 %1708  ;;  %v5076_v56 = vtrunc.f32 %v1705_v42  ;;  %v5059_v40 = vcvt.f32.s32 %v5058_v26  ;;  %v3449_v42 = vld [vmem:[%s7214_s14] sm:$0xff] }
 0xac8   :  { %v1707_v4 = vpop.xlane.xlu0 %1706 }
 0xac9   :  { %vm1789_vm5 = vcmp.eq.s32.totalorder %v5623_v17, %v5075_v62  ;;  %v5078_v62 = vtrunc.f32 %v1707_v4  ;;  %vm1781_vm6 = vcmp.eq.s32.totalorder %v5623_v17, %v5059_v40 }
 0xaca   :  { %4947 = vmatprep.mubr.msk.f32.mxu1 %vm1789_vm5, %v5095_v1  ;;  %vm7452_vm5 = vmmov %vm7451_vm0 }
 0xb13   :  { %v6957_v50 = vpop.f32.mrf.mxu1 }
 0xb15   :  { %v6959_v27 = vpop.f32.mrf.mxu1 }
 0xb1b   :  { %v6961_v37 = vpop.f32.mrf.mxu1 }
 0xb1c   :  { %v3241_v44 = vadd.f32 %v6961_v37, %v6974_v9  ;;  %v3231_v37 = vadd.f32 %v6957_v50, %v6974_v9 }
 0xb1d   :  { %v6963_v5 = vpop.f32.mrf.mxu1 }
 0xb23   :  { %v6965_v58 = vpop.f32.mrf.mxu1 }
 0xb24   :  { %v3251_v7 = vadd.f32 %v6965_v58, %v6974_v9  ;;  %v3236_v58 = vadd.f32 %v6974_v9, %v6963_v5  ;;  %v5062_v5 = vtrunc.f32 %v6949_v28 }
 0xb25   :  { %v6967_v2 = vpop.f32.mrf.mxu1 }
 0xb26   :  { %v3246_v52 = vadd.f32 %v6974_v9, %v6967_v2  ;;  %v1711_v2 = vpop.xlane.xlu0 %1710 }
 0xb2b   :  { %v4887_v31 = vpop.f32.mrf.mxu1 }
 0xb2c   :  { %v3261_v30 = vadd.f32 %v4887_v31, %v6974_v9  ;;  %v5060_v31 = vtrunc.f32 %v6969_v48  ;;  %v5064_v48 = vtrunc.f32 %v6976_v0  ;;  %v5066_v0 = vtrunc.f32 %v6951_v6 }
 0xb2d   :  { %v3255_v19 = vpop.f32.mrf.mxu1  ;;  %v5068_v6 = vtrunc.f32 %v6981_v15  ;;  %v3450_v15 = vld [vmem:[%s7214_s14 + $0x8] sm:$0xff] }
 0xb2e   :  { %v3256_v35 = vadd.f32 %v6974_v9, %v3255_v19  ;;  %v5077_v19 = vcvt.f32.s32 %v5076_v56  ;;  %v5061_v50 = vcvt.f32.s32 %v5060_v31  ;;  %v7118_v56 = vld [vmem:[%s7216_s16] ss:$0 sm:$0xff] }
 0xb30   :  { %vm1790_vm7 = vcmp.eq.s32.totalorder %v5623_v17, %v5077_v19  ;;  %vm1782_vm8 = vcmp.eq.s32.totalorder %v5623_v17, %v5061_v50 }
 0xb33   :  { %v4890_v47 = vpop.f32.mrf.mxu1 }
 0xb34   :  { %v3271_v14 = vadd.f32 %v4890_v47, %v6974_v9  ;;  %v5080_v47 = vtrunc.f32 %v1709_v63 }
 0xb35   :  { %v3265_v20 = vpop.f32.mrf.mxu1 }
 0xb36   :  { %v3266_v34 = vadd.f32 %v6974_v9, %v3265_v20  ;;  %v5079_v20 = vcvt.f32.s32 %v5078_v62  ;;  %v5081_v28 = vcvt.f32.s32 %v5080_v47 }
 0xb38   :  { %vm1791_vm14 = vcmp.eq.s32.totalorder %v5623_v17, %v5079_v20  ;;  %vm1792_vm2 = vcmp.eq.s32.totalorder %v5623_v17, %v5081_v28 }
 0xb3b   :  { %v4893_v10 = vpop.f32.mrf.mxu1 }
 0xb3c   :  { %v3281_v3 = vadd.f32 %v4893_v10, %v6974_v9  ;;  %v1713_v10 = vpop.xlane.xlu1 %1712 }
 0xb3d   :  { %v3275_v54 = vpop.f32.mrf.mxu1 }
 0xb3e   :  { %v3276_v41 = vadd.f32 %v6974_v9, %v3275_v54  ;;  %v5082_v54 = vtrunc.f32 %v1711_v2 }
 0xb3f   :  { %v4896_v39 = vpop.f32.mrf.mxu1 }
 0xb40   :  { %v3291_v57 = vadd.f32 %v4896_v39, %v6974_v9  ;;  %v3226_v39 = vadd.f32 %v6974_v9, %v6959_v27  ;;  %v3452_v27 = vld [vmem:[%s7214_s14 + $0x18] sm:$0xff] }
 0xb41   :  { %v3285_v18 = vpop.f32.mrf.mxu1 }
 0xb42   :  { %v3286_v43 = vadd.f32 %v6974_v9, %v3285_v18  ;;  %v5084_v18 = vtrunc.f32 %v1713_v10 }
 0xb43   :  { %v4899_v53 = vpop.f32.mrf.mxu1 }
 0xb44   :  { %v3301_v25 = vadd.f32 %v4899_v53, %v6974_v9  ;;  %v5063_v53 = vcvt.f32.s32 %v5062_v5 }
 0xb45   :  { %v3295_v33 = vpop.f32.mrf.mxu1 }
 0xb46   :  { %v3296_v61 = vadd.f32 %v6974_v9, %v3295_v33  ;;  %4900 = vmatprep.subr.mxu0 %v3301_v25  ;;  %5020 = vmatprep.subr.mxu1 %v3301_v25  ;;  %v3456_v9 = vld [vmem:[%s7215_s15 + $0x18] sm:$0xff]  ;;  %v5065_v33 = vcvt.f32.s32 %v5064_v48  ;;  %vm1783_vm12 = vcmp.eq.s32.totalorder %v5623_v17, %v5063_v53 }
 0xb47   :  { %4901 = vmatpush3.msra.mxu0 %v3301_v25  ;;  %5036 = vmatpush3.msra.mxu1 %v3301_v25  ;;  %v5083_v25 = vcvt.f32.s32 %v5082_v54 }
 0xb48   :  { %4902 = vmatprep.subr.mxu0 %v3296_v61  ;;  %5021 = vmatprep.subr.mxu1 %v3296_v61  ;;  %vm1784_vm10 = vcmp.eq.s32.totalorder %v5623_v17, %v5065_v33 }
 0xb49   :  { %4903 = vmatpush3.msra.mxu0 %v3296_v61  ;;  %5037 = vmatpush3.msra.mxu1 %v3296_v61  ;;  %v5085_v61 = vcvt.f32.s32 %v5084_v18  ;;  %vm1793_vm1 = vcmp.eq.s32.totalorder %v5623_v17, %v5083_v25 }
 0xb4a   :  { %4904 = vmatprep.subr.mxu0 %v3291_v57  ;;  %5022 = vmatprep.subr.mxu1 %v3291_v57 }
 0xb4b   :  { %4905 = vmatpush3.msra.mxu0 %v3291_v57  ;;  %5038 = vmatpush3.msra.mxu1 %v3291_v57  ;;  %v3451_v57 = vld [vmem:[%s7214_s14 + $0x10] sm:$0xff]  ;;  %vm1794_vm9 = vcmp.eq.s32.totalorder %v5623_v17, %v5085_v61 }
 0xb4c   :  { %4906 = vmatprep.subr.mxu0 %v3286_v43  ;;  %5023 = vmatprep.subr.mxu1 %v3286_v43 }
 0xb4d   :  { %4907 = vmatpush3.msra.mxu0 %v3286_v43  ;;  %5039 = vmatpush3.msra.mxu1 %v3286_v43  ;;  %v3455_v43 = vld [vmem:[%s7215_s15 + $0x10] sm:$0xff] }
 0xb4e   :  { %4908 = vmatprep.subr.mxu0 %v3281_v3  ;;  %5024 = vmatprep.subr.mxu1 %v3281_v3 }
 0xb4f   :  { %4909 = vmatpush3.msra.mxu0 %v3281_v3  ;;  %5040 = vmatpush3.msra.mxu1 %v3281_v3  ;;  %v5067_v3 = vcvt.f32.s32 %v5066_v0 }
 0xb50   :  { %4910 = vmatprep.subr.mxu0 %v3276_v41  ;;  %5025 = vmatprep.subr.mxu1 %v3276_v41 }
 0xb51   :  { %4911 = vmatpush3.msra.mxu0 %v3276_v41  ;;  %5041 = vmatpush3.msra.mxu1 %v3276_v41  ;;  %v5070_v41 = vtrunc.f32 %v6953_v24  ;;  %v5072_v24 = vtrunc.f32 %v6986_v38  ;;  %vm1785_vm4 = vcmp.eq.s32.totalorder %v5623_v17, %v5067_v3 }
 0xb52   :  { %4912 = vmatprep.subr.mxu0 %v3271_v14  ;;  %5026 = vmatprep.subr.mxu1 %v3271_v14 }
 0xb53   :  { %4913 = vmatpush3.msra.mxu0 %v3271_v14  ;;  %5042 = vmatpush3.msra.mxu1 %v3271_v14  ;;  %v5069_v14 = vcvt.f32.s32 %v5068_v6  ;;  %v5073_v38 = vcvt.f32.s32 %v5072_v24 }
 0xb54   :  { %4914 = vmatprep.subr.mxu0 %v3266_v34  ;;  %5027 = vmatprep.subr.mxu1 %v3266_v34 }
 0xb55   :  { %4915 = vmatpush3.msra.mxu0 %v3266_v34  ;;  %5043 = vmatpush3.msra.mxu1 %v3266_v34  ;;  %v3454_v34 = vld [vmem:[%s7215_s15 + $0x8] sm:$0xff]  ;;  %vm1786_vm11 = vcmp.eq.s32.totalorder %v5623_v17, %v5069_v14  ;;  %vm1788_vm15 = vcmp.eq.s32.totalorder %v5623_v17, %v5073_v38 }
 0xb56   :  { %4916 = vmatprep.subr.mxu0 %v3261_v30  ;;  %5028 = vmatprep.subr.mxu1 %v3261_v30 }
 0xb57   :  { %4917 = vmatpush3.msra.mxu0 %v3261_v30  ;;  %5044 = vmatpush3.msra.mxu1 %v3261_v30  ;;  %v5071_v30 = vcvt.f32.s32 %v5070_v41 }
 0xb58   :  { %4918 = vmatprep.subr.mxu0 %v3256_v35  ;;  %5029 = vmatprep.subr.mxu1 %v3256_v35 }
 0xb59   :  { %4919 = vmatpush3.msra.mxu0 %v3256_v35  ;;  %5045 = vmatpush3.msra.mxu1 %v3256_v35  ;;  %vm1787_vm13 = vcmp.eq.s32.totalorder %v5623_v17, %v5071_v30  ;;  %v3453_v17 = vld [vmem:[%s7215_s15] sm:$0xff] }
 0xb5a   :  { %4920 = vmatprep.subr.mxu0 %v3251_v7  ;;  %5030 = vmatprep.subr.mxu1 %v3251_v7 }
 0xb5b   :  { %4921 = vmatpush3.msra.mxu0 %v3251_v7  ;;  %5046 = vmatpush3.msra.mxu1 %v3251_v7 }
 0xb5c   :  { %4922 = vmatprep.subr.mxu0 %v3246_v52  ;;  %5031 = vmatprep.subr.mxu1 %v3246_v52 }
 0xb5d   :  { %4923 = vmatpush3.msra.mxu0 %v3246_v52  ;;  %5047 = vmatpush3.msra.mxu1 %v3246_v52 }
 0xb5e   :  { %4924 = vmatprep.subr.mxu0 %v3241_v44  ;;  %5032 = vmatprep.subr.mxu1 %v3241_v44 }
 0xb5f   :  { %4925 = vmatpush3.msra.mxu0 %v3241_v44  ;;  %5048 = vmatpush3.msra.mxu1 %v3241_v44 }
 0xb60   :  { %4926 = vmatprep.subr.mxu0 %v3236_v58  ;;  %5033 = vmatprep.subr.mxu1 %v3236_v58 }
 0xb61   :  { %4927 = vmatpush3.msra.mxu0 %v3236_v58  ;;  %5049 = vmatpush3.msra.mxu1 %v3236_v58 }
 0xb62   :  { %4928 = vmatprep.subr.mxu0 %v3231_v37  ;;  %5034 = vmatprep.subr.mxu1 %v3231_v37 }
 0xb63   :  { %4929 = vmatpush3.msra.mxu0 %v3231_v37  ;;  %5050 = vmatpush3.msra.mxu1 %v3231_v37 }
 0xb64   :  { %4930 = vmatprep.subr.mxu0 %v3226_v39  ;;  %5035 = vmatprep.subr.mxu1 %v3226_v39 }
 0xb65   :  { %4931 = vmatpush3.msra.mxu0 %v3226_v39  ;;  %5051 = vmatpush3.msra.mxu1 %v3226_v39 }
 0xb66   :  { %4933 = vmatmul.mubr.msk.f32.vlgmr.msra.gmra.mxu0 %vm1780_vm3, %v5095_v1  ;;  %4948 = vmatmul.mubr.msk.f32.vlgmr.msra.gmra.mxu1 %vm1790_vm7, %v5095_v1  ;;  %vm7453_vm3 = vmmov %vm7451_vm0 }
 0xb67   :  { %4935 = vmatprep.mubr.msk.f32.mxu0 %vm1781_vm6, %v5095_v1  ;;  %4950 = vmatprep.mubr.msk.f32.mxu1 %vm1791_vm14, %v5095_v1  ;;  %vm7454_vm6 = vmmov %vm7451_vm0 }
 0xb68   :  { %4988 = vmatprep.subr.mxu0 %v3452_v27  ;;  %4956 = vmatprep.subr.mxu1 %v3456_v9  ;;  %vm7455_vm7 = vmmov %vm7451_vm0 }
 0xb69   :  { %4989 = vmatpush3.msra.mxu0 %v3452_v27  ;;  %4957 = vmatpush3.msra.mxu1 %v3456_v9  ;;  %vm7456_vm14 = vmmov %vm7451_vm0 }
 0xb6a   :  { %4936 = vmatmul.mubr.msk.f32.gmra.mxu0 %vm1782_vm8, %v5095_v1  ;;  %4951 = vmatmul.mubr.msk.f32.gmra.mxu1 %vm1792_vm2, %v5095_v1  ;;  %vm7457_vm8 = vmmov %vm7451_vm0 }
 0xb6b   :  { %4938 = vmatprep.mubr.msk.f32.mxu0 %vm1783_vm12, %v5095_v1  ;;  %4953 = vmatprep.mubr.msk.f32.mxu1 %vm1793_vm1, %v5095_v1  ;;  %vm7458_vm2 = vmmov %vm7451_vm0 }
 0xb6c   :  { %4990 = vmatprep.subr.mxu0 %v3451_v57  ;;  %4958 = vmatprep.subr.mxu1 %v3455_v43  ;;  %vm7459_vm12 = vmmov %vm7451_vm0 }
 0xb6d   :  { %4991 = vmatpush3.msra.mxu0 %v3451_v57  ;;  %4959 = vmatpush3.msra.mxu1 %v3455_v43  ;;  %vm7460_vm1 = vmmov %vm7451_vm0 }
 0xb6e   :  { %4939 = vmatmul.mubr.msk.f32.gmra.mxu0 %vm1784_vm10, %v5095_v1  ;;  %4954 = vmatmul.mubr.msk.f32.gmra.mxu1 %vm1794_vm9, %v5095_v1  ;;  %vm7461_vm10 = vmmov %vm7451_vm0 }
 0xb6f   :  { %4941 = vmatprep.mubr.msk.f32.mxu0 %vm1785_vm4, %v5095_v1  ;;  %4992 = vmatprep.subr.mxu0 %v3450_v15  ;;  %vm7462_vm9 = vmmov %vm7451_vm0 }
 0xb70   :  { %4993 = vmatpush3.msra.mxu0 %v3450_v15  ;;  %4960 = vmatprep.subr.mxu1 %v3454_v34  ;;  %vm7463_vm4 = vmmov %vm7451_vm0 }
 0xb71   :  { %4994 = vmatprep.subr.mxu0 %v3449_v42  ;;  %4961 = vmatpush3.msra.mxu1 %v3454_v34 }
 0xb72   :  { %4942 = vmatmul.mubr.msk.f32.gmra.mxu0 %vm1786_vm11, %v5095_v1  ;;  %vm7464_vm11 = vmmov %vm7451_vm0  ;;  %4962 = vmatprep.subr.mxu1 %v3453_v17 }
 0xb73   :  { %4944 = vmatprep.mubr.msk.f32.mxu0 %vm1787_vm13, %v5095_v1  ;;  %4995 = vmatpush3.msra.mxu0 %v3449_v42  ;;  %vm7465_vm13 = vmmov %vm7451_vm0 }
 0xb74   :  { %4963 = vmatpush3.msra.mxu1 %v3453_v17 }
 0xb76   :  { %4945 = vmatmul.mubr.msk.f32.gmra.mxu0 %vm1788_vm15, %v5095_v1  ;;  %vm7466_vm15 = vmmov %vm7451_vm0 }
 0xb77   :  { %4996 = vmatprep.mubr.msk.f32.mxu0 %vm7451_vm0, %v7419_v60 }
 0xb7a   :  { %4997 = vmatmul.mubr.msk.f32.vlgmr.msra.gmra.mxu0 %vm7452_vm5, %v7418_v16  ;;  %vm7467_vm5 = vmmov %vm7451_vm0 }
 0xb7b   :  { %4999 = vmatprep.mubr.msk.f32.mxu0 %vm7453_vm3, %v7417_v45  ;;  %vm7468_vm3 = vmmov %vm7451_vm0 }
 0xb7e   :  { %5000 = vmatmul.mubr.msk.f32.gmra.mxu0 %vm7454_vm6, %v7416_v55  ;;  %vm7469_vm6 = vmmov %vm7451_vm0 }
 0xb7f   :  { %5002 = vmatprep.mubr.msk.f32.mxu0 %vm7455_vm7, %v7415_v21  ;;  %vm7470_vm7 = vmmov %vm7451_vm0 }
 0xb82   :  { %5003 = vmatmul.mubr.msk.f32.gmra.mxu0 %vm7456_vm14, %v7414_v36  ;;  %vm7471_vm14 = vmmov %vm7451_vm0 }
 0xb83   :  { %5005 = vmatprep.mubr.msk.f32.mxu0 %vm7457_vm8, %v7413_v46  ;;  %vm7472_vm8 = vmmov %vm7451_vm0 }
 0xb86   :  { %5006 = vmatmul.mubr.msk.f32.gmra.mxu0 %vm7458_vm2, %v7412_v59  ;;  %vm7473_vm2 = vmmov %vm7451_vm0 }
 0xb87   :  { %5008 = vmatprep.mubr.msk.f32.mxu0 %vm7459_vm12, %v7411_v32  ;;  %vm7474_vm12 = vmmov %vm7451_vm0 }
 0xb8a   :  { %5009 = vmatmul.mubr.msk.f32.gmra.mxu0 %vm7460_vm1, %v7410_v23  ;;  %vm7475_vm1 = vmmov %vm7451_vm0 }
 0xb8b   :  { %5011 = vmatprep.mubr.msk.f32.mxu0 %vm7461_vm10, %v7409_v22  ;;  %vm7476_vm10 = vmmov %vm7451_vm0 }
 0xb8e   :  { %5012 = vmatmul.mubr.msk.f32.gmra.mxu0 %vm7462_vm9, %v7408_v8  ;;  %vm7477_vm9 = vmmov %vm7451_vm0 }
 0xb8f   :  { %5014 = vmatprep.mubr.msk.f32.mxu0 %vm7463_vm4, %v7407_v13  ;;  %vm7478_vm4 = vmmov %vm7451_vm0 }
 0xb92   :  { %5015 = vmatmul.mubr.msk.f32.gmra.mxu0 %vm7464_vm11, %v7406_v49  ;;  %vm7479_vm11 = vmmov %vm7451_vm0 }
 0xb93   :  { %5017 = vmatprep.mubr.msk.f32.mxu0 %vm7465_vm13, %v7405_v12  ;;  %vm7480_vm13 = vmmov %vm7451_vm0 }
 0xb96   :  { %5018 = vmatmul.mubr.msk.f32.gmra.mxu0 %vm7466_vm15, %v7404_v29  ;;  %vm7481_vm15 = vmmov %vm7451_vm0 }
 0xc26   :  { %v4934_v1 = vpop.f32.mrf.mxu0  ;;  %v4949_v12 = vpop.f32.mrf.mxu1 }
 0xc28   :  { %v3370_v8 = vpop.f32.mrf.mxu0  ;;  %v3420_v23 = vpop.f32.mrf.mxu1 }
 0xc29   :  { %4964 = vmatprep.mubr.msk.f32.mxu1 %vm7451_vm0, %v3370_v8 }
 0xc2a   :  { %v4937_v13 = vpop.f32.mrf.mxu0  ;;  %4965 = vmatmul.mubr.msk.f32.vlgmr.msra.gmra.mxu1 %vm7467_vm5, %v4934_v1  ;;  %v4952_v46 = vpop.f32.mrf.mxu1  ;;  %vm7482_vm5 = vmmov %vm7451_vm0 }
 0xc2c   :  { %v3380_v49 = vpop.f32.mrf.mxu0  ;;  %v3430_v55 = vpop.f32.mrf.mxu1 }
 0xc2d   :  { %4967 = vmatprep.mubr.msk.f32.mxu1 %vm7468_vm3, %v3380_v49  ;;  %vm7483_vm3 = vmmov %vm7451_vm0 }
 0xc2e   :  { %v4940_v22 = vpop.f32.mrf.mxu0  ;;  %4968 = vmatmul.mubr.msk.f32.gmra.mxu1 %vm7469_vm6, %v4937_v13  ;;  %v4955_v45 = vpop.f32.mrf.mxu1  ;;  %vm7484_vm6 = vmmov %vm7451_vm0 }
 0xc30   :  { %v3390_v29 = vpop.f32.mrf.mxu0  ;;  %v3440_v16 = vpop.f32.mrf.mxu1 }
 0xc31   :  { %4970 = vmatprep.mubr.msk.f32.mxu1 %vm7470_vm7, %v3390_v29  ;;  %vm7485_vm7 = vmmov %vm7451_vm0 }
 0xc32   :  { %v4943_v32 = vpop.f32.mrf.mxu0  ;;  %4971 = vmatmul.mubr.msk.f32.gmra.mxu1 %vm7471_vm14, %v4940_v22  ;;  %vm7486_vm14 = vmmov %vm7451_vm0 }
 0xc34   :  { %v3400_v59 = vpop.f32.mrf.mxu0 }
 0xc35   :  { %4973 = vmatprep.mubr.msk.f32.mxu1 %vm7472_vm8, %v3400_v59  ;;  %vm7487_vm8 = vmmov %vm7451_vm0 }
 0xc36   :  { %v4946_v36 = vpop.f32.mrf.mxu0  ;;  %4974 = vmatmul.mubr.msk.f32.gmra.mxu1 %vm7473_vm2, %v4943_v32  ;;  %vm7488_vm2 = vmmov %vm7451_vm0 }
 0xc38   :  { %v3410_v21 = vpop.f32.mrf.mxu0 }
 0xc39   :  { %4976 = vmatprep.mubr.msk.f32.mxu1 %vm7474_vm12, %v3410_v21  ;;  %vm7489_vm12 = vmmov %vm7451_vm0 }
 0xc3a   :  { %4977 = vmatmul.mubr.msk.f32.gmra.mxu1 %vm7475_vm1, %v4946_v36  ;;  %v4998_v60 = vpop.f32.mrf.mxu0  ;;  %vm7490_vm1 = vmmov %vm7451_vm0 }
 0xc3b   :  { %4979 = vmatprep.mubr.msk.f32.mxu1 %vm7476_vm10, %v3420_v23  ;;  %vm7491_vm10 = vmmov %vm7451_vm0 }
 0xc3c   :  { %v3716_v35 = vpop.f32.mrf.mxu0 }
 0xc3e   :  { %4980 = vmatmul.mubr.msk.f32.gmra.mxu1 %vm7477_vm9, %v4949_v12  ;;  %v5001_v7 = vpop.f32.mrf.mxu0  ;;  %vm7492_vm9 = vmmov %vm7451_vm0 }
 0xc3f   :  { %4982 = vmatprep.mubr.msk.f32.mxu1 %vm7478_vm4, %v3430_v55  ;;  %vm7493_vm4 = vmmov %vm7451_vm0 }
 0xc40   :  { %v3726_v4 = vpop.f32.mrf.mxu0 }
 0xc42   :  { %4983 = vmatmul.mubr.msk.f32.gmra.mxu1 %vm7479_vm11, %v4952_v46  ;;  %v5004_v52 = vpop.f32.mrf.mxu0  ;;  %vm7494_vm11 = vmmov %vm7451_vm0 }
 0xc43   :  { %4985 = vmatprep.mubr.msk.f32.mxu1 %vm7480_vm13, %v3440_v16  ;;  %vm7495_vm13 = vmmov %vm7451_vm0 }
 0xc44   :  { %v3736_v11 = vpop.f32.mrf.mxu0 }
 0xc46   :  { %4986 = vmatmul.mubr.msk.f32.gmra.mxu1 %vm7481_vm15, %v4955_v45  ;;  %v5007_v63 = vpop.f32.mrf.mxu0  ;;  %vm7496_vm15 = vmmov %vm7451_vm0 }
 0xc48   :  { %v3746_v44 = vpop.f32.mrf.mxu0 }
 0xc4a   :  { %v5010_v58 = vpop.f32.mrf.mxu0 }
 0xc4c   :  { %v3756_v47 = vpop.f32.mrf.mxu0 }
 0xc4e   :  { %v5013_v48 = vpop.f32.mrf.mxu0 }
 0xc50   :  { %v3766_v25 = vpop.f32.mrf.mxu0 }
 0xc52   :  { %v5016_v41 = vpop.f32.mrf.mxu0 }
 0xc54   :  { %v3776_v38 = vpop.f32.mrf.mxu0 }
 0xc56   :  { %v5019_v22 = vpop.f32.mrf.mxu0 }
 0xc58   :  { %v3786_v21 = vpop.f32.mrf.mxu0 }
 0xcea   :  { %v4966_v26 = vpop.f32.mrf.mxu1 }
 0xceb   :  { %v3722_v62 = vadd.f32 %v4998_v60, %v4966_v26 }
 0xcec   :  { %v3571_v2 = vpop.f32.mrf.mxu1 }
 0xced   :  { %v3803_v51 = vadd.f32 %v7118_v56, %v3722_v62  ;;  %v3717_v31 = vadd.f32 %v3716_v35, %v3571_v2 }
 0xcee   :  { %v4969_v37 = vpop.f32.mrf.mxu1 }
 0xcef   :  { %3819 = vst.msk [vmem:[%s7217_s17 + $0x8] sm:$0xff] %vm7451_vm0, %v3803_v51  ;;  %v3802_v40 = vadd.f32 %v7118_v56, %v3717_v31  ;;  %v3732_v19 = vadd.f32 %v5001_v7, %v4969_v37 }
 0xcf0   :  { %v3581_v5 = vpop.f32.mrf.mxu1 }
 0xcf1   :  { %3818 = vst.msk [vmem:[%s7217_s17] sm:$0xff] %vm7482_vm5, %v3802_v40  ;;  %v3805_v20 = vadd.f32 %v7118_v56, %v3732_v19  ;;  %v3727_v10 = vadd.f32 %v3726_v4, %v3581_v5 }
 0xcf2   :  { %v4972_v54 = vpop.f32.mrf.mxu1 }
 0xcf3   :  { %3821 = vst.msk [vmem:[%s7217_s17 + $0x18] sm:$0xff] %vm7483_vm3, %v3805_v20  ;;  %v3804_v39 = vadd.f32 %v7118_v56, %v3727_v10  ;;  %v3742_v50 = vadd.f32 %v5004_v52, %v4972_v54 }
 0xcf4   :  { %v3591_v28 = vpop.f32.mrf.mxu1 }
 0xcf5   :  { %3820 = vst.msk [vmem:[%s7217_s17 + $0x10] sm:$0xff] %vm7484_vm6, %v3804_v39  ;;  %v3807_v18 = vadd.f32 %v7118_v56, %v3742_v50  ;;  %v3737_v27 = vadd.f32 %v3736_v11, %v3591_v28 }
 0xcf6   :  { %v4975_v9 = vpop.f32.mrf.mxu1 }
 0xcf7   :  { %3823 = vst.msk [vmem:[%s7217_s17 + $0x28] sm:$0xff] %vm7485_vm7, %v3807_v18  ;;  %v3806_v53 = vadd.f32 %v7118_v56, %v3737_v27  ;;  %v3752_v0 = vadd.f32 %v5007_v63, %v4975_v9 }
 0xcf8   :  { %v3601_v33 = vpop.f32.mrf.mxu1 }
 0xcf9   :  { %3822 = vst.msk [vmem:[%s7217_s17 + $0x20] sm:$0xff] %vm7486_vm14, %v3806_v53  ;;  %v3809_v6 = vadd.f32 %v7118_v56, %v3752_v0  ;;  %v3747_v61 = vadd.f32 %v3746_v44, %v3601_v33 }
 0xcfa   :  { %v4978_v57 = vpop.f32.mrf.mxu1 }
 0xcfb   :  { %3825 = vst.msk [vmem:[%s7217_s17 + $0x38] sm:$0xff] %vm7487_vm8, %v3809_v6  ;;  %v3808_v43 = vadd.f32 %v7118_v56, %v3747_v61  ;;  %v3762_v3 = vadd.f32 %v5010_v58, %v4978_v57 }
 0xcfc   :  { %v3611_v15 = vpop.f32.mrf.mxu1 }
 0xcfd   :  { %3824 = vst.msk [vmem:[%s7217_s17 + $0x30] sm:$0xff] %vm7488_vm2, %v3808_v43  ;;  %v3811_v14 = vadd.f32 %v7118_v56, %v3762_v3  ;;  %v3757_v24 = vadd.f32 %v3756_v47, %v3611_v15 }
 0xcfe   :  { %v4981_v34 = vpop.f32.mrf.mxu1 }
 0xcff   :  { %3827 = vst.msk [vmem:[%s7217_s17 + $0x48] sm:$0xff] %vm7489_vm12, %v3811_v14  ;;  %v3810_v30 = vadd.f32 %v7118_v56, %v3757_v24  ;;  %v3772_v42 = vadd.f32 %v5013_v48, %v4981_v34 }
 0xd00   :  { %v3621_v17 = vpop.f32.mrf.mxu1 }
 0xd01   :  { %3826 = vst.msk [vmem:[%s7217_s17 + $0x40] sm:$0xff] %vm7490_vm1, %v3810_v30  ;;  %v3813_v1 = vadd.f32 %v7118_v56, %v3772_v42  ;;  %v3767_v8 = vadd.f32 %v3766_v25, %v3621_v17 }
 0xd02   :  { %v4984_v13 = vpop.f32.mrf.mxu1 }
 0xd03   :  { %3829 = vst.msk [vmem:[%s7217_s17 + $0x58] sm:$0xff] %vm7491_vm10, %v3813_v1  ;;  %v3812_v49 = vadd.f32 %v7118_v56, %v3767_v8  ;;  %v3782_v12 = vadd.f32 %v5016_v41, %v4984_v13 }
 0xd04   :  { %v3631_v29 = vpop.f32.mrf.mxu1 }
 0xd05   :  { %3828 = vst.msk [vmem:[%s7217_s17 + $0x50] sm:$0xff] %vm7492_vm9, %v3812_v49  ;;  %v3815_v23 = vadd.f32 %v7118_v56, %v3782_v12  ;;  %v3777_v32 = vadd.f32 %v3776_v38, %v3631_v29 }
 0xd06   :  { %v4987_v59 = vpop.f32.mrf.mxu1 }
 0xd07   :  { %3831 = vst.msk [vmem:[%s7217_s17 + $0x68] sm:$0xff] %vm7493_vm4, %v3815_v23  ;;  %v3814_v46 = vadd.f32 %v7118_v56, %v3777_v32  ;;  %v3792_v36 = vadd.f32 %v5019_v22, %v4987_v59 }
 0xd08   :  { %v3641_v55 = vpop.f32.mrf.mxu1 }
 0xd09   :  { %3830 = vst.msk [vmem:[%s7217_s17 + $0x60] sm:$0xff] %vm7494_vm11, %v3814_v46  ;;  %v3817_v45 = vadd.f32 %v7118_v56, %v3792_v36  ;;  %v3787_v16 = vadd.f32 %v3786_v21, %v3641_v55 }
 0xd0b   :  { %3833 = vst.msk [vmem:[%s7217_s17 + $0x78] sm:$0xff] %vm7495_vm13, %v3817_v45  ;;  %v3816_v60 = vadd.f32 %v7118_v56, %v3787_v16 }
 0xd0d   :  { %3832 = vst.msk [vmem:[%s7217_s17 + $0x70] sm:$0xff] %vm7496_vm15, %v3816_v60 }

</bundles_post_ra>
